<compile_context>
chip_gen: v6e
topology: v6e:2x2x1
jax: 0.10.0
libtpu: 0.0.40
codegen_flags: <defaults>
</compile_context>

<pallas_src>
import functools

import jax
import jax.numpy as jnp
from jax.experimental import pallas as pl
from jax.experimental.pallas import tpu as pltpu


# ----------------------------------------------------------------------------
# The fused kernel: everything lives in VMEM / vregs.
# ----------------------------------------------------------------------------

def _img_text_trans_kernel(
    # activations
    text_ref, img_ref,
    # TextEncoder (Linear + ReLU model)
    te_w_ref, te_b_ref,
    # co-attention: per-head q/k/v projections (scale folded into q), out-proj
    co_qkv_w_ref, co_qkv_b_ref, co_o_w_ref, co_o_b_ref,
    # stacked encoder layers (img layers [0, n_img), text layers [n_img, ...))
    vo_w_ref, w1_ref, b1_ref, w2_ref, vecs_ref,
    # classifier (pre-split: [0] multiplies text branch, [1] the img branch)
    fc_w_ref, fc_b_ref,
    # output
    o_ref,
    *, num_heads, n_img_layers, n_text_layers, eps):
    f32 = jnp.float32

    def layer_norm(y, g, b):
        mu = jnp.mean(y, axis=-1, keepdims=True)
        var = jnp.mean(jnp.square(y - mu), axis=-1, keepdims=True)
        return (y - mu) * jax.lax.rsqrt(var + eps) * g + b

    # ---- TextEncoder: Linear(text_len -> E) + ReLU --------------------------
    text_feat = jnp.dot(text_ref[...], te_w_ref[...], preferred_element_type=f32)
    text_feat = jnp.maximum(text_feat + te_b_ref[...], 0.0)          # (B, E)

    B = text_feat.shape[0]
    H = num_heads

    # ---- co_attention(text_input, img_input, img_input), Lq == 1 ------------
    # img rows are the raw .view(S, B, C) rows flattened in (s, b) order.
    img = img_ref[...]                                                # (S*B, E)
    SB = img.shape[0]

    # Cross-batch additive mask built in-kernel (no (B, S*B) f32 input):
    # kv row r belongs to batch r % B; cross-batch pairs get -1e30.
    col_b = jax.lax.broadcasted_iota(jnp.int32, (B, SB), 1) % B
    row_b = jax.lax.broadcasted_iota(jnp.int32, (B, SB), 0)
    bias = jnp.where(col_b == row_b, 0.0, -1e30).astype(f32)          # (B, S*B)

    attn = None
    for h in range(H):                                                # unrolled, H tiny
        # Per-head projections fall straight out of pre-split weights:
        # no lane-axis slicing anywhere.  1/sqrt(dh) already folded into q.
        q_h = jnp.dot(text_feat, co_qkv_w_ref[0, h],
                      preferred_element_type=f32) + co_qkv_b_ref[0, h]    # (B, dh)
        k_h = jnp.dot(img, co_qkv_w_ref[1, h],
                      preferred_element_type=f32) + co_qkv_b_ref[1, h]    # (S*B, dh)
        v_h = jnp.dot(img, co_qkv_w_ref[2, h],
                      preferred_element_type=f32) + co_qkv_b_ref[2, h]    # (S*B, dh)
        s = jax.lax.dot_general(q_h, k_h, (((1,), (1,)), ((), ())),
                                preferred_element_type=f32) + bias        # (B, S*B)
        m = jnp.max(s, axis=-1, keepdims=True)
        p = jnp.exp(s - m)
        p = p * pl.reciprocal(jnp.sum(p, axis=-1, keepdims=True), approx=True)
        o_h = jnp.dot(p, v_h, preferred_element_type=f32)                 # (B, dh)
        # concat(heads) @ Wo == sum_h o_h @ Wo_h  (Wo pre-split as (H, dh, E))
        contrib = jnp.dot(o_h, co_o_w_ref[h], preferred_element_type=f32)
        attn = contrib if attn is None else attn + contrib
    x_img = attn + co_o_b_ref[...]                                    # (B, E) == img_co (Lq = 1)

    # ---- nn.TransformerEncoderLayer (post-norm, relu, dropout = identity) ---
    # L == 1: SelfAttn(x) == out_proj(v_proj(x)) == x @ vo_w + vo_b (folded at
    # init).  vecs_ref rows: 0 vo_b, 1 b2, 2 ln1_g, 3 ln1_b, 4 ln2_g, 5 ln2_b.
    def encoder_layer(x, l):
        a_l = jnp.dot(x, vo_w_ref[l], preferred_element_type=f32) + vecs_ref[l, 0:1, :]
        x = layer_norm(x + a_l, vecs_ref[l, 2:3, :], vecs_ref[l, 3:4, :])
        ff = jnp.maximum(jnp.dot(x, w1_ref[l], preferred_element_type=f32) + b1_ref[l], 0.0)
        ff = jnp.dot(ff, w2_ref[l], preferred_element_type=f32) + vecs_ref[l, 1:2, :]
        return layer_norm(x + ff, vecs_ref[l, 4:5, :], vecs_ref[l, 5:6, :])

    x = x_img
    for l in range(n_img_layers):                                     # img_transformer (4 layers)
        x = encoder_layer(x, l)
    y = text_feat
    for l in range(n_text_layers):                                    # text_transformer (3 layers)
        y = encoder_layer(y, n_img_layers + l)

    # ---- fusion = cat([text_trans, img_trans], -1).squeeze(0); fc; sigmoid --
    # Concat removed: split classifier, logits = y @ Wy + x @ Wx + b.
    logits = (jnp.dot(y, fc_w_ref[0], preferred_element_type=f32)
              + jnp.dot(x, fc_w_ref[1], preferred_element_type=f32)
              + fc_b_ref[...])
    o_ref[...] = jax.nn.sigmoid(logits).astype(o_ref.dtype)


# ----------------------------------------------------------------------------
# Wrapper: one pallas_call, no grid, all operands fully VMEM-resident.
# ----------------------------------------------------------------------------

def img_text_trans_forward(params, img_features, text, *, num_heads=2,
                           n_img_layers=4, n_text_layers=3):
    B, C, S = img_features.shape
    E = C
    assert E % num_heads == 0

    # torch: img_features.contiguous().view(S, B, C) -> raw memory-order
    # reshape (NOT a transpose); flattened to (S*B, E) rows in (s, b) order —
    # a metadata-only reshape, no data movement.
    img2 = img_features.reshape(S * B, E)

    kernel = functools.partial(
        _img_text_trans_kernel, num_heads=num_heads,
        n_img_layers=n_img_layers, n_text_layers=n_text_layers, eps=1e-5)

    args = (
        text, img2,
        params["te_w"], params["te_b"],
        params["co_qkv_w"], params["co_qkv_b"],
        params["co_o_w"], params["co_o_b"],
        params["lyr_vo_w"], params["lyr_w1"], params["lyr_b1"],
        params["lyr_w2"], params["lyr_vecs"],
        params["fc_w"], params["fc_b"],
    )
    vmem = pl.BlockSpec(memory_space=pltpu.MemorySpace.VMEM)
    # TODO(synk): at real E/FF sizes add a grid axis over encoder layers with a
    # BlockSpec index_map on the stacked (n_layers, ...) weight arrays (weight
    # streaming for v7x's 64 MiB VMEM) plus a parallel batch-tile axis, and set
    # pltpu.CompilerParams(dimension_semantics=..., vmem_limit_bytes=...).
    return pl.pallas_call(
        kernel,
        out_shape=jax.ShapeDtypeStruct((B, 1), jnp.float32),
        in_specs=[vmem] * len(args),
        out_specs=vmem,
    )(*args)


# ----------------------------------------------------------------------------
# Pure-JAX reference (same math, plain XLA) for a correctness cross-check.
# Uses the natural per-batch (S keys) formulation to validate the in-kernel
# static cross-batch mask and the (s, b) row ordering.
# ----------------------------------------------------------------------------

def _reference_forward(params, img_features, text, *, num_heads=2,
                       n_img_layers=4, n_text_layers=3, eps=1e-5):
    B, C, S = img_features.shape
    E, H = C, num_heads
    dh = E // H
    tf_ = jax.nn.relu(text @ params["te_w"] + params["te_b"])          # (B, E)
    img2 = img_features.reshape(S * B, E)                              # (s, b) rows

    qw, kw, vw = params["co_qkv_w"][0], params["co_qkv_w"][1], params["co_qkv_w"][2]
    qb, kb, vb = params["co_qkv_b"][0], params["co_qkv_b"][1], params["co_qkv_b"][2]
    attn = jnp.zeros((B, E), jnp.float32)
    for h in range(H):
        q_h = tf_ @ qw[h] + qb[h]                                      # (B, dh), scale folded
        k_h = (img2 @ kw[h] + kb[h]).reshape(S, B, dh)
        v_h = (img2 @ vw[h] + vb[h]).reshape(S, B, dh)
        s = jnp.einsum("bd,sbd->bs", q_h, k_h)                         # (B, S)
        p = jax.nn.softmax(s, axis=-1)
        o_h = jnp.einsum("bs,sbd->bd", p, v_h)                         # (B, dh)
        attn = attn + o_h @ params["co_o_w"][h]
    x_img = attn + params["co_o_b"]

    def ln(y, g, b):
        mu = y.mean(-1, keepdims=True)
        var = ((y - mu) ** 2).mean(-1, keepdims=True)
        return (y - mu) / jnp.sqrt(var + eps) * g + b

    def layer(x, l):
        vecs = params["lyr_vecs"][l]
        a_l = x @ params["lyr_vo_w"][l] + vecs[0]
        x = ln(x + a_l, vecs[2], vecs[3])
        ff = jax.nn.relu(x @ params["lyr_w1"][l] + params["lyr_b1"][l])
        ff = ff @ params["lyr_w2"][l] + vecs[1]
        return ln(x + ff, vecs[4], vecs[5])

    x = x_img
    for l in range(n_img_layers):
        x = layer(x, l)
    y = tf_
    for l in range(n_text_layers):
        y = layer(y, n_img_layers + l)
    logits = y @ params["fc_w"][0] + x @ params["fc_w"][1] + params["fc_b"]
    return jax.nn.sigmoid(logits)


# ----------------------------------------------------------------------------
# Deterministic synthetic parameters, stored directly in compute layout:
#   * all weight matrices are (K, N) (PyTorch's weight.T),
#   * co-attention q/k/v weights pre-split per head (3, H, E, dh) with the
#     1/sqrt(dh) scale folded into the q projection,
#   * co-attention out-projection pre-split per head (H, dh, E),
#   * each encoder layer's v_proj∘out_proj folded into one (E, E) linear,
#   * per-layer (1, E) bias / LayerNorm vectors packed into (n_layers, 6, E),
#   * classifier weight pre-split into (2, E, 1).
# ----------------------------------------------------------------------------

def init_params(key, E, text_len, ff, num_heads=2, n_img_layers=4, n_text_layers=3):
    H = num_heads
    dh = E // H
    n_layers = n_img_layers + n_text_layers
    keys = iter(jax.random.split(key, 16))

    def nrm(shape, scale=0.05):
        return scale * jax.random.normal(next(keys), shape, jnp.float32)

    scale = float(dh) ** -0.5
    co_qkv_w = nrm((3, H, E, dh))
    co_qkv_b = jnp.zeros((3, H, 1, dh), jnp.float32)
    # Fold 1/sqrt(dh) into the q projection (weights and bias).
    co_qkv_w = co_qkv_w.at[0].multiply(scale)
    co_qkv_b = co_qkv_b.at[0].multiply(scale)

    # Packed per-layer vectors: 0 vo_b, 1 b2, 2 ln1_g, 3 ln1_b, 4 ln2_g, 5 ln2_b.
    lyr_vecs = jnp.zeros((n_layers, 6, E), jnp.float32)
    lyr_vecs = lyr_vecs.at[:, 2, :].set(1.0)   # ln1 gamma
    lyr_vecs = lyr_vecs.at[:, 4, :].set(1.0)   # ln2 gamma

    return dict(
        # TextEncoder (Linear + ReLU model)
        te_w=nrm((text_len, E)), te_b=jnp.zeros((1, E), jnp.float32),
        # co-attention
        co_qkv_w=co_qkv_w, co_qkv_b=co_qkv_b,
        co_o_w=nrm((H, dh, E)), co_o_b=jnp.zeros((1, E), jnp.float32),
        # stacked nn.TransformerEncoderLayer params; with L == 1 the q/k
        # projections provably cancel and v_proj∘out_proj is one linear (vo_w).
        lyr_vo_w=nrm((n_layers, E, E)),
        lyr_w1=nrm((n_layers, E, ff)),
        lyr_b1=jnp.zeros((n_layers, 1, ff), jnp.float32),
        lyr_w2=nrm((n_layers, ff, E)),
        lyr_vecs=lyr_vecs,
        # fc = Linear(2*in_dim, 1), stored pre-split: [0] text rows, [1] img rows
        fc_w=nrm((2, E, 1)), fc_b=jnp.zeros((1, 1), jnp.float32),
    )


# ----------------------------------------------------------------------------

if __name__ == "__main__":
    # Small shapes consistent with the forward:
    #   in_dim = d_model = embed_dim = 32, nhead = 2, text_len = 16,
    #   dim_feedforward shrunk 1024 -> 64, fc = Linear(2*in_dim, 1).
    B, E, S, TEXT_LEN, FF, NHEAD = 2, 32, 8, 16, 64, 2

    root = jax.random.PRNGKey(0)
    k_img, k_txt, k_par = jax.random.split(root, 3)

    img_features = jax.random.normal(k_img, (B, E, S), jnp.float32)    # (B, C, S)
    text = jax.random.normal(k_txt, (B, TEXT_LEN), jnp.float32)        # (B, text_len)
    params = init_params(k_par, E, TEXT_LEN, FF, num_heads=NHEAD)

    fwd = jax.jit(functools.partial(img_text_trans_forward, num_heads=NHEAD))
    out = jax.block_until_ready(fwd(params, img_features, text))

    assert out.shape == (B, 1)
    assert bool(jnp.all((out >= 0.0) & (out <= 1.0)))

    ref = _reference_forward(params, img_features, text, num_heads=NHEAD)
    assert bool(jnp.allclose(out, ref, atol=1e-2, rtol=1e-2)), (out, ref)

    print("KERNEL_OK")
</pallas_src>

<mosaic_0001>
module attributes {stable_mosaic.version = 11 : i64} {
  func.func @_img_text_trans_kernel(%arg0: memref<2x16xf32, #tpu.memory_space<vmem>>, %arg1: memref<16x32xf32, #tpu.memory_space<vmem>>, %arg2: memref<16x32xf32, #tpu.memory_space<vmem>>, %arg3: memref<1x32xf32, #tpu.memory_space<vmem>>, %arg4: memref<3x2x32x16xf32, #tpu.memory_space<vmem>>, %arg5: memref<3x2x1x16xf32, #tpu.memory_space<vmem>>, %arg6: memref<2x16x32xf32, #tpu.memory_space<vmem>>, %arg7: memref<1x32xf32, #tpu.memory_space<vmem>>, %arg8: memref<7x32x32xf32, #tpu.memory_space<vmem>>, %arg9: memref<7x32x64xf32, #tpu.memory_space<vmem>>, %arg10: memref<7x1x64xf32, #tpu.memory_space<vmem>>, %arg11: memref<7x64x32xf32, #tpu.memory_space<vmem>>, %arg12: memref<7x6x32xf32, #tpu.memory_space<vmem>>, %arg13: memref<2x32x1xf32, #tpu.memory_space<vmem>>, %arg14: memref<1x1xf32, #tpu.memory_space<vmem>>, %arg15: memref<2x1xf32, #tpu.memory_space<vmem>>) attributes {dimension_semantics = [], scalar_prefetch = 0 : i64, scratch_operands = 0 : i64, tpu.core_type = #tpu.core_type<tc>} {
    %c0 = arith.constant 0 : index
    %c0_0 = arith.constant 0 : index
    %0 = vector.load %arg0[%c0, %c0_0] : memref<2x16xf32, #tpu.memory_space<vmem>>, vector<2x16xf32>
    %c0_1 = arith.constant 0 : index
    %c0_2 = arith.constant 0 : index
    %1 = vector.load %arg2[%c0_1, %c0_2] : memref<16x32xf32, #tpu.memory_space<vmem>>, vector<16x32xf32>
    %cst = arith.constant dense<0.000000e+00> : vector<2x32xf32>
    %2 = tpu.matmul %0, %1, %cst {dimension_numbers = #tpu.dot_dimension_numbers<[1], [0], [0], [1], [0, 0, 1, 1], [], []>} : vector<2x16xf32>, vector<16x32xf32>, vector<2x32xf32> -> vector<2x32xf32>
    %c0_3 = arith.constant 0 : index
    %c0_4 = arith.constant 0 : index
    %3 = vector.load %arg3[%c0_3, %c0_4] : memref<1x32xf32, #tpu.memory_space<vmem>>, vector<1x32xf32>
    %4 = vector.broadcast %3 : vector<1x32xf32> to vector<2x32xf32>
    %5 = arith.addf %2, %4 : vector<2x32xf32>
    %cst_5 = arith.constant 0.000000e+00 : f32
    %6 = vector.broadcast %cst_5 : f32 to vector<2x32xf32>
    %7 = arith.maximumf %5, %6 : vector<2x32xf32>
    %c0_6 = arith.constant 0 : index
    %c0_7 = arith.constant 0 : index
    %8 = vector.load %arg1[%c0_6, %c0_7] : memref<16x32xf32, #tpu.memory_space<vmem>>, vector<16x32xf32>
    %9 = tpu.iota {dimensions = array<i32: 1>} : vector<2x16xi32>
    %c2_i32 = arith.constant 2 : i32
    %c0_i32 = arith.constant 0 : i32
    %10 = arith.cmpi eq, %c2_i32, %c0_i32 : i32
    %c1_i32 = arith.constant 1 : i32
    %11 = arith.select %10, %c1_i32, %c2_i32 : i32
    %12 = vector.broadcast %11 : i32 to vector<2x16xi32>
    %13 = arith.remsi %9, %12 : vector<2x16xi32>
    %c0_i32_8 = arith.constant 0 : i32
    %14 = vector.broadcast %c0_i32_8 : i32 to vector<2x16xi32>
    %15 = arith.cmpi ne, %13, %14 : vector<2x16xi32>
    %c0_i32_9 = arith.constant 0 : i32
    %16 = vector.broadcast %c0_i32_9 : i32 to vector<2x16xi32>
    %17 = arith.cmpi slt, %13, %16 : vector<2x16xi32>
    %c0_i32_10 = arith.constant 0 : i32
    %18 = arith.cmpi slt, %11, %c0_i32_10 : i32
    %19 = vector.broadcast %18 : i1 to vector<2x16xi1>
    %20 = vector.broadcast %19 : vector<2x16xi1> to vector<2x16xi1>
    %21 = arith.xori %17, %20 : vector<2x16xi1>
    %22 = arith.andi %21, %15 : vector<2x16xi1>
    %23 = vector.broadcast %11 : i32 to vector<2x16xi32>
    %24 = arith.addi %13, %23 : vector<2x16xi32>
    %25 = arith.select %22, %24, %13 : vector<2x16xi1>, vector<2x16xi32>
    %26 = tpu.iota {dimensions = array<i32: 0>} : vector<2x16xi32>
    %27 = arith.cmpi eq, %25, %26 : vector<2x16xi32>
    %cst_11 = arith.constant 0.000000e+00 : f32
    %cst_12 = arith.constant -1.000000e+30 : f32
    %28 = vector.broadcast %cst_11 : f32 to vector<2x16xf32>
    %29 = vector.broadcast %cst_12 : f32 to vector<2x16xf32>
    %30 = arith.select %27, %28, %29 : vector<2x16xi1>, vector<2x16xf32>
    %c0_13 = arith.constant 0 : index
    %c0_14 = arith.constant 0 : index
    %c0_15 = arith.constant 0 : index
    %c0_16 = arith.constant 0 : index
    %31 = vector.load %arg4[%c0_13, %c0_14, %c0_15, %c0_16] : memref<3x2x32x16xf32, #tpu.memory_space<vmem>>, vector<1x1x32x16xf32>
    %32 = vector.shape_cast %31 : vector<1x1x32x16xf32> to vector<32x16xf32>
    %cst_17 = arith.constant dense<0.000000e+00> : vector<2x16xf32>
    %33 = tpu.matmul %7, %32, %cst_17 {dimension_numbers = #tpu.dot_dimension_numbers<[1], [0], [0], [1], [0, 0, 1, 1], [], []>} : vector<2x32xf32>, vector<32x16xf32>, vector<2x16xf32> -> vector<2x16xf32>
    %c0_18 = arith.constant 0 : index
    %c0_19 = arith.constant 0 : index
    %c0_20 = arith.constant 0 : index
    %c0_21 = arith.constant 0 : index
    %34 = vector.load %arg5[%c0_18, %c0_19, %c0_20, %c0_21] : memref<3x2x1x16xf32, #tpu.memory_space<vmem>>, vector<1x1x1x16xf32>
    %35 = vector.shape_cast %34 : vector<1x1x1x16xf32> to vector<1x16xf32>
    %36 = vector.broadcast %35 : vector<1x16xf32> to vector<2x16xf32>
    %37 = arith.addf %33, %36 : vector<2x16xf32>
    %c1 = arith.constant 1 : index
    %c0_22 = arith.constant 0 : index
    %c0_23 = arith.constant 0 : index
    %c0_24 = arith.constant 0 : index
    %38 = vector.load %arg4[%c1, %c0_22, %c0_23, %c0_24] : memref<3x2x32x16xf32, #tpu.memory_space<vmem>>, vector<1x1x32x16xf32>
    %39 = vector.shape_cast %38 : vector<1x1x32x16xf32> to vector<32x16xf32>
    %cst_25 = arith.constant dense<0.000000e+00> : vector<16x16xf32>
    %40 = tpu.matmul %8, %39, %cst_25 {dimension_numbers = #tpu.dot_dimension_numbers<[1], [0], [0], [1], [0, 0, 1, 1], [], []>} : vector<16x32xf32>, vector<32x16xf32>, vector<16x16xf32> -> vector<16x16xf32>
    %c1_26 = arith.constant 1 : index
    %c0_27 = arith.constant 0 : index
    %c0_28 = arith.constant 0 : index
    %c0_29 = arith.constant 0 : index
    %41 = vector.load %arg5[%c1_26, %c0_27, %c0_28, %c0_29] : memref<3x2x1x16xf32, #tpu.memory_space<vmem>>, vector<1x1x1x16xf32>
    %42 = vector.shape_cast %41 : vector<1x1x1x16xf32> to vector<1x16xf32>
    %43 = vector.broadcast %42 : vector<1x16xf32> to vector<16x16xf32>
    %44 = arith.addf %40, %43 : vector<16x16xf32>
    %c2 = arith.constant 2 : index
    %c0_30 = arith.constant 0 : index
    %c0_31 = arith.constant 0 : index
    %c0_32 = arith.constant 0 : index
    %45 = vector.load %arg4[%c2, %c0_30, %c0_31, %c0_32] : memref<3x2x32x16xf32, #tpu.memory_space<vmem>>, vector<1x1x32x16xf32>
    %46 = vector.shape_cast %45 : vector<1x1x32x16xf32> to vector<32x16xf32>
    %cst_33 = arith.constant dense<0.000000e+00> : vector<16x16xf32>
    %47 = tpu.matmul %8, %46, %cst_33 {dimension_numbers = #tpu.dot_dimension_numbers<[1], [0], [0], [1], [0, 0, 1, 1], [], []>} : vector<16x32xf32>, vector<32x16xf32>, vector<16x16xf32> -> vector<16x16xf32>
    %c2_34 = arith.constant 2 : index
    %c0_35 = arith.constant 0 : index
    %c0_36 = arith.constant 0 : index
    %c0_37 = arith.constant 0 : index
    %48 = vector.load %arg5[%c2_34, %c0_35, %c0_36, %c0_37] : memref<3x2x1x16xf32, #tpu.memory_space<vmem>>, vector<1x1x1x16xf32>
    %49 = vector.shape_cast %48 : vector<1x1x1x16xf32> to vector<1x16xf32>
    %50 = vector.broadcast %49 : vector<1x16xf32> to vector<16x16xf32>
    %51 = arith.addf %47, %50 : vector<16x16xf32>
    %cst_38 = arith.constant dense<0.000000e+00> : vector<2x16xf32>
    %52 = tpu.matmul %37, %44, %cst_38 {dimension_numbers = #tpu.dot_dimension_numbers<[1], [1], [0], [0], [0, 0, 1, 0], [], []>} : vector<2x16xf32>, vector<16x16xf32>, vector<2x16xf32> -> vector<2x16xf32>
    %53 = arith.addf %52, %30 : vector<2x16xf32>
    %cst_39 = arith.constant dense<0xFF800000> : vector<2xf32>
    %54 = vector.multi_reduction <maximumf>, %53, %cst_39 [1] : vector<2x16xf32> to vector<2xf32>
    %55 = vector.shape_cast %54 : vector<2xf32> to vector<2x1xf32>
    %56 = vector.broadcast %55 : vector<2x1xf32> to vector<2x16xf32>
    %57 = arith.subf %53, %56 : vector<2x16xf32>
    %58 = math.exp %57 : vector<2x16xf32>
    %cst_40 = arith.constant dense<0.000000e+00> : vector<2xf32>
    %59 = vector.multi_reduction <add>, %58, %cst_40 [1] : vector<2x16xf32> to vector<2xf32>
    %60 = vector.shape_cast %59 : vector<2xf32> to vector<2x1xf32>
    %61 = tpu.reciprocal %60 {approx = true} : vector<2x1xf32> -> vector<2x1xf32>
    %62 = vector.broadcast %61 : vector<2x1xf32> to vector<2x16xf32>
    %63 = arith.mulf %58, %62 : vector<2x16xf32>
    %cst_41 = arith.constant dense<0.000000e+00> : vector<2x16xf32>
    %64 = tpu.matmul %63, %51, %cst_41 {dimension_numbers = #tpu.dot_dimension_numbers<[1], [0], [0], [1], [0, 0, 1, 1], [], []>} : vector<2x16xf32>, vector<16x16xf32>, vector<2x16xf32> -> vector<2x16xf32>
    %c0_42 = arith.constant 0 : index
    %c0_43 = arith.constant 0 : index
    %c0_44 = arith.constant 0 : index
    %65 = vector.load %arg6[%c0_42, %c0_43, %c0_44] : memref<2x16x32xf32, #tpu.memory_space<vmem>>, vector<1x16x32xf32>
    %66 = vector.shape_cast %65 : vector<1x16x32xf32> to vector<16x32xf32>
    %cst_45 = arith.constant dense<0.000000e+00> : vector<2x32xf32>
    %67 = tpu.matmul %64, %66, %cst_45 {dimension_numbers = #tpu.dot_dimension_numbers<[1], [0], [0], [1], [0, 0, 1, 1], [], []>} : vector<2x16xf32>, vector<16x32xf32>, vector<2x32xf32> -> vector<2x32xf32>
    %c0_46 = arith.constant 0 : index
    %c1_47 = arith.constant 1 : index
    %c0_48 = arith.constant 0 : index
    %c0_49 = arith.constant 0 : index
    %68 = vector.load %arg4[%c0_46, %c1_47, %c0_48, %c0_49] : memref<3x2x32x16xf32, #tpu.memory_space<vmem>>, vector<1x1x32x16xf32>
    %69 = vector.shape_cast %68 : vector<1x1x32x16xf32> to vector<32x16xf32>
    %cst_50 = arith.constant dense<0.000000e+00> : vector<2x16xf32>
    %70 = tpu.matmul %7, %69, %cst_50 {dimension_numbers = #tpu.dot_dimension_numbers<[1], [0], [0], [1], [0, 0, 1, 1], [], []>} : vector<2x32xf32>, vector<32x16xf32>, vector<2x16xf32> -> vector<2x16xf32>
    %c0_51 = arith.constant 0 : index
    %c1_52 = arith.constant 1 : index
    %c0_53 = arith.constant 0 : index
    %c0_54 = arith.constant 0 : index
    %71 = vector.load %arg5[%c0_51, %c1_52, %c0_53, %c0_54] : memref<3x2x1x16xf32, #tpu.memory_space<vmem>>, vector<1x1x1x16xf32>
    %72 = vector.shape_cast %71 : vector<1x1x1x16xf32> to vector<1x16xf32>
    %73 = vector.broadcast %72 : vector<1x16xf32> to vector<2x16xf32>
    %74 = arith.addf %70, %73 : vector<2x16xf32>
    %c1_55 = arith.constant 1 : index
    %c1_56 = arith.constant 1 : index
    %c0_57 = arith.constant 0 : index
    %c0_58 = arith.constant 0 : index
    %75 = vector.load %arg4[%c1_55, %c1_56, %c0_57, %c0_58] : memref<3x2x32x16xf32, #tpu.memory_space<vmem>>, vector<1x1x32x16xf32>
    %76 = vector.shape_cast %75 : vector<1x1x32x16xf32> to vector<32x16xf32>
    %cst_59 = arith.constant dense<0.000000e+00> : vector<16x16xf32>
    %77 = tpu.matmul %8, %76, %cst_59 {dimension_numbers = #tpu.dot_dimension_numbers<[1], [0], [0], [1], [0, 0, 1, 1], [], []>} : vector<16x32xf32>, vector<32x16xf32>, vector<16x16xf32> -> vector<16x16xf32>
    %c1_60 = arith.constant 1 : index
    %c1_61 = arith.constant 1 : index
    %c0_62 = arith.constant 0 : index
    %c0_63 = arith.constant 0 : index
    %78 = vector.load %arg5[%c1_60, %c1_61, %c0_62, %c0_63] : memref<3x2x1x16xf32, #tpu.memory_space<vmem>>, vector<1x1x1x16xf32>
    %79 = vector.shape_cast %78 : vector<1x1x1x16xf32> to vector<1x16xf32>
    %80 = vector.broadcast %79 : vector<1x16xf32> to vector<16x16xf32>
    %81 = arith.addf %77, %80 : vector<16x16xf32>
    %c2_64 = arith.constant 2 : index
    %c1_65 = arith.constant 1 : index
    %c0_66 = arith.constant 0 : index
    %c0_67 = arith.constant 0 : index
    %82 = vector.load %arg4[%c2_64, %c1_65, %c0_66, %c0_67] : memref<3x2x32x16xf32, #tpu.memory_space<vmem>>, vector<1x1x32x16xf32>
    %83 = vector.shape_cast %82 : vector<1x1x32x16xf32> to vector<32x16xf32>
    %cst_68 = arith.constant dense<0.000000e+00> : vector<16x16xf32>
    %84 = tpu.matmul %8, %83, %cst_68 {dimension_numbers = #tpu.dot_dimension_numbers<[1], [0], [0], [1], [0, 0, 1, 1], [], []>} : vector<16x32xf32>, vector<32x16xf32>, vector<16x16xf32> -> vector<16x16xf32>
    %c2_69 = arith.constant 2 : index
    %c1_70 = arith.constant 1 : index
    %c0_71 = arith.constant 0 : index
    %c0_72 = arith.constant 0 : index
    %85 = vector.load %arg5[%c2_69, %c1_70, %c0_71, %c0_72] : memref<3x2x1x16xf32, #tpu.memory_space<vmem>>, vector<1x1x1x16xf32>
    %86 = vector.shape_cast %85 : vector<1x1x1x16xf32> to vector<1x16xf32>
    %87 = vector.broadcast %86 : vector<1x16xf32> to vector<16x16xf32>
    %88 = arith.addf %84, %87 : vector<16x16xf32>
    %cst_73 = arith.constant dense<0.000000e+00> : vector<2x16xf32>
    %89 = tpu.matmul %74, %81, %cst_73 {dimension_numbers = #tpu.dot_dimension_numbers<[1], [1], [0], [0], [0, 0, 1, 0], [], []>} : vector<2x16xf32>, vector<16x16xf32>, vector<2x16xf32> -> vector<2x16xf32>
    %90 = arith.addf %89, %30 : vector<2x16xf32>
    %cst_74 = arith.constant dense<0xFF800000> : vector<2xf32>
    %91 = vector.multi_reduction <maximumf>, %90, %cst_74 [1] : vector<2x16xf32> to vector<2xf32>
    %92 = vector.shape_cast %91 : vector<2xf32> to vector<2x1xf32>
    %93 = vector.broadcast %92 : vector<2x1xf32> to vector<2x16xf32>
    %94 = arith.subf %90, %93 : vector<2x16xf32>
    %95 = math.exp %94 : vector<2x16xf32>
    %cst_75 = arith.constant dense<0.000000e+00> : vector<2xf32>
    %96 = vector.multi_reduction <add>, %95, %cst_75 [1] : vector<2x16xf32> to vector<2xf32>
    %97 = vector.shape_cast %96 : vector<2xf32> to vector<2x1xf32>
    %98 = tpu.reciprocal %97 {approx = true} : vector<2x1xf32> -> vector<2x1xf32>
    %99 = vector.broadcast %98 : vector<2x1xf32> to vector<2x16xf32>
    %100 = arith.mulf %95, %99 : vector<2x16xf32>
    %cst_76 = arith.constant dense<0.000000e+00> : vector<2x16xf32>
    %101 = tpu.matmul %100, %88, %cst_76 {dimension_numbers = #tpu.dot_dimension_numbers<[1], [0], [0], [1], [0, 0, 1, 1], [], []>} : vector<2x16xf32>, vector<16x16xf32>, vector<2x16xf32> -> vector<2x16xf32>
    %c1_77 = arith.constant 1 : index
    %c0_78 = arith.constant 0 : index
    %c0_79 = arith.constant 0 : index
    %102 = vector.load %arg6[%c1_77, %c0_78, %c0_79] : memref<2x16x32xf32, #tpu.memory_space<vmem>>, vector<1x16x32xf32>
    %103 = vector.shape_cast %102 : vector<1x16x32xf32> to vector<16x32xf32>
    %cst_80 = arith.constant dense<0.000000e+00> : vector<2x32xf32>
    %104 = tpu.matmul %101, %103, %cst_80 {dimension_numbers = #tpu.dot_dimension_numbers<[1], [0], [0], [1], [0, 0, 1, 1], [], []>} : vector<2x16xf32>, vector<16x32xf32>, vector<2x32xf32> -> vector<2x32xf32>
    %105 = arith.addf %67, %104 : vector<2x32xf32>
    %c0_81 = arith.constant 0 : index
    %c0_82 = arith.constant 0 : index
    %106 = vector.load %arg7[%c0_81, %c0_82] : memref<1x32xf32, #tpu.memory_space<vmem>>, vector<1x32xf32>
    %107 = vector.broadcast %106 : vector<1x32xf32> to vector<2x32xf32>
    %108 = arith.addf %105, %107 : vector<2x32xf32>
    %c0_83 = arith.constant 0 : index
    %c0_84 = arith.constant 0 : index
    %c0_85 = arith.constant 0 : index
    %109 = vector.load %arg8[%c0_83, %c0_84, %c0_85] : memref<7x32x32xf32, #tpu.memory_space<vmem>>, vector<1x32x32xf32>
    %110 = vector.shape_cast %109 : vector<1x32x32xf32> to vector<32x32xf32>
    %cst_86 = arith.constant dense<0.000000e+00> : vector<2x32xf32>
    %111 = tpu.matmul %108, %110, %cst_86 {dimension_numbers = #tpu.dot_dimension_numbers<[1], [0], [0], [1], [0, 0, 1, 1], [], []>} : vector<2x32xf32>, vector<32x32xf32>, vector<2x32xf32> -> vector<2x32xf32>
    %c0_87 = arith.constant 0 : index
    %c0_88 = arith.constant 0 : index
    %c0_89 = arith.constant 0 : index
    %112 = vector.load %arg12[%c0_87, %c0_88, %c0_89] : memref<7x6x32xf32, #tpu.memory_space<vmem>>, vector<1x1x32xf32>
    %113 = vector.shape_cast %112 : vector<1x1x32xf32> to vector<1x32xf32>
    %114 = vector.broadcast %113 : vector<1x32xf32> to vector<2x32xf32>
    %115 = arith.addf %111, %114 : vector<2x32xf32>
    %116 = arith.addf %108, %115 : vector<2x32xf32>
    %c0_90 = arith.constant 0 : index
    %c2_91 = arith.constant 2 : index
    %c0_92 = arith.constant 0 : index
    %117 = vector.load %arg12[%c0_90, %c2_91, %c0_92] : memref<7x6x32xf32, #tpu.memory_space<vmem>>, vector<1x1x32xf32>
    %118 = vector.shape_cast %117 : vector<1x1x32xf32> to vector<1x32xf32>
    %c0_93 = arith.constant 0 : index
    %c3 = arith.constant 3 : index
    %c0_94 = arith.constant 0 : index
    %119 = vector.load %arg12[%c0_93, %c3, %c0_94] : memref<7x6x32xf32, #tpu.memory_space<vmem>>, vector<1x1x32xf32>
    %120 = vector.shape_cast %119 : vector<1x1x32xf32> to vector<1x32xf32>
    %cst_95 = arith.constant dense<0.000000e+00> : vector<2xf32>
    %121 = vector.multi_reduction <add>, %116, %cst_95 [1] : vector<2x32xf32> to vector<2xf32>
    %122 = vector.shape_cast %121 : vector<2xf32> to vector<2x1xf32>
    %cst_96 = arith.constant 3.200000e+01 : f32
    %123 = vector.broadcast %cst_96 : f32 to vector<2x1xf32>
    %124 = arith.divf %122, %123 : vector<2x1xf32>
    %125 = vector.broadcast %124 : vector<2x1xf32> to vector<2x32xf32>
    %126 = arith.subf %116, %125 : vector<2x32xf32>
    %127 = arith.mulf %126, %126 : vector<2x32xf32>
    %cst_97 = arith.constant dense<0.000000e+00> : vector<2xf32>
    %128 = vector.multi_reduction <add>, %127, %cst_97 [1] : vector<2x32xf32> to vector<2xf32>
    %129 = vector.shape_cast %128 : vector<2xf32> to vector<2x1xf32>
    %cst_98 = arith.constant 3.200000e+01 : f32
    %130 = vector.broadcast %cst_98 : f32 to vector<2x1xf32>
    %131 = arith.divf %129, %130 : vector<2x1xf32>
    %132 = vector.broadcast %124 : vector<2x1xf32> to vector<2x32xf32>
    %133 = arith.subf %116, %132 : vector<2x32xf32>
    %cst_99 = arith.constant 9.99999974E-6 : f32
    %134 = vector.broadcast %cst_99 : f32 to vector<2x1xf32>
    %135 = arith.addf %131, %134 : vector<2x1xf32>
    %136 = math.rsqrt %135 : vector<2x1xf32>
    %137 = vector.broadcast %136 : vector<2x1xf32> to vector<2x32xf32>
    %138 = arith.mulf %133, %137 : vector<2x32xf32>
    %139 = vector.broadcast %118 : vector<1x32xf32> to vector<2x32xf32>
    %140 = arith.mulf %138, %139 : vector<2x32xf32>
    %141 = vector.broadcast %120 : vector<1x32xf32> to vector<2x32xf32>
    %142 = arith.addf %140, %141 : vector<2x32xf32>
    %c0_100 = arith.constant 0 : index
    %c0_101 = arith.constant 0 : index
    %c0_102 = arith.constant 0 : index
    %143 = vector.load %arg9[%c0_100, %c0_101, %c0_102] : memref<7x32x64xf32, #tpu.memory_space<vmem>>, vector<1x32x64xf32>
    %144 = vector.shape_cast %143 : vector<1x32x64xf32> to vector<32x64xf32>
    %cst_103 = arith.constant dense<0.000000e+00> : vector<2x64xf32>
    %145 = tpu.matmul %142, %144, %cst_103 {dimension_numbers = #tpu.dot_dimension_numbers<[1], [0], [0], [1], [0, 0, 1, 1], [], []>} : vector<2x32xf32>, vector<32x64xf32>, vector<2x64xf32> -> vector<2x64xf32>
    %c0_104 = arith.constant 0 : index
    %c0_105 = arith.constant 0 : index
    %c0_106 = arith.constant 0 : index
    %146 = vector.load %arg10[%c0_104, %c0_105, %c0_106] : memref<7x1x64xf32, #tpu.memory_space<vmem>>, vector<1x1x64xf32>
    %147 = vector.shape_cast %146 : vector<1x1x64xf32> to vector<1x64xf32>
    %148 = vector.broadcast %147 : vector<1x64xf32> to vector<2x64xf32>
    %149 = arith.addf %145, %148 : vector<2x64xf32>
    %cst_107 = arith.constant 0.000000e+00 : f32
    %150 = vector.broadcast %cst_107 : f32 to vector<2x64xf32>
    %151 = arith.maximumf %149, %150 : vector<2x64xf32>
    %c0_108 = arith.constant 0 : index
    %c0_109 = arith.constant 0 : index
    %c0_110 = arith.constant 0 : index
    %152 = vector.load %arg11[%c0_108, %c0_109, %c0_110] : memref<7x64x32xf32, #tpu.memory_space<vmem>>, vector<1x64x32xf32>
    %153 = vector.shape_cast %152 : vector<1x64x32xf32> to vector<64x32xf32>
    %cst_111 = arith.constant dense<0.000000e+00> : vector<2x32xf32>
    %154 = tpu.matmul %151, %153, %cst_111 {dimension_numbers = #tpu.dot_dimension_numbers<[1], [0], [0], [1], [0, 0, 1, 1], [], []>} : vector<2x64xf32>, vector<64x32xf32>, vector<2x32xf32> -> vector<2x32xf32>
    %c0_112 = arith.constant 0 : index
    %c1_113 = arith.constant 1 : index
    %c0_114 = arith.constant 0 : index
    %155 = vector.load %arg12[%c0_112, %c1_113, %c0_114] : memref<7x6x32xf32, #tpu.memory_space<vmem>>, vector<1x1x32xf32>
    %156 = vector.shape_cast %155 : vector<1x1x32xf32> to vector<1x32xf32>
    %157 = vector.broadcast %156 : vector<1x32xf32> to vector<2x32xf32>
    %158 = arith.addf %154, %157 : vector<2x32xf32>
    %159 = arith.addf %142, %158 : vector<2x32xf32>
    %c0_115 = arith.constant 0 : index
    %c4 = arith.constant 4 : index
    %c0_116 = arith.constant 0 : index
    %160 = vector.load %arg12[%c0_115, %c4, %c0_116] : memref<7x6x32xf32, #tpu.memory_space<vmem>>, vector<1x1x32xf32>
    %161 = vector.shape_cast %160 : vector<1x1x32xf32> to vector<1x32xf32>
    %c0_117 = arith.constant 0 : index
    %c5 = arith.constant 5 : index
    %c0_118 = arith.constant 0 : index
    %162 = vector.load %arg12[%c0_117, %c5, %c0_118] : memref<7x6x32xf32, #tpu.memory_space<vmem>>, vector<1x1x32xf32>
    %163 = vector.shape_cast %162 : vector<1x1x32xf32> to vector<1x32xf32>
    %cst_119 = arith.constant dense<0.000000e+00> : vector<2xf32>
    %164 = vector.multi_reduction <add>, %159, %cst_119 [1] : vector<2x32xf32> to vector<2xf32>
    %165 = vector.shape_cast %164 : vector<2xf32> to vector<2x1xf32>
    %cst_120 = arith.constant 3.200000e+01 : f32
    %166 = vector.broadcast %cst_120 : f32 to vector<2x1xf32>
    %167 = arith.divf %165, %166 : vector<2x1xf32>
    %168 = vector.broadcast %167 : vector<2x1xf32> to vector<2x32xf32>
    %169 = arith.subf %159, %168 : vector<2x32xf32>
    %170 = arith.mulf %169, %169 : vector<2x32xf32>
    %cst_121 = arith.constant dense<0.000000e+00> : vector<2xf32>
    %171 = vector.multi_reduction <add>, %170, %cst_121 [1] : vector<2x32xf32> to vector<2xf32>
    %172 = vector.shape_cast %171 : vector<2xf32> to vector<2x1xf32>
    %cst_122 = arith.constant 3.200000e+01 : f32
    %173 = vector.broadcast %cst_122 : f32 to vector<2x1xf32>
    %174 = arith.divf %172, %173 : vector<2x1xf32>
    %175 = vector.broadcast %167 : vector<2x1xf32> to vector<2x32xf32>
    %176 = arith.subf %159, %175 : vector<2x32xf32>
    %cst_123 = arith.constant 9.99999974E-6 : f32
    %177 = vector.broadcast %cst_123 : f32 to vector<2x1xf32>
    %178 = arith.addf %174, %177 : vector<2x1xf32>
    %179 = math.rsqrt %178 : vector<2x1xf32>
    %180 = vector.broadcast %179 : vector<2x1xf32> to vector<2x32xf32>
    %181 = arith.mulf %176, %180 : vector<2x32xf32>
    %182 = vector.broadcast %161 : vector<1x32xf32> to vector<2x32xf32>
    %183 = arith.mulf %181, %182 : vector<2x32xf32>
    %184 = vector.broadcast %163 : vector<1x32xf32> to vector<2x32xf32>
    %185 = arith.addf %183, %184 : vector<2x32xf32>
    %c1_124 = arith.constant 1 : index
    %c0_125 = arith.constant 0 : index
    %c0_126 = arith.constant 0 : index
    %186 = vector.load %arg8[%c1_124, %c0_125, %c0_126] : memref<7x32x32xf32, #tpu.memory_space<vmem>>, vector<1x32x32xf32>
    %187 = vector.shape_cast %186 : vector<1x32x32xf32> to vector<32x32xf32>
    %cst_127 = arith.constant dense<0.000000e+00> : vector<2x32xf32>
    %188 = tpu.matmul %185, %187, %cst_127 {dimension_numbers = #tpu.dot_dimension_numbers<[1], [0], [0], [1], [0, 0, 1, 1], [], []>} : vector<2x32xf32>, vector<32x32xf32>, vector<2x32xf32> -> vector<2x32xf32>
    %c1_128 = arith.constant 1 : index
    %c0_129 = arith.constant 0 : index
    %c0_130 = arith.constant 0 : index
    %189 = vector.load %arg12[%c1_128, %c0_129, %c0_130] : memref<7x6x32xf32, #tpu.memory_space<vmem>>, vector<1x1x32xf32>
    %190 = vector.shape_cast %189 : vector<1x1x32xf32> to vector<1x32xf32>
    %191 = vector.broadcast %190 : vector<1x32xf32> to vector<2x32xf32>
    %192 = arith.addf %188, %191 : vector<2x32xf32>
    %193 = arith.addf %185, %192 : vector<2x32xf32>
    %c1_131 = arith.constant 1 : index
    %c2_132 = arith.constant 2 : index
    %c0_133 = arith.constant 0 : index
    %194 = vector.load %arg12[%c1_131, %c2_132, %c0_133] : memref<7x6x32xf32, #tpu.memory_space<vmem>>, vector<1x1x32xf32>
    %195 = vector.shape_cast %194 : vector<1x1x32xf32> to vector<1x32xf32>
    %c1_134 = arith.constant 1 : index
    %c3_135 = arith.constant 3 : index
    %c0_136 = arith.constant 0 : index
    %196 = vector.load %arg12[%c1_134, %c3_135, %c0_136] : memref<7x6x32xf32, #tpu.memory_space<vmem>>, vector<1x1x32xf32>
    %197 = vector.shape_cast %196 : vector<1x1x32xf32> to vector<1x32xf32>
    %cst_137 = arith.constant dense<0.000000e+00> : vector<2xf32>
    %198 = vector.multi_reduction <add>, %193, %cst_137 [1] : vector<2x32xf32> to vector<2xf32>
    %199 = vector.shape_cast %198 : vector<2xf32> to vector<2x1xf32>
    %cst_138 = arith.constant 3.200000e+01 : f32
    %200 = vector.broadcast %cst_138 : f32 to vector<2x1xf32>
    %201 = arith.divf %199, %200 : vector<2x1xf32>
    %202 = vector.broadcast %201 : vector<2x1xf32> to vector<2x32xf32>
    %203 = arith.subf %193, %202 : vector<2x32xf32>
    %204 = arith.mulf %203, %203 : vector<2x32xf32>
    %cst_139 = arith.constant dense<0.000000e+00> : vector<2xf32>
    %205 = vector.multi_reduction <add>, %204, %cst_139 [1] : vector<2x32xf32> to vector<2xf32>
    %206 = vector.shape_cast %205 : vector<2xf32> to vector<2x1xf32>
    %cst_140 = arith.constant 3.200000e+01 : f32
    %207 = vector.broadcast %cst_140 : f32 to vector<2x1xf32>
    %208 = arith.divf %206, %207 : vector<2x1xf32>
    %209 = vector.broadcast %201 : vector<2x1xf32> to vector<2x32xf32>
    %210 = arith.subf %193, %209 : vector<2x32xf32>
    %cst_141 = arith.constant 9.99999974E-6 : f32
    %211 = vector.broadcast %cst_141 : f32 to vector<2x1xf32>
    %212 = arith.addf %208, %211 : vector<2x1xf32>
    %213 = math.rsqrt %212 : vector<2x1xf32>
    %214 = vector.broadcast %213 : vector<2x1xf32> to vector<2x32xf32>
    %215 = arith.mulf %210, %214 : vector<2x32xf32>
    %216 = vector.broadcast %195 : vector<1x32xf32> to vector<2x32xf32>
    %217 = arith.mulf %215, %216 : vector<2x32xf32>
    %218 = vector.broadcast %197 : vector<1x32xf32> to vector<2x32xf32>
    %219 = arith.addf %217, %218 : vector<2x32xf32>
    %c1_142 = arith.constant 1 : index
    %c0_143 = arith.constant 0 : index
    %c0_144 = arith.constant 0 : index
    %220 = vector.load %arg9[%c1_142, %c0_143, %c0_144] : memref<7x32x64xf32, #tpu.memory_space<vmem>>, vector<1x32x64xf32>
    %221 = vector.shape_cast %220 : vector<1x32x64xf32> to vector<32x64xf32>
    %cst_145 = arith.constant dense<0.000000e+00> : vector<2x64xf32>
    %222 = tpu.matmul %219, %221, %cst_145 {dimension_numbers = #tpu.dot_dimension_numbers<[1], [0], [0], [1], [0, 0, 1, 1], [], []>} : vector<2x32xf32>, vector<32x64xf32>, vector<2x64xf32> -> vector<2x64xf32>
    %c1_146 = arith.constant 1 : index
    %c0_147 = arith.constant 0 : index
    %c0_148 = arith.constant 0 : index
    %223 = vector.load %arg10[%c1_146, %c0_147, %c0_148] : memref<7x1x64xf32, #tpu.memory_space<vmem>>, vector<1x1x64xf32>
    %224 = vector.shape_cast %223 : vector<1x1x64xf32> to vector<1x64xf32>
    %225 = vector.broadcast %224 : vector<1x64xf32> to vector<2x64xf32>
    %226 = arith.addf %222, %225 : vector<2x64xf32>
    %cst_149 = arith.constant 0.000000e+00 : f32
    %227 = vector.broadcast %cst_149 : f32 to vector<2x64xf32>
    %228 = arith.maximumf %226, %227 : vector<2x64xf32>
    %c1_150 = arith.constant 1 : index
    %c0_151 = arith.constant 0 : index
    %c0_152 = arith.constant 0 : index
    %229 = vector.load %arg11[%c1_150, %c0_151, %c0_152] : memref<7x64x32xf32, #tpu.memory_space<vmem>>, vector<1x64x32xf32>
    %230 = vector.shape_cast %229 : vector<1x64x32xf32> to vector<64x32xf32>
    %cst_153 = arith.constant dense<0.000000e+00> : vector<2x32xf32>
    %231 = tpu.matmul %228, %230, %cst_153 {dimension_numbers = #tpu.dot_dimension_numbers<[1], [0], [0], [1], [0, 0, 1, 1], [], []>} : vector<2x64xf32>, vector<64x32xf32>, vector<2x32xf32> -> vector<2x32xf32>
    %c1_154 = arith.constant 1 : index
    %c1_155 = arith.constant 1 : index
    %c0_156 = arith.constant 0 : index
    %232 = vector.load %arg12[%c1_154, %c1_155, %c0_156] : memref<7x6x32xf32, #tpu.memory_space<vmem>>, vector<1x1x32xf32>
    %233 = vector.shape_cast %232 : vector<1x1x32xf32> to vector<1x32xf32>
    %234 = vector.broadcast %233 : vector<1x32xf32> to vector<2x32xf32>
    %235 = arith.addf %231, %234 : vector<2x32xf32>
    %236 = arith.addf %219, %235 : vector<2x32xf32>
    %c1_157 = arith.constant 1 : index
    %c4_158 = arith.constant 4 : index
    %c0_159 = arith.constant 0 : index
    %237 = vector.load %arg12[%c1_157, %c4_158, %c0_159] : memref<7x6x32xf32, #tpu.memory_space<vmem>>, vector<1x1x32xf32>
    %238 = vector.shape_cast %237 : vector<1x1x32xf32> to vector<1x32xf32>
    %c1_160 = arith.constant 1 : index
    %c5_161 = arith.constant 5 : index
    %c0_162 = arith.constant 0 : index
    %239 = vector.load %arg12[%c1_160, %c5_161, %c0_162] : memref<7x6x32xf32, #tpu.memory_space<vmem>>, vector<1x1x32xf32>
    %240 = vector.shape_cast %239 : vector<1x1x32xf32> to vector<1x32xf32>
    %cst_163 = arith.constant dense<0.000000e+00> : vector<2xf32>
    %241 = vector.multi_reduction <add>, %236, %cst_163 [1] : vector<2x32xf32> to vector<2xf32>
    %242 = vector.shape_cast %241 : vector<2xf32> to vector<2x1xf32>
    %cst_164 = arith.constant 3.200000e+01 : f32
    %243 = vector.broadcast %cst_164 : f32 to vector<2x1xf32>
    %244 = arith.divf %242, %243 : vector<2x1xf32>
    %245 = vector.broadcast %244 : vector<2x1xf32> to vector<2x32xf32>
    %246 = arith.subf %236, %245 : vector<2x32xf32>
    %247 = arith.mulf %246, %246 : vector<2x32xf32>
    %cst_165 = arith.constant dense<0.000000e+00> : vector<2xf32>
    %248 = vector.multi_reduction <add>, %247, %cst_165 [1] : vector<2x32xf32> to vector<2xf32>
    %249 = vector.shape_cast %248 : vector<2xf32> to vector<2x1xf32>
    %cst_166 = arith.constant 3.200000e+01 : f32
    %250 = vector.broadcast %cst_166 : f32 to vector<2x1xf32>
    %251 = arith.divf %249, %250 : vector<2x1xf32>
    %252 = vector.broadcast %244 : vector<2x1xf32> to vector<2x32xf32>
    %253 = arith.subf %236, %252 : vector<2x32xf32>
    %cst_167 = arith.constant 9.99999974E-6 : f32
    %254 = vector.broadcast %cst_167 : f32 to vector<2x1xf32>
    %255 = arith.addf %251, %254 : vector<2x1xf32>
    %256 = math.rsqrt %255 : vector<2x1xf32>
    %257 = vector.broadcast %256 : vector<2x1xf32> to vector<2x32xf32>
    %258 = arith.mulf %253, %257 : vector<2x32xf32>
    %259 = vector.broadcast %238 : vector<1x32xf32> to vector<2x32xf32>
    %260 = arith.mulf %258, %259 : vector<2x32xf32>
    %261 = vector.broadcast %240 : vector<1x32xf32> to vector<2x32xf32>
    %262 = arith.addf %260, %261 : vector<2x32xf32>
    %c2_168 = arith.constant 2 : index
    %c0_169 = arith.constant 0 : index
    %c0_170 = arith.constant 0 : index
    %263 = vector.load %arg8[%c2_168, %c0_169, %c0_170] : memref<7x32x32xf32, #tpu.memory_space<vmem>>, vector<1x32x32xf32>
    %264 = vector.shape_cast %263 : vector<1x32x32xf32> to vector<32x32xf32>
    %cst_171 = arith.constant dense<0.000000e+00> : vector<2x32xf32>
    %265 = tpu.matmul %262, %264, %cst_171 {dimension_numbers = #tpu.dot_dimension_numbers<[1], [0], [0], [1], [0, 0, 1, 1], [], []>} : vector<2x32xf32>, vector<32x32xf32>, vector<2x32xf32> -> vector<2x32xf32>
    %c2_172 = arith.constant 2 : index
    %c0_173 = arith.constant 0 : index
    %c0_174 = arith.constant 0 : index
    %266 = vector.load %arg12[%c2_172, %c0_173, %c0_174] : memref<7x6x32xf32, #tpu.memory_space<vmem>>, vector<1x1x32xf32>
    %267 = vector.shape_cast %266 : vector<1x1x32xf32> to vector<1x32xf32>
    %268 = vector.broadcast %267 : vector<1x32xf32> to vector<2x32xf32>
    %269 = arith.addf %265, %268 : vector<2x32xf32>
    %270 = arith.addf %262, %269 : vector<2x32xf32>
    %c2_175 = arith.constant 2 : index
    %c2_176 = arith.constant 2 : index
    %c0_177 = arith.constant 0 : index
    %271 = vector.load %arg12[%c2_175, %c2_176, %c0_177] : memref<7x6x32xf32, #tpu.memory_space<vmem>>, vector<1x1x32xf32>
    %272 = vector.shape_cast %271 : vector<1x1x32xf32> to vector<1x32xf32>
    %c2_178 = arith.constant 2 : index
    %c3_179 = arith.constant 3 : index
    %c0_180 = arith.constant 0 : index
    %273 = vector.load %arg12[%c2_178, %c3_179, %c0_180] : memref<7x6x32xf32, #tpu.memory_space<vmem>>, vector<1x1x32xf32>
    %274 = vector.shape_cast %273 : vector<1x1x32xf32> to vector<1x32xf32>
    %cst_181 = arith.constant dense<0.000000e+00> : vector<2xf32>
    %275 = vector.multi_reduction <add>, %270, %cst_181 [1] : vector<2x32xf32> to vector<2xf32>
    %276 = vector.shape_cast %275 : vector<2xf32> to vector<2x1xf32>
    %cst_182 = arith.constant 3.200000e+01 : f32
    %277 = vector.broadcast %cst_182 : f32 to vector<2x1xf32>
    %278 = arith.divf %276, %277 : vector<2x1xf32>
    %279 = vector.broadcast %278 : vector<2x1xf32> to vector<2x32xf32>
    %280 = arith.subf %270, %279 : vector<2x32xf32>
    %281 = arith.mulf %280, %280 : vector<2x32xf32>
    %cst_183 = arith.constant dense<0.000000e+00> : vector<2xf32>
    %282 = vector.multi_reduction <add>, %281, %cst_183 [1] : vector<2x32xf32> to vector<2xf32>
    %283 = vector.shape_cast %282 : vector<2xf32> to vector<2x1xf32>
    %cst_184 = arith.constant 3.200000e+01 : f32
    %284 = vector.broadcast %cst_184 : f32 to vector<2x1xf32>
    %285 = arith.divf %283, %284 : vector<2x1xf32>
    %286 = vector.broadcast %278 : vector<2x1xf32> to vector<2x32xf32>
    %287 = arith.subf %270, %286 : vector<2x32xf32>
    %cst_185 = arith.constant 9.99999974E-6 : f32
    %288 = vector.broadcast %cst_185 : f32 to vector<2x1xf32>
    %289 = arith.addf %285, %288 : vector<2x1xf32>
    %290 = math.rsqrt %289 : vector<2x1xf32>
    %291 = vector.broadcast %290 : vector<2x1xf32> to vector<2x32xf32>
    %292 = arith.mulf %287, %291 : vector<2x32xf32>
    %293 = vector.broadcast %272 : vector<1x32xf32> to vector<2x32xf32>
    %294 = arith.mulf %292, %293 : vector<2x32xf32>
    %295 = vector.broadcast %274 : vector<1x32xf32> to vector<2x32xf32>
    %296 = arith.addf %294, %295 : vector<2x32xf32>
    %c2_186 = arith.constant 2 : index
    %c0_187 = arith.constant 0 : index
    %c0_188 = arith.constant 0 : index
    %297 = vector.load %arg9[%c2_186, %c0_187, %c0_188] : memref<7x32x64xf32, #tpu.memory_space<vmem>>, vector<1x32x64xf32>
    %298 = vector.shape_cast %297 : vector<1x32x64xf32> to vector<32x64xf32>
    %cst_189 = arith.constant dense<0.000000e+00> : vector<2x64xf32>
    %299 = tpu.matmul %296, %298, %cst_189 {dimension_numbers = #tpu.dot_dimension_numbers<[1], [0], [0], [1], [0, 0, 1, 1], [], []>} : vector<2x32xf32>, vector<32x64xf32>, vector<2x64xf32> -> vector<2x64xf32>
    %c2_190 = arith.constant 2 : index
    %c0_191 = arith.constant 0 : index
    %c0_192 = arith.constant 0 : index
    %300 = vector.load %arg10[%c2_190, %c0_191, %c0_192] : memref<7x1x64xf32, #tpu.memory_space<vmem>>, vector<1x1x64xf32>
    %301 = vector.shape_cast %300 : vector<1x1x64xf32> to vector<1x64xf32>
    %302 = vector.broadcast %301 : vector<1x64xf32> to vector<2x64xf32>
    %303 = arith.addf %299, %302 : vector<2x64xf32>
    %cst_193 = arith.constant 0.000000e+00 : f32
    %304 = vector.broadcast %cst_193 : f32 to vector<2x64xf32>
    %305 = arith.maximumf %303, %304 : vector<2x64xf32>
    %c2_194 = arith.constant 2 : index
    %c0_195 = arith.constant 0 : index
    %c0_196 = arith.constant 0 : index
    %306 = vector.load %arg11[%c2_194, %c0_195, %c0_196] : memref<7x64x32xf32, #tpu.memory_space<vmem>>, vector<1x64x32xf32>
    %307 = vector.shape_cast %306 : vector<1x64x32xf32> to vector<64x32xf32>
    %cst_197 = arith.constant dense<0.000000e+00> : vector<2x32xf32>
    %308 = tpu.matmul %305, %307, %cst_197 {dimension_numbers = #tpu.dot_dimension_numbers<[1], [0], [0], [1], [0, 0, 1, 1], [], []>} : vector<2x64xf32>, vector<64x32xf32>, vector<2x32xf32> -> vector<2x32xf32>
    %c2_198 = arith.constant 2 : index
    %c1_199 = arith.constant 1 : index
    %c0_200 = arith.constant 0 : index
    %309 = vector.load %arg12[%c2_198, %c1_199, %c0_200] : memref<7x6x32xf32, #tpu.memory_space<vmem>>, vector<1x1x32xf32>
    %310 = vector.shape_cast %309 : vector<1x1x32xf32> to vector<1x32xf32>
    %311 = vector.broadcast %310 : vector<1x32xf32> to vector<2x32xf32>
    %312 = arith.addf %308, %311 : vector<2x32xf32>
    %313 = arith.addf %296, %312 : vector<2x32xf32>
    %c2_201 = arith.constant 2 : index
    %c4_202 = arith.constant 4 : index
    %c0_203 = arith.constant 0 : index
    %314 = vector.load %arg12[%c2_201, %c4_202, %c0_203] : memref<7x6x32xf32, #tpu.memory_space<vmem>>, vector<1x1x32xf32>
    %315 = vector.shape_cast %314 : vector<1x1x32xf32> to vector<1x32xf32>
    %c2_204 = arith.constant 2 : index
    %c5_205 = arith.constant 5 : index
    %c0_206 = arith.constant 0 : index
    %316 = vector.load %arg12[%c2_204, %c5_205, %c0_206] : memref<7x6x32xf32, #tpu.memory_space<vmem>>, vector<1x1x32xf32>
    %317 = vector.shape_cast %316 : vector<1x1x32xf32> to vector<1x32xf32>
    %cst_207 = arith.constant dense<0.000000e+00> : vector<2xf32>
    %318 = vector.multi_reduction <add>, %313, %cst_207 [1] : vector<2x32xf32> to vector<2xf32>
    %319 = vector.shape_cast %318 : vector<2xf32> to vector<2x1xf32>
    %cst_208 = arith.constant 3.200000e+01 : f32
    %320 = vector.broadcast %cst_208 : f32 to vector<2x1xf32>
    %321 = arith.divf %319, %320 : vector<2x1xf32>
    %322 = vector.broadcast %321 : vector<2x1xf32> to vector<2x32xf32>
    %323 = arith.subf %313, %322 : vector<2x32xf32>
    %324 = arith.mulf %323, %323 : vector<2x32xf32>
    %cst_209 = arith.constant dense<0.000000e+00> : vector<2xf32>
    %325 = vector.multi_reduction <add>, %324, %cst_209 [1] : vector<2x32xf32> to vector<2xf32>
    %326 = vector.shape_cast %325 : vector<2xf32> to vector<2x1xf32>
    %cst_210 = arith.constant 3.200000e+01 : f32
    %327 = vector.broadcast %cst_210 : f32 to vector<2x1xf32>
    %328 = arith.divf %326, %327 : vector<2x1xf32>
    %329 = vector.broadcast %321 : vector<2x1xf32> to vector<2x32xf32>
    %330 = arith.subf %313, %329 : vector<2x32xf32>
    %cst_211 = arith.constant 9.99999974E-6 : f32
    %331 = vector.broadcast %cst_211 : f32 to vector<2x1xf32>
    %332 = arith.addf %328, %331 : vector<2x1xf32>
    %333 = math.rsqrt %332 : vector<2x1xf32>
    %334 = vector.broadcast %333 : vector<2x1xf32> to vector<2x32xf32>
    %335 = arith.mulf %330, %334 : vector<2x32xf32>
    %336 = vector.broadcast %315 : vector<1x32xf32> to vector<2x32xf32>
    %337 = arith.mulf %335, %336 : vector<2x32xf32>
    %338 = vector.broadcast %317 : vector<1x32xf32> to vector<2x32xf32>
    %339 = arith.addf %337, %338 : vector<2x32xf32>
    %c3_212 = arith.constant 3 : index
    %c0_213 = arith.constant 0 : index
    %c0_214 = arith.constant 0 : index
    %340 = vector.load %arg8[%c3_212, %c0_213, %c0_214] : memref<7x32x32xf32, #tpu.memory_space<vmem>>, vector<1x32x32xf32>
    %341 = vector.shape_cast %340 : vector<1x32x32xf32> to vector<32x32xf32>
    %cst_215 = arith.constant dense<0.000000e+00> : vector<2x32xf32>
    %342 = tpu.matmul %339, %341, %cst_215 {dimension_numbers = #tpu.dot_dimension_numbers<[1], [0], [0], [1], [0, 0, 1, 1], [], []>} : vector<2x32xf32>, vector<32x32xf32>, vector<2x32xf32> -> vector<2x32xf32>
    %c3_216 = arith.constant 3 : index
    %c0_217 = arith.constant 0 : index
    %c0_218 = arith.constant 0 : index
    %343 = vector.load %arg12[%c3_216, %c0_217, %c0_218] : memref<7x6x32xf32, #tpu.memory_space<vmem>>, vector<1x1x32xf32>
    %344 = vector.shape_cast %343 : vector<1x1x32xf32> to vector<1x32xf32>
    %345 = vector.broadcast %344 : vector<1x32xf32> to vector<2x32xf32>
    %346 = arith.addf %342, %345 : vector<2x32xf32>
    %347 = arith.addf %339, %346 : vector<2x32xf32>
    %c3_219 = arith.constant 3 : index
    %c2_220 = arith.constant 2 : index
    %c0_221 = arith.constant 0 : index
    %348 = vector.load %arg12[%c3_219, %c2_220, %c0_221] : memref<7x6x32xf32, #tpu.memory_space<vmem>>, vector<1x1x32xf32>
    %349 = vector.shape_cast %348 : vector<1x1x32xf32> to vector<1x32xf32>
    %c3_222 = arith.constant 3 : index
    %c3_223 = arith.constant 3 : index
    %c0_224 = arith.constant 0 : index
    %350 = vector.load %arg12[%c3_222, %c3_223, %c0_224] : memref<7x6x32xf32, #tpu.memory_space<vmem>>, vector<1x1x32xf32>
    %351 = vector.shape_cast %350 : vector<1x1x32xf32> to vector<1x32xf32>
    %cst_225 = arith.constant dense<0.000000e+00> : vector<2xf32>
    %352 = vector.multi_reduction <add>, %347, %cst_225 [1] : vector<2x32xf32> to vector<2xf32>
    %353 = vector.shape_cast %352 : vector<2xf32> to vector<2x1xf32>
    %cst_226 = arith.constant 3.200000e+01 : f32
    %354 = vector.broadcast %cst_226 : f32 to vector<2x1xf32>
    %355 = arith.divf %353, %354 : vector<2x1xf32>
    %356 = vector.broadcast %355 : vector<2x1xf32> to vector<2x32xf32>
    %357 = arith.subf %347, %356 : vector<2x32xf32>
    %358 = arith.mulf %357, %357 : vector<2x32xf32>
    %cst_227 = arith.constant dense<0.000000e+00> : vector<2xf32>
    %359 = vector.multi_reduction <add>, %358, %cst_227 [1] : vector<2x32xf32> to vector<2xf32>
    %360 = vector.shape_cast %359 : vector<2xf32> to vector<2x1xf32>
    %cst_228 = arith.constant 3.200000e+01 : f32
    %361 = vector.broadcast %cst_228 : f32 to vector<2x1xf32>
    %362 = arith.divf %360, %361 : vector<2x1xf32>
    %363 = vector.broadcast %355 : vector<2x1xf32> to vector<2x32xf32>
    %364 = arith.subf %347, %363 : vector<2x32xf32>
    %cst_229 = arith.constant 9.99999974E-6 : f32
    %365 = vector.broadcast %cst_229 : f32 to vector<2x1xf32>
    %366 = arith.addf %362, %365 : vector<2x1xf32>
    %367 = math.rsqrt %366 : vector<2x1xf32>
    %368 = vector.broadcast %367 : vector<2x1xf32> to vector<2x32xf32>
    %369 = arith.mulf %364, %368 : vector<2x32xf32>
    %370 = vector.broadcast %349 : vector<1x32xf32> to vector<2x32xf32>
    %371 = arith.mulf %369, %370 : vector<2x32xf32>
    %372 = vector.broadcast %351 : vector<1x32xf32> to vector<2x32xf32>
    %373 = arith.addf %371, %372 : vector<2x32xf32>
    %c3_230 = arith.constant 3 : index
    %c0_231 = arith.constant 0 : index
    %c0_232 = arith.constant 0 : index
    %374 = vector.load %arg9[%c3_230, %c0_231, %c0_232] : memref<7x32x64xf32, #tpu.memory_space<vmem>>, vector<1x32x64xf32>
    %375 = vector.shape_cast %374 : vector<1x32x64xf32> to vector<32x64xf32>
    %cst_233 = arith.constant dense<0.000000e+00> : vector<2x64xf32>
    %376 = tpu.matmul %373, %375, %cst_233 {dimension_numbers = #tpu.dot_dimension_numbers<[1], [0], [0], [1], [0, 0, 1, 1], [], []>} : vector<2x32xf32>, vector<32x64xf32>, vector<2x64xf32> -> vector<2x64xf32>
    %c3_234 = arith.constant 3 : index
    %c0_235 = arith.constant 0 : index
    %c0_236 = arith.constant 0 : index
    %377 = vector.load %arg10[%c3_234, %c0_235, %c0_236] : memref<7x1x64xf32, #tpu.memory_space<vmem>>, vector<1x1x64xf32>
    %378 = vector.shape_cast %377 : vector<1x1x64xf32> to vector<1x64xf32>
    %379 = vector.broadcast %378 : vector<1x64xf32> to vector<2x64xf32>
    %380 = arith.addf %376, %379 : vector<2x64xf32>
    %cst_237 = arith.constant 0.000000e+00 : f32
    %381 = vector.broadcast %cst_237 : f32 to vector<2x64xf32>
    %382 = arith.maximumf %380, %381 : vector<2x64xf32>
    %c3_238 = arith.constant 3 : index
    %c0_239 = arith.constant 0 : index
    %c0_240 = arith.constant 0 : index
    %383 = vector.load %arg11[%c3_238, %c0_239, %c0_240] : memref<7x64x32xf32, #tpu.memory_space<vmem>>, vector<1x64x32xf32>
    %384 = vector.shape_cast %383 : vector<1x64x32xf32> to vector<64x32xf32>
    %cst_241 = arith.constant dense<0.000000e+00> : vector<2x32xf32>
    %385 = tpu.matmul %382, %384, %cst_241 {dimension_numbers = #tpu.dot_dimension_numbers<[1], [0], [0], [1], [0, 0, 1, 1], [], []>} : vector<2x64xf32>, vector<64x32xf32>, vector<2x32xf32> -> vector<2x32xf32>
    %c3_242 = arith.constant 3 : index
    %c1_243 = arith.constant 1 : index
    %c0_244 = arith.constant 0 : index
    %386 = vector.load %arg12[%c3_242, %c1_243, %c0_244] : memref<7x6x32xf32, #tpu.memory_space<vmem>>, vector<1x1x32xf32>
    %387 = vector.shape_cast %386 : vector<1x1x32xf32> to vector<1x32xf32>
    %388 = vector.broadcast %387 : vector<1x32xf32> to vector<2x32xf32>
    %389 = arith.addf %385, %388 : vector<2x32xf32>
    %390 = arith.addf %373, %389 : vector<2x32xf32>
    %c3_245 = arith.constant 3 : index
    %c4_246 = arith.constant 4 : index
    %c0_247 = arith.constant 0 : index
    %391 = vector.load %arg12[%c3_245, %c4_246, %c0_247] : memref<7x6x32xf32, #tpu.memory_space<vmem>>, vector<1x1x32xf32>
    %392 = vector.shape_cast %391 : vector<1x1x32xf32> to vector<1x32xf32>
    %c3_248 = arith.constant 3 : index
    %c5_249 = arith.constant 5 : index
    %c0_250 = arith.constant 0 : index
    %393 = vector.load %arg12[%c3_248, %c5_249, %c0_250] : memref<7x6x32xf32, #tpu.memory_space<vmem>>, vector<1x1x32xf32>
    %394 = vector.shape_cast %393 : vector<1x1x32xf32> to vector<1x32xf32>
    %cst_251 = arith.constant dense<0.000000e+00> : vector<2xf32>
    %395 = vector.multi_reduction <add>, %390, %cst_251 [1] : vector<2x32xf32> to vector<2xf32>
    %396 = vector.shape_cast %395 : vector<2xf32> to vector<2x1xf32>
    %cst_252 = arith.constant 3.200000e+01 : f32
    %397 = vector.broadcast %cst_252 : f32 to vector<2x1xf32>
    %398 = arith.divf %396, %397 : vector<2x1xf32>
    %399 = vector.broadcast %398 : vector<2x1xf32> to vector<2x32xf32>
    %400 = arith.subf %390, %399 : vector<2x32xf32>
    %401 = arith.mulf %400, %400 : vector<2x32xf32>
    %cst_253 = arith.constant dense<0.000000e+00> : vector<2xf32>
    %402 = vector.multi_reduction <add>, %401, %cst_253 [1] : vector<2x32xf32> to vector<2xf32>
    %403 = vector.shape_cast %402 : vector<2xf32> to vector<2x1xf32>
    %cst_254 = arith.constant 3.200000e+01 : f32
    %404 = vector.broadcast %cst_254 : f32 to vector<2x1xf32>
    %405 = arith.divf %403, %404 : vector<2x1xf32>
    %406 = vector.broadcast %398 : vector<2x1xf32> to vector<2x32xf32>
    %407 = arith.subf %390, %406 : vector<2x32xf32>
    %cst_255 = arith.constant 9.99999974E-6 : f32
    %408 = vector.broadcast %cst_255 : f32 to vector<2x1xf32>
    %409 = arith.addf %405, %408 : vector<2x1xf32>
    %410 = math.rsqrt %409 : vector<2x1xf32>
    %411 = vector.broadcast %410 : vector<2x1xf32> to vector<2x32xf32>
    %412 = arith.mulf %407, %411 : vector<2x32xf32>
    %413 = vector.broadcast %392 : vector<1x32xf32> to vector<2x32xf32>
    %414 = arith.mulf %412, %413 : vector<2x32xf32>
    %415 = vector.broadcast %394 : vector<1x32xf32> to vector<2x32xf32>
    %416 = arith.addf %414, %415 : vector<2x32xf32>
    %c4_256 = arith.constant 4 : index
    %c0_257 = arith.constant 0 : index
    %c0_258 = arith.constant 0 : index
    %417 = vector.load %arg8[%c4_256, %c0_257, %c0_258] : memref<7x32x32xf32, #tpu.memory_space<vmem>>, vector<1x32x32xf32>
    %418 = vector.shape_cast %417 : vector<1x32x32xf32> to vector<32x32xf32>
    %cst_259 = arith.constant dense<0.000000e+00> : vector<2x32xf32>
    %419 = tpu.matmul %7, %418, %cst_259 {dimension_numbers = #tpu.dot_dimension_numbers<[1], [0], [0], [1], [0, 0, 1, 1], [], []>} : vector<2x32xf32>, vector<32x32xf32>, vector<2x32xf32> -> vector<2x32xf32>
    %c4_260 = arith.constant 4 : index
    %c0_261 = arith.constant 0 : index
    %c0_262 = arith.constant 0 : index
    %420 = vector.load %arg12[%c4_260, %c0_261, %c0_262] : memref<7x6x32xf32, #tpu.memory_space<vmem>>, vector<1x1x32xf32>
    %421 = vector.shape_cast %420 : vector<1x1x32xf32> to vector<1x32xf32>
    %422 = vector.broadcast %421 : vector<1x32xf32> to vector<2x32xf32>
    %423 = arith.addf %419, %422 : vector<2x32xf32>
    %424 = arith.addf %7, %423 : vector<2x32xf32>
    %c4_263 = arith.constant 4 : index
    %c2_264 = arith.constant 2 : index
    %c0_265 = arith.constant 0 : index
    %425 = vector.load %arg12[%c4_263, %c2_264, %c0_265] : memref<7x6x32xf32, #tpu.memory_space<vmem>>, vector<1x1x32xf32>
    %426 = vector.shape_cast %425 : vector<1x1x32xf32> to vector<1x32xf32>
    %c4_266 = arith.constant 4 : index
    %c3_267 = arith.constant 3 : index
    %c0_268 = arith.constant 0 : index
    %427 = vector.load %arg12[%c4_266, %c3_267, %c0_268] : memref<7x6x32xf32, #tpu.memory_space<vmem>>, vector<1x1x32xf32>
    %428 = vector.shape_cast %427 : vector<1x1x32xf32> to vector<1x32xf32>
    %cst_269 = arith.constant dense<0.000000e+00> : vector<2xf32>
    %429 = vector.multi_reduction <add>, %424, %cst_269 [1] : vector<2x32xf32> to vector<2xf32>
    %430 = vector.shape_cast %429 : vector<2xf32> to vector<2x1xf32>
    %cst_270 = arith.constant 3.200000e+01 : f32
    %431 = vector.broadcast %cst_270 : f32 to vector<2x1xf32>
    %432 = arith.divf %430, %431 : vector<2x1xf32>
    %433 = vector.broadcast %432 : vector<2x1xf32> to vector<2x32xf32>
    %434 = arith.subf %424, %433 : vector<2x32xf32>
    %435 = arith.mulf %434, %434 : vector<2x32xf32>
    %cst_271 = arith.constant dense<0.000000e+00> : vector<2xf32>
    %436 = vector.multi_reduction <add>, %435, %cst_271 [1] : vector<2x32xf32> to vector<2xf32>
    %437 = vector.shape_cast %436 : vector<2xf32> to vector<2x1xf32>
    %cst_272 = arith.constant 3.200000e+01 : f32
    %438 = vector.broadcast %cst_272 : f32 to vector<2x1xf32>
    %439 = arith.divf %437, %438 : vector<2x1xf32>
    %440 = vector.broadcast %432 : vector<2x1xf32> to vector<2x32xf32>
    %441 = arith.subf %424, %440 : vector<2x32xf32>
    %cst_273 = arith.constant 9.99999974E-6 : f32
    %442 = vector.broadcast %cst_273 : f32 to vector<2x1xf32>
    %443 = arith.addf %439, %442 : vector<2x1xf32>
    %444 = math.rsqrt %443 : vector<2x1xf32>
    %445 = vector.broadcast %444 : vector<2x1xf32> to vector<2x32xf32>
    %446 = arith.mulf %441, %445 : vector<2x32xf32>
    %447 = vector.broadcast %426 : vector<1x32xf32> to vector<2x32xf32>
    %448 = arith.mulf %446, %447 : vector<2x32xf32>
    %449 = vector.broadcast %428 : vector<1x32xf32> to vector<2x32xf32>
    %450 = arith.addf %448, %449 : vector<2x32xf32>
    %c4_274 = arith.constant 4 : index
    %c0_275 = arith.constant 0 : index
    %c0_276 = arith.constant 0 : index
    %451 = vector.load %arg9[%c4_274, %c0_275, %c0_276] : memref<7x32x64xf32, #tpu.memory_space<vmem>>, vector<1x32x64xf32>
    %452 = vector.shape_cast %451 : vector<1x32x64xf32> to vector<32x64xf32>
    %cst_277 = arith.constant dense<0.000000e+00> : vector<2x64xf32>
    %453 = tpu.matmul %450, %452, %cst_277 {dimension_numbers = #tpu.dot_dimension_numbers<[1], [0], [0], [1], [0, 0, 1, 1], [], []>} : vector<2x32xf32>, vector<32x64xf32>, vector<2x64xf32> -> vector<2x64xf32>
    %c4_278 = arith.constant 4 : index
    %c0_279 = arith.constant 0 : index
    %c0_280 = arith.constant 0 : index
    %454 = vector.load %arg10[%c4_278, %c0_279, %c0_280] : memref<7x1x64xf32, #tpu.memory_space<vmem>>, vector<1x1x64xf32>
    %455 = vector.shape_cast %454 : vector<1x1x64xf32> to vector<1x64xf32>
    %456 = vector.broadcast %455 : vector<1x64xf32> to vector<2x64xf32>
    %457 = arith.addf %453, %456 : vector<2x64xf32>
    %cst_281 = arith.constant 0.000000e+00 : f32
    %458 = vector.broadcast %cst_281 : f32 to vector<2x64xf32>
    %459 = arith.maximumf %457, %458 : vector<2x64xf32>
    %c4_282 = arith.constant 4 : index
    %c0_283 = arith.constant 0 : index
    %c0_284 = arith.constant 0 : index
    %460 = vector.load %arg11[%c4_282, %c0_283, %c0_284] : memref<7x64x32xf32, #tpu.memory_space<vmem>>, vector<1x64x32xf32>
    %461 = vector.shape_cast %460 : vector<1x64x32xf32> to vector<64x32xf32>
    %cst_285 = arith.constant dense<0.000000e+00> : vector<2x32xf32>
    %462 = tpu.matmul %459, %461, %cst_285 {dimension_numbers = #tpu.dot_dimension_numbers<[1], [0], [0], [1], [0, 0, 1, 1], [], []>} : vector<2x64xf32>, vector<64x32xf32>, vector<2x32xf32> -> vector<2x32xf32>
    %c4_286 = arith.constant 4 : index
    %c1_287 = arith.constant 1 : index
    %c0_288 = arith.constant 0 : index
    %463 = vector.load %arg12[%c4_286, %c1_287, %c0_288] : memref<7x6x32xf32, #tpu.memory_space<vmem>>, vector<1x1x32xf32>
    %464 = vector.shape_cast %463 : vector<1x1x32xf32> to vector<1x32xf32>
    %465 = vector.broadcast %464 : vector<1x32xf32> to vector<2x32xf32>
    %466 = arith.addf %462, %465 : vector<2x32xf32>
    %467 = arith.addf %450, %466 : vector<2x32xf32>
    %c4_289 = arith.constant 4 : index
    %c4_290 = arith.constant 4 : index
    %c0_291 = arith.constant 0 : index
    %468 = vector.load %arg12[%c4_289, %c4_290, %c0_291] : memref<7x6x32xf32, #tpu.memory_space<vmem>>, vector<1x1x32xf32>
    %469 = vector.shape_cast %468 : vector<1x1x32xf32> to vector<1x32xf32>
    %c4_292 = arith.constant 4 : index
    %c5_293 = arith.constant 5 : index
    %c0_294 = arith.constant 0 : index
    %470 = vector.load %arg12[%c4_292, %c5_293, %c0_294] : memref<7x6x32xf32, #tpu.memory_space<vmem>>, vector<1x1x32xf32>
    %471 = vector.shape_cast %470 : vector<1x1x32xf32> to vector<1x32xf32>
    %cst_295 = arith.constant dense<0.000000e+00> : vector<2xf32>
    %472 = vector.multi_reduction <add>, %467, %cst_295 [1] : vector<2x32xf32> to vector<2xf32>
    %473 = vector.shape_cast %472 : vector<2xf32> to vector<2x1xf32>
    %cst_296 = arith.constant 3.200000e+01 : f32
    %474 = vector.broadcast %cst_296 : f32 to vector<2x1xf32>
    %475 = arith.divf %473, %474 : vector<2x1xf32>
    %476 = vector.broadcast %475 : vector<2x1xf32> to vector<2x32xf32>
    %477 = arith.subf %467, %476 : vector<2x32xf32>
    %478 = arith.mulf %477, %477 : vector<2x32xf32>
    %cst_297 = arith.constant dense<0.000000e+00> : vector<2xf32>
    %479 = vector.multi_reduction <add>, %478, %cst_297 [1] : vector<2x32xf32> to vector<2xf32>
    %480 = vector.shape_cast %479 : vector<2xf32> to vector<2x1xf32>
    %cst_298 = arith.constant 3.200000e+01 : f32
    %481 = vector.broadcast %cst_298 : f32 to vector<2x1xf32>
    %482 = arith.divf %480, %481 : vector<2x1xf32>
    %483 = vector.broadcast %475 : vector<2x1xf32> to vector<2x32xf32>
    %484 = arith.subf %467, %483 : vector<2x32xf32>
    %cst_299 = arith.constant 9.99999974E-6 : f32
    %485 = vector.broadcast %cst_299 : f32 to vector<2x1xf32>
    %486 = arith.addf %482, %485 : vector<2x1xf32>
    %487 = math.rsqrt %486 : vector<2x1xf32>
    %488 = vector.broadcast %487 : vector<2x1xf32> to vector<2x32xf32>
    %489 = arith.mulf %484, %488 : vector<2x32xf32>
    %490 = vector.broadcast %469 : vector<1x32xf32> to vector<2x32xf32>
    %491 = arith.mulf %489, %490 : vector<2x32xf32>
    %492 = vector.broadcast %471 : vector<1x32xf32> to vector<2x32xf32>
    %493 = arith.addf %491, %492 : vector<2x32xf32>
    %c5_300 = arith.constant 5 : index
    %c0_301 = arith.constant 0 : index
    %c0_302 = arith.constant 0 : index
    %494 = vector.load %arg8[%c5_300, %c0_301, %c0_302] : memref<7x32x32xf32, #tpu.memory_space<vmem>>, vector<1x32x32xf32>
    %495 = vector.shape_cast %494 : vector<1x32x32xf32> to vector<32x32xf32>
    %cst_303 = arith.constant dense<0.000000e+00> : vector<2x32xf32>
    %496 = tpu.matmul %493, %495, %cst_303 {dimension_numbers = #tpu.dot_dimension_numbers<[1], [0], [0], [1], [0, 0, 1, 1], [], []>} : vector<2x32xf32>, vector<32x32xf32>, vector<2x32xf32> -> vector<2x32xf32>
    %c5_304 = arith.constant 5 : index
    %c0_305 = arith.constant 0 : index
    %c0_306 = arith.constant 0 : index
    %497 = vector.load %arg12[%c5_304, %c0_305, %c0_306] : memref<7x6x32xf32, #tpu.memory_space<vmem>>, vector<1x1x32xf32>
    %498 = vector.shape_cast %497 : vector<1x1x32xf32> to vector<1x32xf32>
    %499 = vector.broadcast %498 : vector<1x32xf32> to vector<2x32xf32>
    %500 = arith.addf %496, %499 : vector<2x32xf32>
    %501 = arith.addf %493, %500 : vector<2x32xf32>
    %c5_307 = arith.constant 5 : index
    %c2_308 = arith.constant 2 : index
    %c0_309 = arith.constant 0 : index
    %502 = vector.load %arg12[%c5_307, %c2_308, %c0_309] : memref<7x6x32xf32, #tpu.memory_space<vmem>>, vector<1x1x32xf32>
    %503 = vector.shape_cast %502 : vector<1x1x32xf32> to vector<1x32xf32>
    %c5_310 = arith.constant 5 : index
    %c3_311 = arith.constant 3 : index
    %c0_312 = arith.constant 0 : index
    %504 = vector.load %arg12[%c5_310, %c3_311, %c0_312] : memref<7x6x32xf32, #tpu.memory_space<vmem>>, vector<1x1x32xf32>
    %505 = vector.shape_cast %504 : vector<1x1x32xf32> to vector<1x32xf32>
    %cst_313 = arith.constant dense<0.000000e+00> : vector<2xf32>
    %506 = vector.multi_reduction <add>, %501, %cst_313 [1] : vector<2x32xf32> to vector<2xf32>
    %507 = vector.shape_cast %506 : vector<2xf32> to vector<2x1xf32>
    %cst_314 = arith.constant 3.200000e+01 : f32
    %508 = vector.broadcast %cst_314 : f32 to vector<2x1xf32>
    %509 = arith.divf %507, %508 : vector<2x1xf32>
    %510 = vector.broadcast %509 : vector<2x1xf32> to vector<2x32xf32>
    %511 = arith.subf %501, %510 : vector<2x32xf32>
    %512 = arith.mulf %511, %511 : vector<2x32xf32>
    %cst_315 = arith.constant dense<0.000000e+00> : vector<2xf32>
    %513 = vector.multi_reduction <add>, %512, %cst_315 [1] : vector<2x32xf32> to vector<2xf32>
    %514 = vector.shape_cast %513 : vector<2xf32> to vector<2x1xf32>
    %cst_316 = arith.constant 3.200000e+01 : f32
    %515 = vector.broadcast %cst_316 : f32 to vector<2x1xf32>
    %516 = arith.divf %514, %515 : vector<2x1xf32>
    %517 = vector.broadcast %509 : vector<2x1xf32> to vector<2x32xf32>
    %518 = arith.subf %501, %517 : vector<2x32xf32>
    %cst_317 = arith.constant 9.99999974E-6 : f32
    %519 = vector.broadcast %cst_317 : f32 to vector<2x1xf32>
    %520 = arith.addf %516, %519 : vector<2x1xf32>
    %521 = math.rsqrt %520 : vector<2x1xf32>
    %522 = vector.broadcast %521 : vector<2x1xf32> to vector<2x32xf32>
    %523 = arith.mulf %518, %522 : vector<2x32xf32>
    %524 = vector.broadcast %503 : vector<1x32xf32> to vector<2x32xf32>
    %525 = arith.mulf %523, %524 : vector<2x32xf32>
    %526 = vector.broadcast %505 : vector<1x32xf32> to vector<2x32xf32>
    %527 = arith.addf %525, %526 : vector<2x32xf32>
    %c5_318 = arith.constant 5 : index
    %c0_319 = arith.constant 0 : index
    %c0_320 = arith.constant 0 : index
    %528 = vector.load %arg9[%c5_318, %c0_319, %c0_320] : memref<7x32x64xf32, #tpu.memory_space<vmem>>, vector<1x32x64xf32>
    %529 = vector.shape_cast %528 : vector<1x32x64xf32> to vector<32x64xf32>
    %cst_321 = arith.constant dense<0.000000e+00> : vector<2x64xf32>
    %530 = tpu.matmul %527, %529, %cst_321 {dimension_numbers = #tpu.dot_dimension_numbers<[1], [0], [0], [1], [0, 0, 1, 1], [], []>} : vector<2x32xf32>, vector<32x64xf32>, vector<2x64xf32> -> vector<2x64xf32>
    %c5_322 = arith.constant 5 : index
    %c0_323 = arith.constant 0 : index
    %c0_324 = arith.constant 0 : index
    %531 = vector.load %arg10[%c5_322, %c0_323, %c0_324] : memref<7x1x64xf32, #tpu.memory_space<vmem>>, vector<1x1x64xf32>
    %532 = vector.shape_cast %531 : vector<1x1x64xf32> to vector<1x64xf32>
    %533 = vector.broadcast %532 : vector<1x64xf32> to vector<2x64xf32>
    %534 = arith.addf %530, %533 : vector<2x64xf32>
    %cst_325 = arith.constant 0.000000e+00 : f32
    %535 = vector.broadcast %cst_325 : f32 to vector<2x64xf32>
    %536 = arith.maximumf %534, %535 : vector<2x64xf32>
    %c5_326 = arith.constant 5 : index
    %c0_327 = arith.constant 0 : index
    %c0_328 = arith.constant 0 : index
    %537 = vector.load %arg11[%c5_326, %c0_327, %c0_328] : memref<7x64x32xf32, #tpu.memory_space<vmem>>, vector<1x64x32xf32>
    %538 = vector.shape_cast %537 : vector<1x64x32xf32> to vector<64x32xf32>
    %cst_329 = arith.constant dense<0.000000e+00> : vector<2x32xf32>
    %539 = tpu.matmul %536, %538, %cst_329 {dimension_numbers = #tpu.dot_dimension_numbers<[1], [0], [0], [1], [0, 0, 1, 1], [], []>} : vector<2x64xf32>, vector<64x32xf32>, vector<2x32xf32> -> vector<2x32xf32>
    %c5_330 = arith.constant 5 : index
    %c1_331 = arith.constant 1 : index
    %c0_332 = arith.constant 0 : index
    %540 = vector.load %arg12[%c5_330, %c1_331, %c0_332] : memref<7x6x32xf32, #tpu.memory_space<vmem>>, vector<1x1x32xf32>
    %541 = vector.shape_cast %540 : vector<1x1x32xf32> to vector<1x32xf32>
    %542 = vector.broadcast %541 : vector<1x32xf32> to vector<2x32xf32>
    %543 = arith.addf %539, %542 : vector<2x32xf32>
    %544 = arith.addf %527, %543 : vector<2x32xf32>
    %c5_333 = arith.constant 5 : index
    %c4_334 = arith.constant 4 : index
    %c0_335 = arith.constant 0 : index
    %545 = vector.load %arg12[%c5_333, %c4_334, %c0_335] : memref<7x6x32xf32, #tpu.memory_space<vmem>>, vector<1x1x32xf32>
    %546 = vector.shape_cast %545 : vector<1x1x32xf32> to vector<1x32xf32>
    %c5_336 = arith.constant 5 : index
    %c5_337 = arith.constant 5 : index
    %c0_338 = arith.constant 0 : index
    %547 = vector.load %arg12[%c5_336, %c5_337, %c0_338] : memref<7x6x32xf32, #tpu.memory_space<vmem>>, vector<1x1x32xf32>
    %548 = vector.shape_cast %547 : vector<1x1x32xf32> to vector<1x32xf32>
    %cst_339 = arith.constant dense<0.000000e+00> : vector<2xf32>
    %549 = vector.multi_reduction <add>, %544, %cst_339 [1] : vector<2x32xf32> to vector<2xf32>
    %550 = vector.shape_cast %549 : vector<2xf32> to vector<2x1xf32>
    %cst_340 = arith.constant 3.200000e+01 : f32
    %551 = vector.broadcast %cst_340 : f32 to vector<2x1xf32>
    %552 = arith.divf %550, %551 : vector<2x1xf32>
    %553 = vector.broadcast %552 : vector<2x1xf32> to vector<2x32xf32>
    %554 = arith.subf %544, %553 : vector<2x32xf32>
    %555 = arith.mulf %554, %554 : vector<2x32xf32>
    %cst_341 = arith.constant dense<0.000000e+00> : vector<2xf32>
    %556 = vector.multi_reduction <add>, %555, %cst_341 [1] : vector<2x32xf32> to vector<2xf32>
    %557 = vector.shape_cast %556 : vector<2xf32> to vector<2x1xf32>
    %cst_342 = arith.constant 3.200000e+01 : f32
    %558 = vector.broadcast %cst_342 : f32 to vector<2x1xf32>
    %559 = arith.divf %557, %558 : vector<2x1xf32>
    %560 = vector.broadcast %552 : vector<2x1xf32> to vector<2x32xf32>
    %561 = arith.subf %544, %560 : vector<2x32xf32>
    %cst_343 = arith.constant 9.99999974E-6 : f32
    %562 = vector.broadcast %cst_343 : f32 to vector<2x1xf32>
    %563 = arith.addf %559, %562 : vector<2x1xf32>
    %564 = math.rsqrt %563 : vector<2x1xf32>
    %565 = vector.broadcast %564 : vector<2x1xf32> to vector<2x32xf32>
    %566 = arith.mulf %561, %565 : vector<2x32xf32>
    %567 = vector.broadcast %546 : vector<1x32xf32> to vector<2x32xf32>
    %568 = arith.mulf %566, %567 : vector<2x32xf32>
    %569 = vector.broadcast %548 : vector<1x32xf32> to vector<2x32xf32>
    %570 = arith.addf %568, %569 : vector<2x32xf32>
    %c6 = arith.constant 6 : index
    %c0_344 = arith.constant 0 : index
    %c0_345 = arith.constant 0 : index
    %571 = vector.load %arg8[%c6, %c0_344, %c0_345] : memref<7x32x32xf32, #tpu.memory_space<vmem>>, vector<1x32x32xf32>
    %572 = vector.shape_cast %571 : vector<1x32x32xf32> to vector<32x32xf32>
    %cst_346 = arith.constant dense<0.000000e+00> : vector<2x32xf32>
    %573 = tpu.matmul %570, %572, %cst_346 {dimension_numbers = #tpu.dot_dimension_numbers<[1], [0], [0], [1], [0, 0, 1, 1], [], []>} : vector<2x32xf32>, vector<32x32xf32>, vector<2x32xf32> -> vector<2x32xf32>
    %c6_347 = arith.constant 6 : index
    %c0_348 = arith.constant 0 : index
    %c0_349 = arith.constant 0 : index
    %574 = vector.load %arg12[%c6_347, %c0_348, %c0_349] : memref<7x6x32xf32, #tpu.memory_space<vmem>>, vector<1x1x32xf32>
    %575 = vector.shape_cast %574 : vector<1x1x32xf32> to vector<1x32xf32>
    %576 = vector.broadcast %575 : vector<1x32xf32> to vector<2x32xf32>
    %577 = arith.addf %573, %576 : vector<2x32xf32>
    %578 = arith.addf %570, %577 : vector<2x32xf32>
    %c6_350 = arith.constant 6 : index
    %c2_351 = arith.constant 2 : index
    %c0_352 = arith.constant 0 : index
    %579 = vector.load %arg12[%c6_350, %c2_351, %c0_352] : memref<7x6x32xf32, #tpu.memory_space<vmem>>, vector<1x1x32xf32>
    %580 = vector.shape_cast %579 : vector<1x1x32xf32> to vector<1x32xf32>
    %c6_353 = arith.constant 6 : index
    %c3_354 = arith.constant 3 : index
    %c0_355 = arith.constant 0 : index
    %581 = vector.load %arg12[%c6_353, %c3_354, %c0_355] : memref<7x6x32xf32, #tpu.memory_space<vmem>>, vector<1x1x32xf32>
    %582 = vector.shape_cast %581 : vector<1x1x32xf32> to vector<1x32xf32>
    %cst_356 = arith.constant dense<0.000000e+00> : vector<2xf32>
    %583 = vector.multi_reduction <add>, %578, %cst_356 [1] : vector<2x32xf32> to vector<2xf32>
    %584 = vector.shape_cast %583 : vector<2xf32> to vector<2x1xf32>
    %cst_357 = arith.constant 3.200000e+01 : f32
    %585 = vector.broadcast %cst_357 : f32 to vector<2x1xf32>
    %586 = arith.divf %584, %585 : vector<2x1xf32>
    %587 = vector.broadcast %586 : vector<2x1xf32> to vector<2x32xf32>
    %588 = arith.subf %578, %587 : vector<2x32xf32>
    %589 = arith.mulf %588, %588 : vector<2x32xf32>
    %cst_358 = arith.constant dense<0.000000e+00> : vector<2xf32>
    %590 = vector.multi_reduction <add>, %589, %cst_358 [1] : vector<2x32xf32> to vector<2xf32>
    %591 = vector.shape_cast %590 : vector<2xf32> to vector<2x1xf32>
    %cst_359 = arith.constant 3.200000e+01 : f32
    %592 = vector.broadcast %cst_359 : f32 to vector<2x1xf32>
    %593 = arith.divf %591, %592 : vector<2x1xf32>
    %594 = vector.broadcast %586 : vector<2x1xf32> to vector<2x32xf32>
    %595 = arith.subf %578, %594 : vector<2x32xf32>
    %cst_360 = arith.constant 9.99999974E-6 : f32
    %596 = vector.broadcast %cst_360 : f32 to vector<2x1xf32>
    %597 = arith.addf %593, %596 : vector<2x1xf32>
    %598 = math.rsqrt %597 : vector<2x1xf32>
    %599 = vector.broadcast %598 : vector<2x1xf32> to vector<2x32xf32>
    %600 = arith.mulf %595, %599 : vector<2x32xf32>
    %601 = vector.broadcast %580 : vector<1x32xf32> to vector<2x32xf32>
    %602 = arith.mulf %600, %601 : vector<2x32xf32>
    %603 = vector.broadcast %582 : vector<1x32xf32> to vector<2x32xf32>
    %604 = arith.addf %602, %603 : vector<2x32xf32>
    %c6_361 = arith.constant 6 : index
    %c0_362 = arith.constant 0 : index
    %c0_363 = arith.constant 0 : index
    %605 = vector.load %arg9[%c6_361, %c0_362, %c0_363] : memref<7x32x64xf32, #tpu.memory_space<vmem>>, vector<1x32x64xf32>
    %606 = vector.shape_cast %605 : vector<1x32x64xf32> to vector<32x64xf32>
    %cst_364 = arith.constant dense<0.000000e+00> : vector<2x64xf32>
    %607 = tpu.matmul %604, %606, %cst_364 {dimension_numbers = #tpu.dot_dimension_numbers<[1], [0], [0], [1], [0, 0, 1, 1], [], []>} : vector<2x32xf32>, vector<32x64xf32>, vector<2x64xf32> -> vector<2x64xf32>
    %c6_365 = arith.constant 6 : index
    %c0_366 = arith.constant 0 : index
    %c0_367 = arith.constant 0 : index
    %608 = vector.load %arg10[%c6_365, %c0_366, %c0_367] : memref<7x1x64xf32, #tpu.memory_space<vmem>>, vector<1x1x64xf32>
    %609 = vector.shape_cast %608 : vector<1x1x64xf32> to vector<1x64xf32>
    %610 = vector.broadcast %609 : vector<1x64xf32> to vector<2x64xf32>
    %611 = arith.addf %607, %610 : vector<2x64xf32>
    %cst_368 = arith.constant 0.000000e+00 : f32
    %612 = vector.broadcast %cst_368 : f32 to vector<2x64xf32>
    %613 = arith.maximumf %611, %612 : vector<2x64xf32>
    %c6_369 = arith.constant 6 : index
    %c0_370 = arith.constant 0 : index
    %c0_371 = arith.constant 0 : index
    %614 = vector.load %arg11[%c6_369, %c0_370, %c0_371] : memref<7x64x32xf32, #tpu.memory_space<vmem>>, vector<1x64x32xf32>
    %615 = vector.shape_cast %614 : vector<1x64x32xf32> to vector<64x32xf32>
    %cst_372 = arith.constant dense<0.000000e+00> : vector<2x32xf32>
    %616 = tpu.matmul %613, %615, %cst_372 {dimension_numbers = #tpu.dot_dimension_numbers<[1], [0], [0], [1], [0, 0, 1, 1], [], []>} : vector<2x64xf32>, vector<64x32xf32>, vector<2x32xf32> -> vector<2x32xf32>
    %c6_373 = arith.constant 6 : index
    %c1_374 = arith.constant 1 : index
    %c0_375 = arith.constant 0 : index
    %617 = vector.load %arg12[%c6_373, %c1_374, %c0_375] : memref<7x6x32xf32, #tpu.memory_space<vmem>>, vector<1x1x32xf32>
    %618 = vector.shape_cast %617 : vector<1x1x32xf32> to vector<1x32xf32>
    %619 = vector.broadcast %618 : vector<1x32xf32> to vector<2x32xf32>
    %620 = arith.addf %616, %619 : vector<2x32xf32>
    %621 = arith.addf %604, %620 : vector<2x32xf32>
    %c6_376 = arith.constant 6 : index
    %c4_377 = arith.constant 4 : index
    %c0_378 = arith.constant 0 : index
    %622 = vector.load %arg12[%c6_376, %c4_377, %c0_378] : memref<7x6x32xf32, #tpu.memory_space<vmem>>, vector<1x1x32xf32>
    %623 = vector.shape_cast %622 : vector<1x1x32xf32> to vector<1x32xf32>
    %c6_379 = arith.constant 6 : index
    %c5_380 = arith.constant 5 : index
    %c0_381 = arith.constant 0 : index
    %624 = vector.load %arg12[%c6_379, %c5_380, %c0_381] : memref<7x6x32xf32, #tpu.memory_space<vmem>>, vector<1x1x32xf32>
    %625 = vector.shape_cast %624 : vector<1x1x32xf32> to vector<1x32xf32>
    %cst_382 = arith.constant dense<0.000000e+00> : vector<2xf32>
    %626 = vector.multi_reduction <add>, %621, %cst_382 [1] : vector<2x32xf32> to vector<2xf32>
    %627 = vector.shape_cast %626 : vector<2xf32> to vector<2x1xf32>
    %cst_383 = arith.constant 3.200000e+01 : f32
    %628 = vector.broadcast %cst_383 : f32 to vector<2x1xf32>
    %629 = arith.divf %627, %628 : vector<2x1xf32>
    %630 = vector.broadcast %629 : vector<2x1xf32> to vector<2x32xf32>
    %631 = arith.subf %621, %630 : vector<2x32xf32>
    %632 = arith.mulf %631, %631 : vector<2x32xf32>
    %cst_384 = arith.constant dense<0.000000e+00> : vector<2xf32>
    %633 = vector.multi_reduction <add>, %632, %cst_384 [1] : vector<2x32xf32> to vector<2xf32>
    %634 = vector.shape_cast %633 : vector<2xf32> to vector<2x1xf32>
    %cst_385 = arith.constant 3.200000e+01 : f32
    %635 = vector.broadcast %cst_385 : f32 to vector<2x1xf32>
    %636 = arith.divf %634, %635 : vector<2x1xf32>
    %637 = vector.broadcast %629 : vector<2x1xf32> to vector<2x32xf32>
    %638 = arith.subf %621, %637 : vector<2x32xf32>
    %cst_386 = arith.constant 9.99999974E-6 : f32
    %639 = vector.broadcast %cst_386 : f32 to vector<2x1xf32>
    %640 = arith.addf %636, %639 : vector<2x1xf32>
    %641 = math.rsqrt %640 : vector<2x1xf32>
    %642 = vector.broadcast %641 : vector<2x1xf32> to vector<2x32xf32>
    %643 = arith.mulf %638, %642 : vector<2x32xf32>
    %644 = vector.broadcast %623 : vector<1x32xf32> to vector<2x32xf32>
    %645 = arith.mulf %643, %644 : vector<2x32xf32>
    %646 = vector.broadcast %625 : vector<1x32xf32> to vector<2x32xf32>
    %647 = arith.addf %645, %646 : vector<2x32xf32>
    %c0_387 = arith.constant 0 : index
    %c0_388 = arith.constant 0 : index
    %c0_389 = arith.constant 0 : index
    %648 = vector.load %arg13[%c0_387, %c0_388, %c0_389] : memref<2x32x1xf32, #tpu.memory_space<vmem>>, vector<1x32x1xf32>
    %649 = vector.shape_cast %648 : vector<1x32x1xf32> to vector<32x1xf32>
    %cst_390 = arith.constant dense<0.000000e+00> : vector<2x1xf32>
    %650 = tpu.matmul %647, %649, %cst_390 {dimension_numbers = #tpu.dot_dimension_numbers<[1], [0], [0], [1], [0, 0, 1, 1], [], []>} : vector<2x32xf32>, vector<32x1xf32>, vector<2x1xf32> -> vector<2x1xf32>
    %c1_391 = arith.constant 1 : index
    %c0_392 = arith.constant 0 : index
    %c0_393 = arith.constant 0 : index
    %651 = vector.load %arg13[%c1_391, %c0_392, %c0_393] : memref<2x32x1xf32, #tpu.memory_space<vmem>>, vector<1x32x1xf32>
    %652 = vector.shape_cast %651 : vector<1x32x1xf32> to vector<32x1xf32>
    %cst_394 = arith.constant dense<0.000000e+00> : vector<2x1xf32>
    %653 = tpu.matmul %416, %652, %cst_394 {dimension_numbers = #tpu.dot_dimension_numbers<[1], [0], [0], [1], [0, 0, 1, 1], [], []>} : vector<2x32xf32>, vector<32x1xf32>, vector<2x1xf32> -> vector<2x1xf32>
    %654 = arith.addf %650, %653 : vector<2x1xf32>
    %c0_395 = arith.constant 0 : index
    %c0_396 = arith.constant 0 : index
    %655 = vector.load %arg14[%c0_395, %c0_396] : memref<1x1xf32, #tpu.memory_space<vmem>>, vector<1x1xf32>
    %656 = vector.broadcast %655 : vector<1x1xf32> to vector<2x1xf32>
    %657 = arith.addf %654, %656 : vector<2x1xf32>
    %658 = arith.negf %657 : vector<2x1xf32>
    %659 = math.exp %658 : vector<2x1xf32>
    %cst_397 = arith.constant 1.000000e+00 : f32
    %660 = vector.broadcast %cst_397 : f32 to vector<2x1xf32>
    %661 = arith.addf %660, %659 : vector<2x1xf32>
    %662 = arith.divf %660, %661 : vector<2x1xf32>
    %c0_398 = arith.constant 0 : index
    %c0_399 = arith.constant 0 : index
    %663 = vector.load %arg15[%c0_398, %c0_399] : memref<2x1xf32, #tpu.memory_space<vmem>>, vector<2x1xf32>
    tpu.vector_store %arg15[%c0_398, %c0_399], %662 {strides = array<i32>} : memref<2x1xf32, #tpu.memory_space<vmem>>, vector<2x1xf32>,
    return
  }
}

</mosaic_0001>

<bundles_post_ra>
// kernel: img_text_trans_forward.1
= control target key start
LH: loop header
LB: loop body
LE: loop exit
PB: predicated region body
PF: predicated region fallthrough
CT: control target
= control target key end

     0   :  { %v4446_v0 = vmov 0.0   ;;  %vm4447_vm0 = vmmov 0   ;;  %vm62_vm1 = vcmask 130048   ;;  %vm168_vm2 = vcmask 261120   ;;  %s5479_s2 = inlined_call_operand.vmem [shape: f32[16,32], index: 2, kind: input, shape index: {}]   ;;  %s5480_s0 = inlined_call_operand.vmem [shape: f32[2,16], index: 0, kind: input, shape index: {}]   ;;  %s5481_s4 = inlined_call_operand.vmem [shape: f32[3,2,32,16], index: 4, kind: input, shape index: {}]   ;;  %s5482_s1 = inlined_call_operand.vmem [shape: f32[16,32], index: 1, kind: input, shape index: {}]   ;;  %s5483_s3 = inlined_call_operand.vmem [shape: f32[1,32], index: 3, kind: input, shape index: {}]   ;;  %s5484_s5 = inlined_call_operand.vmem [shape: f32[3,2,1,16], index: 5, kind: input, shape index: {}]   ;;  %s5485_s6 = inlined_call_operand.vmem [shape: f32[2,16,32], index: 6, kind: input, shape index: {}]   ;;  %s5486_s8 = inlined_call_operand.vmem [shape: f32[7,32,32], index: 8, kind: input, shape index: {}]   ;;  %s5487_s7 = inlined_call_operand.vmem [shape: f32[1,32], index: 7, kind: input, shape index: {}]   ;;  %s5488_s12 = inlined_call_operand.vmem [shape: f32[7,6,32], index: 12, kind: input, shape index: {}]   ;;  %s5489_s9 = inlined_call_operand.vmem [shape: f32[7,32,64], index: 9, kind: input, shape index: {}]   ;;  %s5490_s11 = inlined_call_operand.vmem [shape: f32[7,64,32], index: 11, kind: input, shape index: {}]   ;;  %s5491_s10 = inlined_call_operand.vmem [shape: f32[7,1,64], index: 10, kind: input, shape index: {}]   ;;  %s5492_s13 = inlined_call_operand.vmem [shape: f32[2,32,1], index: 13, kind: input, shape index: {}]   ;;  %s5493_s14 = inlined_call_operand.<no memory space> [shape: f32[1,1], index: 14, kind: input, shape index: {}]   ;;  %s5494_s15 = inlined_call_operand.vmem [shape: f32[2,1], index: 15, kind: output, shape index: {}]  }
   0x1   :  { %3979 = vmatprep.subr.mxu0 %v4446_v0  ;;  %v54_v1 = vld [vmem:[%s5479_s2 + $0x8] sm:$0xff]  ;;  %v53_v2 = vld [vmem:[%s5479_s2] sm:$0xff]  ;;  %3983 = vmatprep.mubr.msk.f32.mxu0 %vm4447_vm0, %v4446_v0  ;;  %v3516_v4 = vld [vmem:[%s5481_s4 + $0x58] sm:$0xff]  ;;  %v139_v36 = vlaneseq  ;;  %v4448_v40 = vmov -1e+30   ;;  %vm503_vm4 = vcmask 123904  }
   0x2   :  { %3980 = vmatpush3.msra.mxu0 %v54_v1  ;;  %v52_v3 = vld [vmem:[%s5480_s0] sm:$0x3]  ;;  %3986 = vmatprep.subr.mxu1 %v4446_v0  ;;  %v3515_v6 = vld [vmem:[%s5481_s4 + $0x50] sm:$0xff]  ;;  %v160_v7 = vld [vmem:[%s5481_s4 + $0x18] sm:$0xff]  ;;  %vm1254_vm5 = vcmask 254976   ;;  %vm1377_vm6 = vcmask 523264  }
   0x3   :  { %3981 = vmatprep.subr.mxu0 %v4446_v0  ;;  %v4549_v5 = vld [vmem:[%s5482_s1] sm:$0xff]  ;;  %3994 = vmatprep.mubr.msk.f32.mxu1 %vm4447_vm0, %v4446_v0  ;;  %v3514_v8 = vld [vmem:[%s5481_s4 + $0x48] sm:$0xff]  ;;  %v159_v11 = vld [vmem:[%s5481_s4 + $0x10] sm:$0xff]  ;;  %v140_v37 = vand.u32 127, %v139_v36  ;;  %v154_v39 = vshrl.u32 %v139_v36, 7  ;;  %vm3503_vm7 = vcmask 1024  }
   0x4   :  { %3982 = vmatpush3.msra.mxu0 %v53_v2  ;;  %3987 = vmatpush3.msra.mxu1 %v160_v7  ;;  %v3513_v9 = vld [vmem:[%s5481_s4 + $0x40] sm:$0xff]  ;;  %v4572_v10 = vld [vmem:[%s5482_s1 + $0x8] sm:$0xff]  ;;  %v3536_v27 = vld [vmem:[%s5481_s4 + $0x38] sm:$0xff] }
   0x5   :  { %3984 = vmatmul.mubr.msk.f32.vlgmr.msra.gmra.mxu0 %vm62_vm1, %v52_v3  ;;  %3997 = vmatprep.subr.mxu0 %v3516_v4  ;;  %v158_v12 = vld [vmem:[%s5481_s4 + $0x8] sm:$0xff]  ;;  %v157_v13 = vld [vmem:[%s5481_s4] sm:$0xff]  ;;  %v3535_v29 = vld [vmem:[%s5481_s4 + $0x30] sm:$0xff]  ;;  %v145_v38 = vand.u32 1, %v140_v37 }
   0x6   :  { %3998 = vmatpush3.msra.mxu0 %v3516_v4  ;;  %4005 = vmatprep.mubr.msk.f32.mxu0 %vm168_vm2, %v4549_v5  ;;  %v3509_v14 = vld [vmem:[%s5483_s3] ss:$0 sm:$0xff]  ;;  %v3518_v19 = vld [vmem:[%s5484_s5 + $0x2] ss:$0 sm:$0xff]  ;;  %v3534_v30 = vld [vmem:[%s5481_s4 + $0x28] sm:$0xff] }
   0x7   :  { %3999 = vmatprep.subr.mxu0 %v3515_v6  ;;  %3988 = vmatprep.subr.mxu1 %v4446_v0  ;;  %v3511_v24 = vld [vmem:[%s5484_s5] ss:$0 sm:$0xff]  ;;  %v3524_v32 = vld [vmem:[%s5481_s4 + $0x98] sm:$0xff]  ;;  %v3523_v33 = vld [vmem:[%s5481_s4 + $0x90] sm:$0xff]  ;;  %vm155_vm3 = vcmp.eq.s32.totalorder %v145_v38, %v154_v39 }
   0x8   :  { %4000 = vmatpush3.msra.mxu0 %v3515_v6  ;;  %3989 = vmatpush3.msra.mxu1 %v159_v11  ;;  %v3533_v31 = vld [vmem:[%s5481_s4 + $0x20] sm:$0xff]  ;;  %v3522_v34 = vld [vmem:[%s5481_s4 + $0x88] sm:$0xff]  ;;  %v4648_v41 = vsel %vm155_vm3, 0.0, %v4448_v40  ;;  %v3543_v58 = vld [vmem:[%s5481_s4 + $0x78] sm:$0xff] }
   0x9   :  { %4001 = vmatprep.subr.mxu0 %v3514_v8  ;;  %3990 = vmatprep.subr.mxu1 %v4446_v0  ;;  %v3521_v35 = vld [vmem:[%s5481_s4 + $0x80] sm:$0xff]  ;;  %v3542_v62 = vld [vmem:[%s5481_s4 + $0x70] sm:$0xff]  ;;  %v3541_v63 = vld [vmem:[%s5481_s4 + $0x68] sm:$0xff] }
   0xa   :  { %4002 = vmatpush3.msra.mxu0 %v3514_v8  ;;  %3991 = vmatpush3.msra.mxu1 %v158_v12  ;;  %v3526_v54 = vld [vmem:[%s5484_s5 + $0x4] ss:$0 sm:$0xff]  ;;  %v3545_v4 = vld [vmem:[%s5484_s5 + $0x3] ss:$0 sm:$0xff]  ;;  %v3538_v8 = vld [vmem:[%s5484_s5 + $0x1] ss:$0 sm:$0xff] }
   0xb   :  { %4003 = vmatprep.subr.mxu0 %v3513_v9  ;;  %3992 = vmatprep.subr.mxu1 %v4446_v0  ;;  %v3540_v1 = vld [vmem:[%s5481_s4 + $0x60] sm:$0xff]  ;;  %v3551_v12 = vld [vmem:[%s5481_s4 + $0xb8] sm:$0xff] }
   0xc   :  { %4004 = vmatpush3.msra.mxu0 %v3513_v9  ;;  %3993 = vmatpush3.msra.mxu1 %v157_v13  ;;  %v3550_v13 = vld [vmem:[%s5481_s4 + $0xb0] sm:$0xff]  ;;  %v588_v36 = vld [vmem:[%s5485_s6] sm:$0xff]  ;;  %v1172_v37 = vld [vmem:[%s5486_s8 + $0x18] sm:$0xff] }
   0xd   :  { %4006 = vmatmul.mubr.msk.f32.vlgmr.msra.gmra.mxu0 %vm168_vm2, %v4572_v10  ;;  %4019 = vmatprep.subr.mxu0 %v4446_v0 }
   0xe   :  { %4023 = vmatprep.mubr.msk.f32.mxu0 %vm4447_vm0, %v4446_v0  ;;  %4008 = vmatprep.subr.mxu1 %v3524_v32 }
  0xc5   :  { %v132_v15 = vpop.f32.mrf.mxu0 }
  0xc6   :  { %v133_v16 = vadd.f32 %v3509_v14, %v132_v15  ;;  %v3549_v14 = vld [vmem:[%s5481_s4 + $0xa8] sm:$0xff]  ;;  %v3548_v15 = vld [vmem:[%s5481_s4 + $0xa0] sm:$0xff] }
  0xc7   :  { %v3985_v17 = vpop.f32.mrf.mxu0 }
  0xc8   :  { %v4593_v18 = vmax.f32 %v133_v16, 0.0 }
  0xca   :  { %3995 = vmatmul.mubr.msk.f32.vlgmr.msra.gmra.mxu1 %vm168_vm2, %v4593_v18 }
  0xcb   :  { %4016 = vmatprep.mubr.msk.f32.mxu1 %vm168_vm2, %v4549_v5  ;;  %4009 = vmatpush3.msra.mxu1 %v3524_v32 }
  0xcc   :  { %4010 = vmatprep.subr.mxu1 %v3523_v33 }
  0xcd   :  { %v4007_v20 = vpop.f32.mrf.mxu0  ;;  %4011 = vmatpush3.msra.mxu1 %v3523_v33 }
  0xce   :  { %v333_v21 = vadd.f32 %v4007_v20, %v3518_v19  ;;  %4012 = vmatprep.subr.mxu1 %v3522_v34 }
  0xcf   :  { %v327_v22 = vpop.f32.mrf.mxu0  ;;  %4013 = vmatpush3.msra.mxu1 %v3522_v34 }
  0xd0   :  { %4020 = vmatpush3.xpose.msk.msra.mxu0 %vm62_vm1, %v333_v21  ;;  %v328_v23 = vadd.f32 %v3518_v19, %v327_v22  ;;  %4014 = vmatprep.subr.mxu1 %v3521_v35 }
  0xd1   :  { %4021 = vmatprep.subr.mxu0 %v4446_v0  ;;  %4015 = vmatpush3.msra.mxu1 %v3521_v35  ;;  %v589_v35 = vld [vmem:[%s5485_s6 + $0x8] sm:$0xff] }
  0xd2   :  { %4017 = vmatmul.mubr.msk.f32.vlgmr.msra.gmra.mxu1 %vm168_vm2, %v4572_v10  ;;  %4026 = vmatprep.subr.mxu1 %v4446_v0 }
  0xd3   :  { %4030 = vmatprep.mubr.msk.f32.mxu1 %vm4447_vm0, %v4446_v0 }
  0xd4   :  { %4022 = vmatpush3.xpose.msk.msra.mxu0 %vm62_vm1, %v328_v23 }
  0xd5   :  { %4033 = vmatprep.subr.mxu0 %v4446_v0 }
 0x18a   :  { %v238_v25 = vpop.f32.mrf.mxu1 }
 0x18b   :  { %v239_v26 = vadd.f32 %v3511_v24, %v238_v25 }
 0x18c   :  { %v3996_v28 = vpop.f32.mrf.mxu1 }
 0x18d   :  { %4024 = vmatmul.mubr.msk.f32.vlgmr.msra.gmra.mxu0 %vm62_vm1, %v239_v26  ;;  %v3553_v26 = vld [vmem:[%s5484_s5 + $0x5] ss:$0 sm:$0xff] }
 0x18e   :  { %4034 = vmatpush3.msra.mxu0 %v3536_v27  ;;  %4041 = vmatprep.mubr.msk.f32.mxu0 %vm4447_vm0, %v4446_v0 }
 0x18f   :  { %4035 = vmatprep.subr.mxu0 %v4446_v0 }
 0x190   :  { %4036 = vmatpush3.msra.mxu0 %v3535_v29 }
 0x191   :  { %4037 = vmatprep.subr.mxu0 %v4446_v0 }
 0x192   :  { %4038 = vmatpush3.msra.mxu0 %v3534_v30  ;;  %v4018_v53 = vpop.f32.mrf.mxu1  ;;  %v3561_v30 = vld [vmem:[%s5485_s6 + $0x18] sm:$0xff] }
 0x193   :  { %4039 = vmatprep.subr.mxu0 %v4446_v0  ;;  %v421_v55 = vadd.f32 %v4018_v53, %v3526_v54 }
 0x194   :  { %4040 = vmatpush3.msra.mxu0 %v3533_v31  ;;  %v415_v56 = vpop.f32.mrf.mxu1  ;;  %v3560_v31 = vld [vmem:[%s5485_s6 + $0x10] sm:$0xff] }
 0x195   :  { %4042 = vmatmul.mubr.msk.f32.vlgmr.msra.gmra.mxu0 %vm168_vm2, %v4593_v18  ;;  %v416_v57 = vadd.f32 %v3526_v54, %v415_v56  ;;  %4027 = vmatpush3.msra.mxu1 %v421_v55 }
 0x196   :  { %4063 = vmatprep.mubr.msk.f32.mxu0 %vm168_vm2, %v4549_v5  ;;  %4028 = vmatprep.subr.mxu1 %v4446_v0 }
 0x197   :  { %4029 = vmatpush3.msra.mxu1 %v416_v57  ;;  %4055 = vmatprep.subr.mxu0 %v3551_v12 }
 0x198   :  { %4044 = vmatprep.subr.mxu1 %v3543_v58  ;;  %4056 = vmatpush3.msra.mxu0 %v3551_v12  ;;  %v3567_v12 = vld [vmem:[%s5488_s12 + $0x2] ss:$0 sm:$0xff] }
 0x199   :  { %4057 = vmatprep.subr.mxu0 %v3550_v13 }
 0x19a   :  { %4058 = vmatpush3.msra.mxu0 %v3550_v13 }
 0x19b   :  { %4059 = vmatprep.subr.mxu0 %v3549_v14 }
 0x19c   :  { %4060 = vmatpush3.msra.mxu0 %v3549_v14  ;;  %v3568_v14 = vld [vmem:[%s5488_s12 + $0x3] ss:$0 sm:$0xff] }
 0x19d   :  { %4061 = vmatprep.subr.mxu0 %v3548_v15 }
 0x19e   :  { %4062 = vmatpush3.msra.mxu0 %v3548_v15 }
 0x19f   :  { %4064 = vmatmul.mubr.msk.f32.vlgmr.msra.gmra.mxu0 %vm168_vm2, %v4572_v10  ;;  %4073 = vmatprep.subr.mxu0 %v4446_v0 }
 0x1a0   :  { %4077 = vmatprep.mubr.msk.f32.mxu0 %vm4447_vm0, %v4446_v0 }
 0x24d   :  { %v499_v42 = vpop.f32.mrf.mxu0 }
 0x24e   :  { %v500_v43 = vadd.f32 %v499_v42, %v4648_v41  ;;  %v1171_v42 = vld [vmem:[%s5486_s8 + $0x10] sm:$0xff] }
 0x24f   :  { %v4025_v44 = vpop.f32.mrf.mxu0 }
 0x250   :  { %v504_v45 = vsel %vm503_vm4, %v500_v43, -inf  ;;  %v1169_v44 = vld [vmem:[%s5486_s8] sm:$0xff] }
 0x251   :  { %505 = vmax.xlane.f32.xlu0 %v504_v45 }
 0x255   :  { %v669_v46 = vpop.f32.mrf.mxu0 }
 0x256   :  { %v670_v11 = vadd.f32 %v3538_v8, %v669_v46  ;;  %v3564_v46 = vld [vmem:[%s5487_s7] ss:$0 sm:$0xff] }
 0x257   :  { %v4043_v47 = vpop.f32.mrf.mxu0 }
 0x2da   :  { %v506_v48 = vpop.xlane.xlu0 %505 }
 0x2db   :  { %v507_v49 = vsub.f32 %v500_v43, %v506_v48  ;;  %v1170_v43 = vld [vmem:[%s5486_s8 + $0x8] sm:$0xff] }
 0x2dd   :  { %v508_v50 = vmul.f32 1.442695, %v507_v49 }
 0x2df   :  { %4406 = vpow2.f32 %v508_v50  ;;  %v3565_v50 = vld [vmem:[%s5488_s12] ss:$0 sm:$0xff] }
 0x2ec   :  { %v4407_v51 = vpop.eup %4406 }
 0x2ed   :  { %v510_v52 = vsel %vm503_vm4, %v4407_v51, 0.0 }
 0x2ee   :  { %511 = vadd.xlane.f32.xlu0 %v510_v52 }
 0x377   :  { %v512_v59 = vpop.xlane.xlu0 %511 }
 0x378   :  { %4408 = vrcp.f32 %v512_v59 }
 0x385   :  { %v4409_v60 = vpop.eup %4408 }
 0x386   :  { %v514_v61 = vmul.f32 %v4409_v60, %v4407_v51 }
 0x388   :  { %4031 = vmatmul.mubr.msk.f32.vlgmr.msra.gmra.mxu1 %vm62_vm1, %v514_v61  ;;  %v1282_v61 = vld [vmem:[%s5489_s9 + $0x18] sm:$0xff] }
 0x389   :  { %4045 = vmatpush3.msra.mxu1 %v3543_v58  ;;  %4052 = vmatprep.mubr.msk.f32.mxu1 %vm168_vm2, %v4549_v5 }
 0x38a   :  { %4046 = vmatprep.subr.mxu1 %v3542_v62 }
 0x38b   :  { %4047 = vmatpush3.msra.mxu1 %v3542_v62  ;;  %v1281_v62 = vld [vmem:[%s5489_s9 + $0x10] sm:$0xff] }
 0x38c   :  { %4048 = vmatprep.subr.mxu1 %v3541_v63 }
 0x38d   :  { %4049 = vmatpush3.msra.mxu1 %v3541_v63  ;;  %v1280_v63 = vld [vmem:[%s5489_s9 + $0x8] sm:$0xff] }
 0x38e   :  { %4050 = vmatprep.subr.mxu1 %v3540_v1 }
 0x38f   :  { %4051 = vmatpush3.msra.mxu1 %v3540_v1  ;;  %v1279_v1 = vld [vmem:[%s5489_s9] sm:$0xff] }
 0x390   :  { %4053 = vmatmul.mubr.msk.f32.vlgmr.msra.gmra.mxu1 %vm168_vm2, %v4572_v10  ;;  %4066 = vmatprep.subr.mxu1 %v4446_v0  ;;  %v4065_v10 = vpop.f32.mrf.mxu0 }
 0x391   :  { %4070 = vmatprep.mubr.msk.f32.mxu1 %vm4447_vm0, %v4446_v0  ;;  %v846_v27 = vadd.f32 %v4065_v10, %v3553_v26  ;;  %v3571_v10 = vld [vmem:[%s5488_s12 + $0x1] ss:$0 sm:$0xff] }
 0x392   :  { %v840_v28 = vpop.f32.mrf.mxu0 }
 0x393   :  { %v841_v29 = vadd.f32 %v3553_v26, %v840_v28  ;;  %4074 = vmatpush3.msra.mxu0 %v846_v27 }
 0x394   :  { %4075 = vmatprep.subr.mxu0 %v4446_v0 }
 0x395   :  { %4076 = vmatpush3.msra.mxu0 %v841_v29 }
 0x396   :  { %4087 = vmatprep.subr.mxu0 %v4446_v0 }
 0x448   :  { %v4677_v2 = vpop.f32.mrf.mxu1 }
 0x44a   :  { %v4032_v3 = vpop.f32.mrf.mxu1 }
 0x44b   :  { %v1370_v3 = vld [vmem:[%s5490_s11 + $0x30] sm:$0xff] }
 0x450   :  { %v4054_v5 = vpop.f32.mrf.mxu1 }
 0x451   :  { %v758_v6 = vadd.f32 %v4054_v5, %v3545_v4  ;;  %v1368_v5 = vld [vmem:[%s5490_s11 + $0x20] sm:$0xff] }
 0x452   :  { %v752_v7 = vpop.f32.mrf.mxu1 }
 0x453   :  { %4067 = vmatpush3.xpose.msk.msra.mxu1 %vm62_vm1, %v758_v6  ;;  %v753_v9 = vadd.f32 %v3545_v4, %v752_v7  ;;  %v1369_v4 = vld [vmem:[%s5490_s11 + $0x28] sm:$0xff]  ;;  %v1367_v6 = vld [vmem:[%s5490_s11 + $0x18] sm:$0xff] }
 0x454   :  { %4068 = vmatprep.subr.mxu1 %v4446_v0 }
 0x457   :  { %4069 = vmatpush3.xpose.msk.msra.mxu1 %vm62_vm1, %v753_v9 }
 0x458   :  { %4080 = vmatprep.subr.mxu1 %v4446_v0 }
 0x45a   :  { %4071 = vmatmul.mubr.msk.f32.vlgmr.msra.gmra.mxu1 %vm62_vm1, %v670_v11 }
 0x45b   :  { %4084 = vmatprep.mubr.msk.f32.mxu1 %vm4447_vm0, %v4446_v0  ;;  %4081 = vmatpush3.msra.mxu1 %v3561_v30 }
 0x45c   :  { %4082 = vmatprep.subr.mxu1 %v4446_v0 }
 0x45d   :  { %4083 = vmatpush3.msra.mxu1 %v3560_v31 }
 0x45e   :  { %4094 = vmatprep.subr.mxu1 %v4446_v0 }
 0x51a   :  { %v924_v16 = vpop.f32.mrf.mxu1 }
 0x51b   :  { %v925_v17 = vadd.f32 %v924_v16, %v4648_v41 }
 0x51c   :  { %v4072_v19 = vpop.f32.mrf.mxu1 }
 0x51d   :  { %v928_v20 = vsel %vm503_vm4, %v925_v17, -inf  ;;  %v1365_v19 = vld [vmem:[%s5490_s11 + $0x8] sm:$0xff] }
 0x51e   :  { %929 = vmax.xlane.f32.xlu1 %v928_v20  ;;  %v1364_v20 = vld [vmem:[%s5490_s11] sm:$0xff] }
 0x5a7   :  { %v930_v21 = vpop.xlane.xlu1 %929 }
 0x5a8   :  { %v931_v22 = vsub.f32 %v925_v17, %v930_v21  ;;  %v1366_v17 = vld [vmem:[%s5490_s11 + $0x10] sm:$0xff]  ;;  %v3569_v21 = vld [vmem:[%s5491_s10] ss:$0 sm:$0xff] }
 0x5aa   :  { %v932_v23 = vmul.f32 1.442695, %v931_v22 }
 0x5ac   :  { %4410 = vpow2.f32 %v932_v23 }
 0x5b9   :  { %v4411_v24 = vpop.eup %4410 }
 0x5ba   :  { %v934_v25 = vsel %vm503_vm4, %v4411_v24, 0.0 }
 0x5bb   :  { %935 = vadd.xlane.f32.xlu1 %v934_v25 }
 0x644   :  { %v936_v32 = vpop.xlane.xlu1 %935 }
 0x645   :  { %4412 = vrcp.f32 %v936_v32 }
 0x652   :  { %v4413_v33 = vpop.eup %4412 }
 0x653   :  { %v938_v34 = vmul.f32 %v4413_v33, %v4411_v24 }
 0x655   :  { %4078 = vmatmul.mubr.msk.f32.vlgmr.msra.gmra.mxu0 %vm62_vm1, %v938_v34 }
 0x656   :  { %4088 = vmatpush3.msra.mxu0 %v589_v35  ;;  %4091 = vmatprep.mubr.msk.f32.mxu0 %vm4447_vm0, %v4446_v0 }
 0x657   :  { %4089 = vmatprep.subr.mxu0 %v4446_v0 }
 0x658   :  { %4090 = vmatpush3.msra.mxu0 %v588_v36  ;;  %v3578_v36 = vld [vmem:[%s5486_s8 + $0x38] sm:$0xff] }
 0x659   :  { %4092 = vmatmul.mubr.msk.f32.vlgmr.msra.gmra.mxu0 %vm62_vm1, %v4677_v2  ;;  %4105 = vmatprep.subr.mxu0 %v4446_v0  ;;  %v1371_v2 = vld [vmem:[%s5490_s11 + $0x38] sm:$0xff] }
 0x65a   :  { %4113 = vmatprep.mubr.msk.f32.mxu0 %vm4447_vm0, %v4446_v0  ;;  %4106 = vmatpush3.msra.mxu0 %v1282_v61  ;;  %v3588_v61 = vld [vmem:[%s5489_s9 + $0x30] sm:$0xff] }
 0x65b   :  { %4107 = vmatprep.subr.mxu0 %v4446_v0 }
 0x65c   :  { %4108 = vmatpush3.msra.mxu0 %v1281_v62  ;;  %v3587_v62 = vld [vmem:[%s5489_s9 + $0x28] sm:$0xff] }
 0x65d   :  { %4109 = vmatprep.subr.mxu0 %v4446_v0 }
 0x65e   :  { %4110 = vmatpush3.msra.mxu0 %v1280_v63  ;;  %v3586_v63 = vld [vmem:[%s5489_s9 + $0x20] sm:$0xff] }
 0x65f   :  { %4111 = vmatprep.subr.mxu0 %v4446_v0 }
 0x660   :  { %4112 = vmatpush3.msra.mxu0 %v1279_v1  ;;  %v3600_v1 = vld [vmem:[%s5490_s11 + $0x78] sm:$0xff] }
 0x661   :  { %4135 = vmatprep.subr.mxu0 %v4446_v0 }
 0x715   :  { %v1008_v38 = vpop.f32.mrf.mxu0 }
 0x716   :  { %4085 = vmatmul.mubr.msk.f32.vlgmr.msra.gmra.mxu1 %vm62_vm1, %v1008_v38  ;;  %v3576_v38 = vld [vmem:[%s5486_s8 + $0x28] sm:$0xff] }
 0x717   :  { %v4079_v39 = vpop.f32.mrf.mxu0  ;;  %4095 = vmatpush3.msra.mxu1 %v1172_v37  ;;  %4102 = vmatprep.mubr.msk.f32.mxu1 %vm4447_vm0, %v4446_v0  ;;  %v3577_v37 = vld [vmem:[%s5486_s8 + $0x30] sm:$0xff] }
 0x718   :  { %4096 = vmatprep.subr.mxu1 %v4446_v0  ;;  %v3575_v39 = vld [vmem:[%s5486_s8 + $0x20] sm:$0xff] }
 0x719   :  { %v1157_v40 = vpop.f32.mrf.mxu0  ;;  %4097 = vmatpush3.msra.mxu1 %v1171_v42 }
 0x71a   :  { %4098 = vmatprep.subr.mxu1 %v4446_v0 }
 0x71b   :  { %v4093_v41 = vpop.f32.mrf.mxu0  ;;  %4099 = vmatpush3.msra.mxu1 %v1170_v43 }
 0x71c   :  { %4100 = vmatprep.subr.mxu1 %v4446_v0 }
 0x71d   :  { %4101 = vmatpush3.msra.mxu1 %v1169_v44  ;;  %v3573_v44 = vld [vmem:[%s5488_s12 + $0x4] ss:$0 sm:$0xff] }
 0x71e   :  { %4116 = vmatprep.subr.mxu1 %v4446_v0 }
 0x7d6   :  { %v1084_v45 = vpop.f32.mrf.mxu1 }
 0x7d7   :  { %v1158_v47 = vadd.f32 %v1157_v40, %v1084_v45 }
 0x7d8   :  { %v4086_v48 = vpop.f32.mrf.mxu1 }
 0x7d9   :  { %v1168_v49 = vadd.f32 %v3564_v46, %v1158_v47  ;;  %v3574_v46 = vld [vmem:[%s5488_s12 + $0x5] ss:$0 sm:$0xff] }
 0x7db   :  { %4103 = vmatmul.mubr.msk.f32.vlgmr.msra.gmra.mxu1 %vm168_vm2, %v1168_v49 }
 0x7dc   :  { %4132 = vmatprep.mubr.msk.f32.mxu1 %vm4447_vm0, %v4446_v0  ;;  %4117 = vmatpush3.msra.mxu1 %v1371_v2  ;;  %v3599_v2 = vld [vmem:[%s5490_s11 + $0x70] sm:$0xff] }
 0x7dd   :  { %4118 = vmatprep.subr.mxu1 %v4446_v0 }
 0x7de   :  { %4119 = vmatpush3.msra.mxu1 %v1370_v3  ;;  %v3598_v3 = vld [vmem:[%s5490_s11 + $0x68] sm:$0xff] }
 0x7df   :  { %4120 = vmatprep.subr.mxu1 %v4446_v0 }
 0x7e0   :  { %4121 = vmatpush3.msra.mxu1 %v1369_v4  ;;  %v3597_v4 = vld [vmem:[%s5490_s11 + $0x60] sm:$0xff] }
 0x7e1   :  { %4122 = vmatprep.subr.mxu1 %v4446_v0 }
 0x7e2   :  { %4123 = vmatpush3.msra.mxu1 %v1368_v5  ;;  %v3596_v5 = vld [vmem:[%s5490_s11 + $0x58] sm:$0xff] }
 0x7e3   :  { %4124 = vmatprep.subr.mxu1 %v4446_v0 }
 0x7e4   :  { %4125 = vmatpush3.msra.mxu1 %v1367_v6 }
 0x7e5   :  { %4126 = vmatprep.subr.mxu1 %v4446_v0 }
 0x7e6   :  { %4127 = vmatpush3.msra.mxu1 %v1366_v17  ;;  %v3594_v17 = vld [vmem:[%s5490_s11 + $0x48] sm:$0xff] }
 0x7e7   :  { %4128 = vmatprep.subr.mxu1 %v4446_v0 }
 0x7e8   :  { %4129 = vmatpush3.msra.mxu1 %v1365_v19  ;;  %v3593_v19 = vld [vmem:[%s5490_s11 + $0x40] sm:$0xff] }
 0x7e9   :  { %4130 = vmatprep.subr.mxu1 %v4446_v0 }
 0x7ea   :  { %4131 = vmatpush3.msra.mxu1 %v1364_v20  ;;  %v3591_v20 = vld [vmem:[%s5491_s10 + $0x1] ss:$0 sm:$0xff] }
 0x7eb   :  { %4157 = vmatprep.subr.mxu1 %v4446_v0 }
 0x89b   :  { %v1247_v51 = vpop.f32.mrf.mxu1 }
 0x89c   :  { %v1248_v52 = vadd.f32 %v3565_v50, %v1247_v51 }
 0x89d   :  { %v4104_v53 = vpop.f32.mrf.mxu1 }
 0x89e   :  { %v1251_v54 = vadd.f32 %v1248_v52, %v1168_v49  ;;  %v3580_v49 = vld [vmem:[%s5488_s12 + $0x8] ss:$0 sm:$0xff] }
 0x8a0   :  { %v1255_v55 = vsel %vm1254_vm5, %v1251_v54, 0.0 }
 0x8a1   :  { %1256 = vadd.xlane.f32.xlu0 %v1255_v55 }
 0x92a   :  { %v1257_v56 = vpop.xlane.xlu0 %1256 }
 0x92b   :  { %v1259_v57 = vmul.f32 0.03125, %v1257_v56 }
 0x92d   :  { %v1260_v58 = vsub.f32 %v1251_v54, %v1259_v57 }
 0x92f   :  { %v1261_v59 = vmul.f32 %v1260_v58, %v1260_v58 }
 0x931   :  { %v1262_v60 = vsel %vm1254_vm5, %v1261_v59, 0.0 }
 0x932   :  { %1263 = vadd.xlane.f32.xlu1 %v1262_v60  ;;  %v3589_v60 = vld [vmem:[%s5489_s9 + $0x38] sm:$0xff] }
 0x9bb   :  { %v1264_v7 = vpop.xlane.xlu1 %1263 }
 0x9bc   :  { %v1265_v8 = vmul.f32 0.03125, %v1264_v7 }
 0x9be   :  { %v1266_v9 = vadd.f32 1e-05, %v1265_v8 }
 0x9c0   :  { %4414 = vrsqrt.f32 %v1266_v9 }
 0x9cd   :  { %v4415_v11 = vpop.eup %4414 }
 0x9ce   :  { %v1268_v13 = vmul.f32 %v4415_v11, %v1260_v58  ;;  %v3584_v11 = vld [vmem:[%s5488_s12 + $0xa] ss:$0 sm:$0xff] }
 0x9d0   :  { %v1273_v15 = vmul.f32 %v3567_v12, %v1268_v13  ;;  %v3585_v13 = vld [vmem:[%s5488_s12 + $0xb] ss:$0 sm:$0xff] }
 0x9d2   :  { %v1278_v16 = vadd.f32 %v3568_v14, %v1273_v15 }
 0x9d4   :  { %4114 = vmatmul.mubr.msk.f32.vlgmr.msra.gmra.mxu0 %vm168_vm2, %v1278_v16 }
 0x9d5   :  { %4143 = vmatprep.mubr.msk.f32.mxu0 %vm4447_vm0, %v4446_v0  ;;  %4136 = vmatpush3.msra.mxu0 %v3578_v36  ;;  %v3610_v36 = vld [vmem:[%s5486_s8 + $0x50] sm:$0xff] }
 0x9d6   :  { %4137 = vmatprep.subr.mxu0 %v4446_v0 }
 0x9d7   :  { %4138 = vmatpush3.msra.mxu0 %v3577_v37  ;;  %v3609_v37 = vld [vmem:[%s5486_s8 + $0x48] sm:$0xff] }
 0x9d8   :  { %4139 = vmatprep.subr.mxu0 %v4446_v0 }
 0x9d9   :  { %4140 = vmatpush3.msra.mxu0 %v3576_v38  ;;  %v3608_v38 = vld [vmem:[%s5486_s8 + $0x40] sm:$0xff] }
 0x9da   :  { %4141 = vmatprep.subr.mxu0 %v4446_v0 }
 0x9db   :  { %4142 = vmatpush3.msra.mxu0 %v3575_v39 }
 0x9dc   :  { %4146 = vmatprep.subr.mxu0 %v4446_v0 }
 0xa94   :  { %v1359_v22 = vpop.f32.mrf.mxu0 }
 0xa95   :  { %v1360_v23 = vadd.f32 %v3569_v21, %v1359_v22 }
 0xa96   :  { %v4115_v24 = vpop.f32.mrf.mxu0 }
 0xa97   :  { %v1363_v25 = vmax.f32 %v1360_v23, 0.0 }
 0xa99   :  { %4133 = vmatmul.mubr.msk.f32.vlgmr.msra.gmra.mxu1 %vm1377_vm6, %v1363_v25  ;;  %v3602_v25 = vld [vmem:[%s5488_s12 + $0x9] ss:$0 sm:$0xff] }
 0xa9a   :  { %4173 = vmatprep.mubr.msk.f32.mxu1 %vm4447_vm0, %v4446_v0  ;;  %4158 = vmatpush3.msra.mxu1 %v3600_v1  ;;  %v3632_v1 = vld [vmem:[%s5490_s11 + $0xb0] sm:$0xff] }
 0xa9b   :  { %4159 = vmatprep.subr.mxu1 %v4446_v0 }
 0xa9c   :  { %4160 = vmatpush3.msra.mxu1 %v3599_v2  ;;  %v3631_v2 = vld [vmem:[%s5490_s11 + $0xa8] sm:$0xff] }
 0xa9d   :  { %4161 = vmatprep.subr.mxu1 %v4446_v0 }
 0xa9e   :  { %4162 = vmatpush3.msra.mxu1 %v3598_v3  ;;  %v3630_v3 = vld [vmem:[%s5490_s11 + $0xa0] sm:$0xff] }
 0xa9f   :  { %4163 = vmatprep.subr.mxu1 %v4446_v0 }
 0xaa0   :  { %4164 = vmatpush3.msra.mxu1 %v3597_v4  ;;  %v3629_v4 = vld [vmem:[%s5490_s11 + $0x98] sm:$0xff] }
 0xaa1   :  { %4165 = vmatprep.subr.mxu1 %v4446_v0 }
 0xaa2   :  { %4166 = vmatpush3.msra.mxu1 %v3596_v5 }
 0xaa3   :  { %4167 = vmatprep.subr.mxu1 %v4446_v0 }
 0xb59   :  { %v1447_v26 = vpop.f32.mrf.mxu1 }
 0xb5a   :  { %v1448_v27 = vadd.f32 %v3571_v10, %v1447_v26 }
 0xb5b   :  { %v4134_v28 = vpop.f32.mrf.mxu1 }
 0xb5c   :  { %v1451_v29 = vadd.f32 %v1448_v27, %v1278_v16  ;;  %v3595_v16 = vld [vmem:[%s5490_s11 + $0x50] sm:$0xff] }
 0xb5d   :  { %4168 = vmatpush3.msra.mxu1 %v3595_v16  ;;  %v3627_v16 = vld [vmem:[%s5490_s11 + $0x88] sm:$0xff] }
 0xb5e   :  { %v1454_v30 = vsel %vm1254_vm5, %v1451_v29, 0.0  ;;  %4169 = vmatprep.subr.mxu1 %v4446_v0 }
 0xb5f   :  { %1455 = vadd.xlane.f32.xlu0 %v1454_v30  ;;  %4170 = vmatpush3.msra.mxu1 %v3594_v17  ;;  %v3626_v17 = vld [vmem:[%s5490_s11 + $0x80] sm:$0xff] }
 0xb60   :  { %4171 = vmatprep.subr.mxu1 %v4446_v0 }
 0xb61   :  { %4172 = vmatpush3.msra.mxu1 %v3593_v19  ;;  %v3624_v19 = vld [vmem:[%s5491_s10 + $0x2] ss:$0 sm:$0xff] }
 0xb62   :  { %4198 = vmatprep.subr.mxu1 %v4446_v0 }
 0xbe8   :  { %v1456_v31 = vpop.xlane.xlu0 %1455 }
 0xbe9   :  { %v1457_v32 = vmul.f32 0.03125, %v1456_v31 }
 0xbeb   :  { %v1458_v33 = vsub.f32 %v1451_v29, %v1457_v32 }
 0xbed   :  { %v1459_v34 = vmul.f32 %v1458_v33, %v1458_v33 }
 0xbef   :  { %v1460_v35 = vsel %vm1254_vm5, %v1459_v34, 0.0 }
 0xbf0   :  { %1461 = vadd.xlane.f32.xlu1 %v1460_v35  ;;  %v3611_v35 = vld [vmem:[%s5486_s8 + $0x58] sm:$0xff] }
 0xc79   :  { %v1462_v40 = vpop.xlane.xlu1 %1461 }
 0xc7a   :  { %v1463_v41 = vmul.f32 0.03125, %v1462_v40 }
 0xc7c   :  { %v1464_v42 = vadd.f32 1e-05, %v1463_v41 }
 0xc7e   :  { %4416 = vrsqrt.f32 %v1464_v42 }
 0xc8b   :  { %v4417_v43 = vpop.eup %4416 }
 0xc8c   :  { %v1466_v45 = vmul.f32 %v4417_v43, %v1458_v33  ;;  %v3606_v43 = vld [vmem:[%s5488_s12 + $0xc] ss:$0 sm:$0xff] }
 0xc8e   :  { %v1471_v47 = vmul.f32 %v3573_v44, %v1466_v45  ;;  %v3607_v45 = vld [vmem:[%s5488_s12 + $0xd] ss:$0 sm:$0xff] }
 0xc90   :  { %v1476_v48 = vadd.f32 %v3574_v46, %v1471_v47 }
 0xc92   :  { %4144 = vmatmul.mubr.msk.f32.vlgmr.msra.gmra.mxu0 %vm168_vm2, %v1476_v48 }
 0xc93   :  { %4154 = vmatprep.mubr.msk.f32.mxu0 %vm4447_vm0, %v4446_v0  ;;  %4147 = vmatpush3.msra.mxu0 %v3589_v60  ;;  %v3621_v60 = vld [vmem:[%s5489_s9 + $0x50] sm:$0xff] }
 0xc94   :  { %4148 = vmatprep.subr.mxu0 %v4446_v0 }
 0xc95   :  { %4149 = vmatpush3.msra.mxu0 %v3588_v61  ;;  %v3620_v61 = vld [vmem:[%s5489_s9 + $0x48] sm:$0xff] }
 0xc96   :  { %4150 = vmatprep.subr.mxu0 %v4446_v0 }
 0xc97   :  { %4151 = vmatpush3.msra.mxu0 %v3587_v62  ;;  %v3619_v62 = vld [vmem:[%s5489_s9 + $0x40] sm:$0xff] }
 0xc98   :  { %4152 = vmatprep.subr.mxu0 %v4446_v0 }
 0xc99   :  { %4153 = vmatpush3.msra.mxu0 %v3586_v63  ;;  %v3633_v63 = vld [vmem:[%s5490_s11 + $0xb8] sm:$0xff] }
 0xc9a   :  { %4176 = vmatprep.subr.mxu0 %v4446_v0 }
 0xd52   :  { %v1557_v50 = vpop.f32.mrf.mxu0 }
 0xd53   :  { %v1558_v51 = vadd.f32 %v3580_v49, %v1557_v50 }
 0xd54   :  { %v4145_v52 = vpop.f32.mrf.mxu0 }
 0xd55   :  { %v1561_v53 = vadd.f32 %v1558_v51, %v1476_v48  ;;  %v3613_v48 = vld [vmem:[%s5488_s12 + $0x10] ss:$0 sm:$0xff] }
 0xd57   :  { %v1564_v54 = vsel %vm1254_vm5, %v1561_v53, 0.0 }
 0xd58   :  { %1565 = vadd.xlane.f32.xlu0 %v1564_v54 }
 0xde1   :  { %v1566_v55 = vpop.xlane.xlu0 %1565 }
 0xde2   :  { %v1567_v56 = vmul.f32 0.03125, %v1566_v55 }
 0xde4   :  { %v1568_v57 = vsub.f32 %v1561_v53, %v1567_v56 }
 0xde6   :  { %v1569_v58 = vmul.f32 %v1568_v57, %v1568_v57 }
 0xde8   :  { %v1570_v59 = vsel %vm1254_vm5, %v1569_v58, 0.0 }
 0xde9   :  { %1571 = vadd.xlane.f32.xlu1 %v1570_v59  ;;  %v3622_v59 = vld [vmem:[%s5489_s9 + $0x58] sm:$0xff] }
 0xe72   :  { %v1572_v6 = vpop.xlane.xlu1 %1571 }
 0xe73   :  { %v1573_v7 = vmul.f32 0.03125, %v1572_v6 }
 0xe75   :  { %v1574_v8 = vadd.f32 1e-05, %v1573_v7 }
 0xe77   :  { %4418 = vrsqrt.f32 %v1574_v8 }
 0xe84   :  { %v4419_v9 = vpop.eup %4418 }
 0xe85   :  { %v1576_v12 = vmul.f32 %v4419_v9, %v1568_v57  ;;  %v3617_v9 = vld [vmem:[%s5488_s12 + $0x12] ss:$0 sm:$0xff] }
 0xe87   :  { %v1581_v14 = vmul.f32 %v3584_v11, %v1576_v12  ;;  %v3618_v12 = vld [vmem:[%s5488_s12 + $0x13] ss:$0 sm:$0xff] }
 0xe89   :  { %v1586_v15 = vadd.f32 %v3585_v13, %v1581_v14 }
 0xe8b   :  { %4155 = vmatmul.mubr.msk.f32.vlgmr.msra.gmra.mxu0 %vm168_vm2, %v1586_v15 }
 0xe8c   :  { %4184 = vmatprep.mubr.msk.f32.mxu0 %vm4447_vm0, %v4446_v0  ;;  %4177 = vmatpush3.msra.mxu0 %v3611_v35  ;;  %v3643_v35 = vld [vmem:[%s5486_s8 + $0x70] sm:$0xff] }
 0xe8d   :  { %4178 = vmatprep.subr.mxu0 %v4446_v0 }
 0xe8e   :  { %4179 = vmatpush3.msra.mxu0 %v3610_v36  ;;  %v3642_v36 = vld [vmem:[%s5486_s8 + $0x68] sm:$0xff] }
 0xe8f   :  { %4180 = vmatprep.subr.mxu0 %v4446_v0 }
 0xe90   :  { %4181 = vmatpush3.msra.mxu0 %v3609_v37  ;;  %v3641_v37 = vld [vmem:[%s5486_s8 + $0x60] sm:$0xff] }
 0xe91   :  { %4182 = vmatprep.subr.mxu0 %v4446_v0 }
 0xe92   :  { %4183 = vmatpush3.msra.mxu0 %v3608_v38 }
 0xe93   :  { %4187 = vmatprep.subr.mxu0 %v4446_v0 }
 0xf4b   :  { %v1669_v21 = vpop.f32.mrf.mxu0 }
 0xf4c   :  { %v1670_v22 = vadd.f32 %v3591_v20, %v1669_v21 }
 0xf4d   :  { %v4156_v23 = vpop.f32.mrf.mxu0 }
 0xf4e   :  { %v1673_v24 = vmax.f32 %v1670_v22, 0.0 }
 0xf50   :  { %4174 = vmatmul.mubr.msk.f32.vlgmr.msra.gmra.mxu1 %vm1377_vm6, %v1673_v24  ;;  %v3635_v24 = vld [vmem:[%s5488_s12 + $0x11] ss:$0 sm:$0xff] }
 0xf51   :  { %4214 = vmatprep.mubr.msk.f32.mxu1 %vm4447_vm0, %v4446_v0  ;;  %4199 = vmatpush3.msra.mxu1 %v3633_v63  ;;  %v3665_v63 = vld [vmem:[%s5490_s11 + $0xf0] sm:$0xff] }
 0xf52   :  { %4200 = vmatprep.subr.mxu1 %v4446_v0 }
 0xf53   :  { %4201 = vmatpush3.msra.mxu1 %v3632_v1  ;;  %v3664_v1 = vld [vmem:[%s5490_s11 + $0xe8] sm:$0xff] }
 0xf54   :  { %4202 = vmatprep.subr.mxu1 %v4446_v0 }
 0xf55   :  { %4203 = vmatpush3.msra.mxu1 %v3631_v2  ;;  %v3663_v2 = vld [vmem:[%s5490_s11 + $0xe0] sm:$0xff] }
 0xf56   :  { %4204 = vmatprep.subr.mxu1 %v4446_v0 }
 0xf57   :  { %4205 = vmatpush3.msra.mxu1 %v3630_v3  ;;  %v3662_v3 = vld [vmem:[%s5490_s11 + $0xd8] sm:$0xff] }
 0xf58   :  { %4206 = vmatprep.subr.mxu1 %v4446_v0 }
 0xf59   :  { %4207 = vmatpush3.msra.mxu1 %v3629_v4 }
 0xf5a   :  { %4208 = vmatprep.subr.mxu1 %v4446_v0 }
0x1010   :  { %v1757_v10 = vpop.f32.mrf.mxu1 }
0x1011   :  { %v1758_v26 = vadd.f32 %v3602_v25, %v1757_v10 }
0x1012   :  { %v4175_v27 = vpop.f32.mrf.mxu1 }
0x1013   :  { %v1761_v28 = vadd.f32 %v1758_v26, %v1586_v15  ;;  %v3628_v15 = vld [vmem:[%s5490_s11 + $0x90] sm:$0xff] }
0x1014   :  { %4209 = vmatpush3.msra.mxu1 %v3628_v15  ;;  %v3676_v15 = vld [vmem:[%s5486_s8 + $0x90] sm:$0xff] }
0x1015   :  { %v1764_v29 = vsel %vm1254_vm5, %v1761_v28, 0.0  ;;  %4210 = vmatprep.subr.mxu1 %v4446_v0 }
0x1016   :  { %1765 = vadd.xlane.f32.xlu0 %v1764_v29  ;;  %4211 = vmatpush3.msra.mxu1 %v3627_v16  ;;  %v3675_v16 = vld [vmem:[%s5486_s8 + $0x88] sm:$0xff] }
0x1017   :  { %4212 = vmatprep.subr.mxu1 %v4446_v0 }
0x1018   :  { %4213 = vmatpush3.msra.mxu1 %v3626_v17  ;;  %v3674_v17 = vld [vmem:[%s5486_s8 + $0x80] sm:$0xff] }
0x1019   :  { %4239 = vmatprep.subr.mxu1 %v4446_v0 }
0x109f   :  { %v1766_v30 = vpop.xlane.xlu0 %1765 }
0x10a0   :  { %v1767_v31 = vmul.f32 0.03125, %v1766_v30 }
0x10a2   :  { %v1768_v32 = vsub.f32 %v1761_v28, %v1767_v31 }
0x10a4   :  { %v1769_v33 = vmul.f32 %v1768_v32, %v1768_v32 }
0x10a6   :  { %v1770_v34 = vsel %vm1254_vm5, %v1769_v33, 0.0 }
0x10a7   :  { %1771 = vadd.xlane.f32.xlu1 %v1770_v34  ;;  %v3644_v34 = vld [vmem:[%s5486_s8 + $0x78] sm:$0xff] }
0x1130   :  { %v1772_v39 = vpop.xlane.xlu1 %1771 }
0x1131   :  { %v1773_v40 = vmul.f32 0.03125, %v1772_v39 }
0x1133   :  { %v1774_v41 = vadd.f32 1e-05, %v1773_v40 }
0x1135   :  { %4420 = vrsqrt.f32 %v1774_v41 }
0x1142   :  { %v4421_v42 = vpop.eup %4420 }
0x1143   :  { %v1776_v44 = vmul.f32 %v4421_v42, %v1768_v32  ;;  %v3639_v42 = vld [vmem:[%s5488_s12 + $0x14] ss:$0 sm:$0xff] }
0x1145   :  { %v1781_v46 = vmul.f32 %v3606_v43, %v1776_v44  ;;  %v3640_v44 = vld [vmem:[%s5488_s12 + $0x15] ss:$0 sm:$0xff] }
0x1147   :  { %v1786_v47 = vadd.f32 %v3607_v45, %v1781_v46 }
0x1149   :  { %4185 = vmatmul.mubr.msk.f32.vlgmr.msra.gmra.mxu0 %vm168_vm2, %v1786_v47 }
0x114a   :  { %4195 = vmatprep.mubr.msk.f32.mxu0 %vm4447_vm0, %v4446_v0  ;;  %4188 = vmatpush3.msra.mxu0 %v3622_v59  ;;  %v3654_v59 = vld [vmem:[%s5489_s9 + $0x70] sm:$0xff] }
0x114b   :  { %4189 = vmatprep.subr.mxu0 %v4446_v0 }
0x114c   :  { %4190 = vmatpush3.msra.mxu0 %v3621_v60  ;;  %v3653_v60 = vld [vmem:[%s5489_s9 + $0x68] sm:$0xff] }
0x114d   :  { %4191 = vmatprep.subr.mxu0 %v4446_v0 }
0x114e   :  { %4192 = vmatpush3.msra.mxu0 %v3620_v61  ;;  %v3652_v61 = vld [vmem:[%s5489_s9 + $0x60] sm:$0xff] }
0x114f   :  { %4193 = vmatprep.subr.mxu0 %v4446_v0 }
0x1150   :  { %4194 = vmatpush3.msra.mxu0 %v3619_v62  ;;  %v3666_v62 = vld [vmem:[%s5490_s11 + $0xf8] sm:$0xff] }
0x1151   :  { %4217 = vmatprep.subr.mxu0 %v4446_v0 }
0x1209   :  { %v1867_v49 = vpop.f32.mrf.mxu0 }
0x120a   :  { %v1868_v50 = vadd.f32 %v3613_v48, %v1867_v49 }
0x120b   :  { %v4186_v51 = vpop.f32.mrf.mxu0 }
0x120c   :  { %v1871_v52 = vadd.f32 %v1868_v50, %v1786_v47  ;;  %v3646_v47 = vld [vmem:[%s5488_s12 + $0x18] ss:$0 sm:$0xff] }
0x120e   :  { %v1874_v53 = vsel %vm1254_vm5, %v1871_v52, 0.0 }
0x120f   :  { %1875 = vadd.xlane.f32.xlu0 %v1874_v53 }
0x1298   :  { %v1876_v54 = vpop.xlane.xlu0 %1875 }
0x1299   :  { %v1877_v55 = vmul.f32 0.03125, %v1876_v54 }
0x129b   :  { %v1878_v56 = vsub.f32 %v1871_v52, %v1877_v55 }
0x129d   :  { %v1879_v57 = vmul.f32 %v1878_v56, %v1878_v56 }
0x129f   :  { %v1880_v58 = vsel %vm1254_vm5, %v1879_v57, 0.0 }
0x12a0   :  { %1881 = vadd.xlane.f32.xlu1 %v1880_v58  ;;  %v3655_v58 = vld [vmem:[%s5489_s9 + $0x78] sm:$0xff] }
0x1329   :  { %v1882_v5 = vpop.xlane.xlu1 %1881 }
0x132a   :  { %v1883_v6 = vmul.f32 0.03125, %v1882_v5 }
0x132c   :  { %v1884_v7 = vadd.f32 1e-05, %v1883_v6 }
0x132e   :  { %4422 = vrsqrt.f32 %v1884_v7 }
0x133b   :  { %v4423_v8 = vpop.eup %4422 }
0x133c   :  { %v1886_v11 = vmul.f32 %v4423_v8, %v1878_v56  ;;  %v3650_v8 = vld [vmem:[%s5488_s12 + $0x1a] ss:$0 sm:$0xff] }
0x133e   :  { %v1891_v13 = vmul.f32 %v3617_v9, %v1886_v11  ;;  %v3651_v11 = vld [vmem:[%s5488_s12 + $0x1b] ss:$0 sm:$0xff] }
0x1340   :  { %v1896_v14 = vadd.f32 %v3618_v12, %v1891_v13 }
0x1342   :  { %4196 = vmatmul.mubr.msk.f32.vlgmr.msra.gmra.mxu0 %vm168_vm2, %v1896_v14 }
0x1343   :  { %4225 = vmatprep.mubr.msk.f32.mxu0 %vm4447_vm0, %v4446_v0  ;;  %4218 = vmatpush3.msra.mxu0 %v3644_v34 }
0x1344   :  { %4219 = vmatprep.subr.mxu0 %v4446_v0 }
0x1345   :  { %4220 = vmatpush3.msra.mxu0 %v3643_v35 }
0x1346   :  { %4221 = vmatprep.subr.mxu0 %v4446_v0 }
0x1347   :  { %4222 = vmatpush3.msra.mxu0 %v3642_v36 }
0x1348   :  { %4223 = vmatprep.subr.mxu0 %v4446_v0 }
0x1349   :  { %4224 = vmatpush3.msra.mxu0 %v3641_v37  ;;  %v3688_v37 = vld [vmem:[%s5489_s9 + $0x98] sm:$0xff] }
0x134a   :  { %4228 = vmatprep.subr.mxu0 %v4446_v0 }
0x1402   :  { %v1979_v20 = vpop.f32.mrf.mxu0 }
0x1403   :  { %v1980_v21 = vadd.f32 %v3624_v19, %v1979_v20  ;;  %v3661_v19 = vld [vmem:[%s5490_s11 + $0xd0] sm:$0xff]  ;;  %v3660_v20 = vld [vmem:[%s5490_s11 + $0xc8] sm:$0xff] }
0x1404   :  { %v4197_v22 = vpop.f32.mrf.mxu0 }
0x1405   :  { %v1983_v23 = vmax.f32 %v1980_v21, 0.0  ;;  %v3659_v21 = vld [vmem:[%s5490_s11 + $0xc0] sm:$0xff] }
0x1406   :  { %v3657_v22 = vld [vmem:[%s5491_s10 + $0x3] ss:$0 sm:$0xff] }
0x1407   :  { %4215 = vmatmul.mubr.msk.f32.vlgmr.msra.gmra.mxu1 %vm1377_vm6, %v1983_v23 }
0x1408   :  { %4255 = vmatprep.mubr.msk.f32.mxu1 %vm4447_vm0, %v4446_v0  ;;  %4240 = vmatpush3.msra.mxu1 %v3666_v62 }
0x1409   :  { %4241 = vmatprep.subr.mxu1 %v4446_v0 }
0x140a   :  { %4242 = vmatpush3.msra.mxu1 %v3665_v63 }
0x140b   :  { %4243 = vmatprep.subr.mxu1 %v4446_v0 }
0x140c   :  { %4244 = vmatpush3.msra.mxu1 %v3664_v1  ;;  %v3701_v1 = vld [vmem:[%s5488_s12 + $0x21] ss:$0 sm:$0xff] }
0x140d   :  { %4245 = vmatprep.subr.mxu1 %v4446_v0 }
0x140e   :  { %4246 = vmatpush3.msra.mxu1 %v3663_v2 }
0x140f   :  { %4247 = vmatprep.subr.mxu1 %v4446_v0 }
0x1410   :  { %4248 = vmatpush3.msra.mxu1 %v3662_v3 }
0x1411   :  { %4249 = vmatprep.subr.mxu1 %v4446_v0 }
0x1412   :  { %4250 = vmatpush3.msra.mxu1 %v3661_v19 }
0x1413   :  { %4251 = vmatprep.subr.mxu1 %v4446_v0 }
0x1414   :  { %4252 = vmatpush3.msra.mxu1 %v3660_v20 }
0x1415   :  { %4253 = vmatprep.subr.mxu1 %v4446_v0 }
0x1416   :  { %4254 = vmatpush3.msra.mxu1 %v3659_v21 }
0x1417   :  { %4280 = vmatprep.subr.mxu1 %v4446_v0 }
0x14c7   :  { %v2067_v25 = vpop.f32.mrf.mxu1 }
0x14c8   :  { %v2068_v10 = vadd.f32 %v3635_v24, %v2067_v25 }
0x14c9   :  { %v4216_v26 = vpop.f32.mrf.mxu1 }
0x14ca   :  { %v2071_v27 = vadd.f32 %v2068_v10, %v1896_v14  ;;  %v3677_v14 = vld [vmem:[%s5486_s8 + $0x98] sm:$0xff]  ;;  %v3679_v26 = vld [vmem:[%s5488_s12 + $0x20] ss:$0 sm:$0xff] }
0x14cc   :  { %v2074_v28 = vsel %vm1254_vm5, %v2071_v27, 0.0 }
0x14cd   :  { %2075 = vadd.xlane.f32.xlu0 %v2074_v28 }
0x1556   :  { %v2076_v29 = vpop.xlane.xlu0 %2075 }
0x1557   :  { %v2077_v30 = vmul.f32 0.03125, %v2076_v29 }
0x1559   :  { %v2078_v31 = vsub.f32 %v2071_v27, %v2077_v30 }
0x155b   :  { %v2079_v32 = vmul.f32 %v2078_v31, %v2078_v31 }
0x155d   :  { %v2080_v33 = vsel %vm1254_vm5, %v2079_v32, 0.0 }
0x155e   :  { %2081 = vadd.xlane.f32.xlu1 %v2080_v33 }
0x15e7   :  { %v2082_v38 = vpop.xlane.xlu1 %2081 }
0x15e8   :  { %v2083_v39 = vmul.f32 0.03125, %v2082_v38  ;;  %v3686_v38 = vld [vmem:[%s5489_s9 + $0x88] sm:$0xff] }
0x15ea   :  { %v2084_v40 = vadd.f32 1e-05, %v2083_v39  ;;  %v3685_v39 = vld [vmem:[%s5489_s9 + $0x80] sm:$0xff] }
0x15ec   :  { %4424 = vrsqrt.f32 %v2084_v40  ;;  %v3699_v40 = vld [vmem:[%s5490_s11 + $0x138] sm:$0xff] }
0x15f9   :  { %v4425_v41 = vpop.eup %4424 }
0x15fa   :  { %v2086_v43 = vmul.f32 %v4425_v41, %v2078_v31  ;;  %v3698_v41 = vld [vmem:[%s5490_s11 + $0x130] sm:$0xff] }
0x15fc   :  { %v2091_v45 = vmul.f32 %v3639_v42, %v2086_v43  ;;  %v3697_v42 = vld [vmem:[%s5490_s11 + $0x128] sm:$0xff] }
0x15fe   :  { %v2096_v46 = vadd.f32 %v3640_v44, %v2091_v45  ;;  %v3696_v44 = vld [vmem:[%s5490_s11 + $0x120] sm:$0xff] }
0x1600   :  { %4226 = vmatmul.mubr.msk.f32.vlgmr.msra.gmra.mxu0 %vm168_vm2, %v2096_v46 }
0x1601   :  { %4236 = vmatprep.mubr.msk.f32.mxu0 %vm4447_vm0, %v4446_v0  ;;  %4229 = vmatpush3.msra.mxu0 %v3655_v58  ;;  %v3692_v58 = vld [vmem:[%s5490_s11 + $0x100] sm:$0xff] }
0x1602   :  { %4230 = vmatprep.subr.mxu0 %v4446_v0 }
0x1603   :  { %4231 = vmatpush3.msra.mxu0 %v3654_v59  ;;  %v3690_v59 = vld [vmem:[%s5491_s10 + $0x4] ss:$0 sm:$0xff] }
0x1604   :  { %4232 = vmatprep.subr.mxu0 %v4446_v0 }
0x1605   :  { %4233 = vmatpush3.msra.mxu0 %v3653_v60 }
0x1606   :  { %4234 = vmatprep.subr.mxu0 %v4446_v0 }
0x1607   :  { %4235 = vmatpush3.msra.mxu0 %v3652_v61 }
0x1608   :  { %4258 = vmatprep.subr.mxu0 %v4446_v0 }
0x16c0   :  { %v2177_v48 = vpop.f32.mrf.mxu0 }
0x16c1   :  { %v2178_v49 = vadd.f32 %v3646_v47, %v2177_v48 }
0x16c2   :  { %v4227_v50 = vpop.f32.mrf.mxu0 }
0x16c3   :  { %v2181_v51 = vadd.f32 %v2178_v49, %v2096_v46  ;;  %v3695_v46 = vld [vmem:[%s5490_s11 + $0x118] sm:$0xff] }
0x16c5   :  { %v2184_v52 = vsel %vm1254_vm5, %v2181_v51, 0.0 }
0x16c6   :  { %2185 = vadd.xlane.f32.xlu0 %v2184_v52 }
0x174f   :  { %v2186_v53 = vpop.xlane.xlu0 %2185 }
0x1750   :  { %v2187_v54 = vmul.f32 0.03125, %v2186_v53  ;;  %v3684_v53 = vld [vmem:[%s5488_s12 + $0x23] ss:$0 sm:$0xff] }
0x1752   :  { %v2188_v55 = vsub.f32 %v2181_v51, %v2187_v54  ;;  %v3683_v51 = vld [vmem:[%s5488_s12 + $0x22] ss:$0 sm:$0xff] }
0x1754   :  { %v2189_v56 = vmul.f32 %v2188_v55, %v2188_v55 }
0x1756   :  { %v2190_v57 = vsel %vm1254_vm5, %v2189_v56, 0.0  ;;  %v3694_v56 = vld [vmem:[%s5490_s11 + $0x110] sm:$0xff] }
0x1757   :  { %2191 = vadd.xlane.f32.xlu1 %v2190_v57  ;;  %v3693_v57 = vld [vmem:[%s5490_s11 + $0x108] sm:$0xff] }
0x17e0   :  { %v2192_v4 = vpop.xlane.xlu1 %2191 }
0x17e1   :  { %v2193_v5 = vmul.f32 0.03125, %v2192_v4 }
0x17e3   :  { %v2194_v6 = vadd.f32 1e-05, %v2193_v5 }
0x17e5   :  { %4426 = vrsqrt.f32 %v2194_v6 }
0x17f2   :  { %v4427_v7 = vpop.eup %4426 }
0x17f3   :  { %v2196_v9 = vmul.f32 %v4427_v7, %v2188_v55 }
0x17f5   :  { %v2201_v12 = vmul.f32 %v3650_v8, %v2196_v9 }
0x17f7   :  { %v5106_v13 = vadd.f32 %v3651_v11, %v2201_v12 }
0x17f9   :  { %4237 = vmatmul.mubr.msk.f32.vlgmr.msra.gmra.mxu0 %vm168_vm2, %v5106_v13 }
0x17fa   :  { %4259 = vmatpush3.msra.mxu0 %v3677_v14  ;;  %4266 = vmatprep.mubr.msk.f32.mxu0 %vm4447_vm0, %v4446_v0  ;;  %v3710_v14 = vld [vmem:[%s5486_s8 + $0xb8] sm:$0xff] }
0x17fb   :  { %4260 = vmatprep.subr.mxu0 %v4446_v0 }
0x17fc   :  { %4261 = vmatpush3.msra.mxu0 %v3676_v15  ;;  %v3709_v15 = vld [vmem:[%s5486_s8 + $0xb0] sm:$0xff] }
0x17fd   :  { %4262 = vmatprep.subr.mxu0 %v4446_v0 }
0x17fe   :  { %4263 = vmatpush3.msra.mxu0 %v3675_v16  ;;  %v3708_v16 = vld [vmem:[%s5486_s8 + $0xa8] sm:$0xff] }
0x17ff   :  { %4264 = vmatprep.subr.mxu0 %v4446_v0 }
0x1800   :  { %4265 = vmatpush3.msra.mxu0 %v3674_v17  ;;  %v3707_v17 = vld [vmem:[%s5486_s8 + $0xa0] sm:$0xff] }
0x1801   :  { %4267 = vmatmul.mubr.msk.f32.vlgmr.msra.gmra.mxu0 %vm168_vm2, %v4593_v18  ;;  %4269 = vmatprep.subr.mxu0 %v4446_v0 }
0x1802   :  { %4277 = vmatprep.mubr.msk.f32.mxu0 %vm4447_vm0, %v4446_v0  ;;  %4270 = vmatpush3.msra.mxu0 %v3688_v37 }
0x1803   :  { %4271 = vmatprep.subr.mxu0 %v4446_v0 }
0x18b9   :  { %v2289_v23 = vpop.f32.mrf.mxu0 }
0x18ba   :  { %v2290_v24 = vadd.f32 %v3657_v22, %v2289_v23  ;;  %v3705_v23 = vld [vmem:[%s5488_s12 + $0x24] ss:$0 sm:$0xff] }
0x18bb   :  { %v4238_v25 = vpop.f32.mrf.mxu0 }
0x18bc   :  { %v2293_v10 = vmax.f32 %v2290_v24, 0.0  ;;  %v3706_v25 = vld [vmem:[%s5488_s12 + $0x25] ss:$0 sm:$0xff] }
0x18be   :  { %4256 = vmatmul.mubr.msk.f32.vlgmr.msra.gmra.mxu1 %vm1377_vm6, %v2293_v10 }
0x18bf   :  { %4296 = vmatprep.mubr.msk.f32.mxu1 %vm4447_vm0, %v4446_v0  ;;  %4281 = vmatpush3.msra.mxu1 %v3699_v40  ;;  %v3718_v40 = vld [vmem:[%s5489_s9 + $0xa0] sm:$0xff] }
0x18c0   :  { %4282 = vmatprep.subr.mxu1 %v4446_v0 }
0x18c1   :  { %v2484_v27 = vpop.f32.mrf.mxu0  ;;  %4283 = vmatpush3.msra.mxu1 %v3698_v41  ;;  %v3732_v41 = vld [vmem:[%s5490_s11 + $0x178] sm:$0xff] }
0x18c2   :  { %v2485_v28 = vadd.f32 %v3679_v26, %v2484_v27  ;;  %4284 = vmatprep.subr.mxu1 %v4446_v0  ;;  %v3712_v27 = vld [vmem:[%s5488_s12 + $0x28] ss:$0 sm:$0xff] }
0x18c3   :  { %v4268_v29 = vpop.f32.mrf.mxu0  ;;  %4285 = vmatpush3.msra.mxu1 %v3697_v42  ;;  %v3731_v42 = vld [vmem:[%s5490_s11 + $0x170] sm:$0xff] }
0x18c4   :  { %v2488_v30 = vadd.f32 %v2485_v28, %v4593_v18  ;;  %v3687_v18 = vld [vmem:[%s5489_s9 + $0x90] sm:$0xff]  ;;  %4286 = vmatprep.subr.mxu1 %v4446_v0 }
0x18c5   :  { %4272 = vmatpush3.msra.mxu0 %v3687_v18  ;;  %4287 = vmatpush3.msra.mxu1 %v3696_v44  ;;  %v3721_v18 = vld [vmem:[%s5489_s9 + $0xb8] sm:$0xff]  ;;  %v3730_v44 = vld [vmem:[%s5490_s11 + $0x168] sm:$0xff] }
0x18c6   :  { %v2491_v31 = vsel %vm1254_vm5, %v2488_v30, 0.0  ;;  %4273 = vmatprep.subr.mxu0 %v4446_v0  ;;  %4288 = vmatprep.subr.mxu1 %v4446_v0 }
0x18c7   :  { %2492 = vadd.xlane.f32.xlu0 %v2491_v31  ;;  %4274 = vmatpush3.msra.mxu0 %v3686_v38  ;;  %v3720_v38 = vld [vmem:[%s5489_s9 + $0xb0] sm:$0xff] }
0x18c8   :  { %4275 = vmatprep.subr.mxu0 %v4446_v0  ;;  %4289 = vmatpush3.msra.mxu1 %v3695_v46  ;;  %v3728_v46 = vld [vmem:[%s5490_s11 + $0x158] sm:$0xff] }
0x18c9   :  { %4276 = vmatpush3.msra.mxu0 %v3685_v39  ;;  %4290 = vmatprep.subr.mxu1 %v4446_v0  ;;  %v3719_v39 = vld [vmem:[%s5489_s9 + $0xa8] sm:$0xff] }
0x18ca   :  { %4299 = vmatprep.subr.mxu0 %v4446_v0  ;;  %4291 = vmatpush3.msra.mxu1 %v3694_v56  ;;  %v3727_v56 = vld [vmem:[%s5490_s11 + $0x150] sm:$0xff] }
0x18cb   :  { %4292 = vmatprep.subr.mxu1 %v4446_v0 }
0x18cc   :  { %4293 = vmatpush3.msra.mxu1 %v3693_v57  ;;  %v3726_v57 = vld [vmem:[%s5490_s11 + $0x148] sm:$0xff] }
0x18cd   :  { %4294 = vmatprep.subr.mxu1 %v4446_v0 }
0x18ce   :  { %4295 = vmatpush3.msra.mxu1 %v3692_v58  ;;  %v3725_v58 = vld [vmem:[%s5490_s11 + $0x140] sm:$0xff] }
0x18cf   :  { %4321 = vmatprep.subr.mxu1 %v4446_v0 }
0x1950   :  { %v2493_v32 = vpop.xlane.xlu0 %2492 }
0x1951   :  { %v2494_v33 = vmul.f32 0.03125, %v2493_v32 }
0x1953   :  { %v2495_v34 = vsub.f32 %v2488_v30, %v2494_v33 }
0x1955   :  { %v2496_v35 = vmul.f32 %v2495_v34, %v2495_v34 }
0x1957   :  { %v2497_v36 = vsel %vm1254_vm5, %v2496_v35, 0.0 }
0x1958   :  { %2498 = vadd.xlane.f32.xlu1 %v2497_v36 }
0x197e   :  { %v5182_v43 = vpop.f32.mrf.mxu1 }
0x1980   :  { %v4257_v45 = vpop.f32.mrf.mxu1 }
0x1981   :  { %v3729_v45 = vld [vmem:[%s5490_s11 + $0x160] sm:$0xff] }
0x19e1   :  { %v2499_v47 = vpop.xlane.xlu1 %2498 }
0x19e2   :  { %v2500_v48 = vmul.f32 0.03125, %v2499_v47 }
0x19e4   :  { %v2501_v49 = vadd.f32 1e-05, %v2500_v48 }
0x19e6   :  { %4428 = vrsqrt.f32 %v2501_v49 }
0x19f3   :  { %v4429_v50 = vpop.eup %4428 }
0x19f4   :  { %v2503_v52 = vmul.f32 %v4429_v50, %v2495_v34 }
0x19f6   :  { %v2508_v54 = vmul.f32 %v3683_v51, %v2503_v52  ;;  %v3716_v51 = vld [vmem:[%s5488_s12 + $0x2a] ss:$0 sm:$0xff] }
0x19f8   :  { %v2513_v55 = vadd.f32 %v3684_v53, %v2508_v54  ;;  %v3717_v53 = vld [vmem:[%s5488_s12 + $0x2b] ss:$0 sm:$0xff] }
0x19fa   :  { %4278 = vmatmul.mubr.msk.f32.vlgmr.msra.gmra.mxu0 %vm168_vm2, %v2513_v55 }
0x19fb   :  { %4307 = vmatprep.mubr.msk.f32.mxu0 %vm4447_vm0, %v4446_v0  ;;  %4300 = vmatpush3.msra.mxu0 %v3710_v14  ;;  %v3743_v14 = vld [vmem:[%s5486_s8 + $0xd8] sm:$0xff] }
0x19fc   :  { %4301 = vmatprep.subr.mxu0 %v4446_v0 }
0x19fd   :  { %4302 = vmatpush3.msra.mxu0 %v3709_v15  ;;  %v3742_v15 = vld [vmem:[%s5486_s8 + $0xd0] sm:$0xff] }
0x19fe   :  { %4303 = vmatprep.subr.mxu0 %v4446_v0 }
0x19ff   :  { %4304 = vmatpush3.msra.mxu0 %v3708_v16  ;;  %v3741_v16 = vld [vmem:[%s5486_s8 + $0xc8] sm:$0xff] }
0x1a00   :  { %4305 = vmatprep.subr.mxu0 %v4446_v0 }
0x1a01   :  { %4306 = vmatpush3.msra.mxu0 %v3707_v17  ;;  %v3740_v17 = vld [vmem:[%s5486_s8 + $0xc0] sm:$0xff] }
0x1a02   :  { %4310 = vmatprep.subr.mxu0 %v4446_v0 }
0x1aba   :  { %v2596_v60 = vpop.f32.mrf.mxu0 }
0x1abb   :  { %v2597_v61 = vadd.f32 %v3690_v59, %v2596_v60  ;;  %v3723_v59 = vld [vmem:[%s5491_s10 + $0x5] ss:$0 sm:$0xff] }
0x1abc   :  { %v4279_v62 = vpop.f32.mrf.mxu0 }
0x1abd   :  { %v2600_v63 = vmax.f32 %v2597_v61, 0.0 }
0x1abf   :  { %4297 = vmatmul.mubr.msk.f32.vlgmr.msra.gmra.mxu1 %vm1377_vm6, %v2600_v63 }
0x1ac0   :  { %4337 = vmatprep.mubr.msk.f32.mxu1 %vm4447_vm0, %v4446_v0  ;;  %4322 = vmatpush3.msra.mxu1 %v3732_v41 }
0x1ac1   :  { %4323 = vmatprep.subr.mxu1 %v4446_v0 }
0x1ac2   :  { %4324 = vmatpush3.msra.mxu1 %v3731_v42 }
0x1ac3   :  { %4325 = vmatprep.subr.mxu1 %v4446_v0 }
0x1ac4   :  { %4326 = vmatpush3.msra.mxu1 %v3730_v44 }
0x1ac5   :  { %4327 = vmatprep.subr.mxu1 %v4446_v0 }
0x1ac6   :  { %4328 = vmatpush3.msra.mxu1 %v3729_v45 }
0x1ac7   :  { %4329 = vmatprep.subr.mxu1 %v4446_v0 }
0x1ac8   :  { %4330 = vmatpush3.msra.mxu1 %v3728_v46  ;;  %v3753_v46 = vld [vmem:[%s5489_s9 + $0xd0] sm:$0xff] }
0x1ac9   :  { %4331 = vmatprep.subr.mxu1 %v4446_v0 }
0x1aca   :  { %4332 = vmatpush3.msra.mxu1 %v3727_v56 }
0x1acb   :  { %4333 = vmatprep.subr.mxu1 %v4446_v0 }
0x1acc   :  { %4334 = vmatpush3.msra.mxu1 %v3726_v57 }
0x1acd   :  { %4335 = vmatprep.subr.mxu1 %v4446_v0 }
0x1ace   :  { %4336 = vmatpush3.msra.mxu1 %v3725_v58 }
0x1acf   :  { %4362 = vmatprep.subr.mxu1 %v4446_v0 }
0x1b7f   :  { %v2684_v2 = vpop.f32.mrf.mxu1 }
0x1b80   :  { %v2685_v3 = vadd.f32 %v3701_v1, %v2684_v2  ;;  %v3734_v1 = vld [vmem:[%s5488_s12 + $0x29] ss:$0 sm:$0xff] }
0x1b81   :  { %v4298_v4 = vpop.f32.mrf.mxu1 }
0x1b82   :  { %v2688_v5 = vadd.f32 %v2685_v3, %v2513_v55 }
0x1b84   :  { %v2691_v6 = vsel %vm1254_vm5, %v2688_v5, 0.0 }
0x1b85   :  { %2692 = vadd.xlane.f32.xlu0 %v2691_v6 }
0x1c0e   :  { %v2693_v7 = vpop.xlane.xlu0 %2692 }
0x1c0f   :  { %v2694_v8 = vmul.f32 0.03125, %v2693_v7 }
0x1c11   :  { %v2695_v9 = vsub.f32 %v2688_v5, %v2694_v8 }
0x1c13   :  { %v2696_v11 = vmul.f32 %v2695_v9, %v2695_v9 }
0x1c15   :  { %v2697_v12 = vsel %vm1254_vm5, %v2696_v11, 0.0 }
0x1c16   :  { %2698 = vadd.xlane.f32.xlu1 %v2697_v12 }
0x1c9f   :  { %v2699_v19 = vpop.xlane.xlu1 %2698 }
0x1ca0   :  { %v2700_v20 = vmul.f32 0.03125, %v2699_v19 }
0x1ca2   :  { %v2701_v21 = vadd.f32 1e-05, %v2700_v20 }
0x1ca4   :  { %4430 = vrsqrt.f32 %v2701_v21 }
0x1cb1   :  { %v4431_v22 = vpop.eup %4430 }
0x1cb2   :  { %v2703_v24 = vmul.f32 %v4431_v22, %v2695_v9 }
0x1cb4   :  { %v2708_v10 = vmul.f32 %v3705_v23, %v2703_v24  ;;  %v3738_v23 = vld [vmem:[%s5488_s12 + $0x2c] ss:$0 sm:$0xff] }
0x1cb6   :  { %v2713_v26 = vadd.f32 %v3706_v25, %v2708_v10  ;;  %v3739_v25 = vld [vmem:[%s5488_s12 + $0x2d] ss:$0 sm:$0xff] }
0x1cb8   :  { %4308 = vmatmul.mubr.msk.f32.vlgmr.msra.gmra.mxu0 %vm168_vm2, %v2713_v26 }
0x1cb9   :  { %4318 = vmatprep.mubr.msk.f32.mxu0 %vm4447_vm0, %v4446_v0  ;;  %4311 = vmatpush3.msra.mxu0 %v3721_v18 }
0x1cba   :  { %4312 = vmatprep.subr.mxu0 %v4446_v0 }
0x1cbb   :  { %4313 = vmatpush3.msra.mxu0 %v3720_v38 }
0x1cbc   :  { %4314 = vmatprep.subr.mxu0 %v4446_v0 }
0x1cbd   :  { %4315 = vmatpush3.msra.mxu0 %v3719_v39 }
0x1cbe   :  { %4316 = vmatprep.subr.mxu0 %v4446_v0 }
0x1cbf   :  { %4317 = vmatpush3.msra.mxu0 %v3718_v40 }
0x1cc0   :  { %4340 = vmatprep.subr.mxu0 %v4446_v0 }
0x1d78   :  { %v2794_v28 = vpop.f32.mrf.mxu0 }
0x1d79   :  { %v2795_v29 = vadd.f32 %v3712_v27, %v2794_v28  ;;  %v3668_v27 = vld [vmem:[%s5488_s12 + $0x19] ss:$0 sm:$0xff]  ;;  %v3745_v28 = vld [vmem:[%s5488_s12 + $0x30] ss:$0 sm:$0xff] }
0x1d7a   :  { %v4309_v30 = vpop.f32.mrf.mxu0 }
0x1d7b   :  { %v2798_v31 = vadd.f32 %v2795_v29, %v2713_v26  ;;  %v2378_v30 = vadd.f32 %v3668_v27, %v5182_v43 }
0x1d7d   :  { %v2801_v32 = vsel %vm1254_vm5, %v2798_v31, 0.0 }
0x1d7e   :  { %2802 = vadd.xlane.f32.xlu0 %v2801_v32 }
0x1e07   :  { %v2803_v33 = vpop.xlane.xlu0 %2802 }
0x1e08   :  { %v2804_v34 = vmul.f32 0.03125, %v2803_v33 }
0x1e0a   :  { %v2805_v35 = vsub.f32 %v2798_v31, %v2804_v34 }
0x1e0c   :  { %v2806_v36 = vmul.f32 %v2805_v35, %v2805_v35 }
0x1e0e   :  { %v2807_v37 = vsel %vm1254_vm5, %v2806_v36, 0.0 }
0x1e0f   :  { %2808 = vadd.xlane.f32.xlu1 %v2807_v37 }
0x1e98   :  { %v2809_v47 = vpop.xlane.xlu1 %2808 }
0x1e99   :  { %v2810_v48 = vmul.f32 0.03125, %v2809_v47  ;;  %v3752_v47 = vld [vmem:[%s5489_s9 + $0xc8] sm:$0xff] }
0x1e9b   :  { %v2811_v49 = vadd.f32 1e-05, %v2810_v48  ;;  %v3751_v48 = vld [vmem:[%s5489_s9 + $0xc0] sm:$0xff] }
0x1e9d   :  { %4432 = vrsqrt.f32 %v2811_v49  ;;  %v3765_v49 = vld [vmem:[%s5490_s11 + $0x1b8] sm:$0xff] }
0x1eaa   :  { %v4433_v50 = vpop.eup %4432 }
0x1eab   :  { %v2813_v52 = vmul.f32 %v4433_v50, %v2805_v35  ;;  %v2381_v35 = vadd.f32 %v2378_v30, %v5106_v13  ;;  %v3754_v13 = vld [vmem:[%s5489_s9 + $0xd8] sm:$0xff]  ;;  %v3764_v50 = vld [vmem:[%s5490_s11 + $0x1b0] sm:$0xff] }
0x1ead   :  { %v2818_v54 = vmul.f32 %v3716_v51, %v2813_v52  ;;  %v2384_v36 = vsel %vm1254_vm5, %v2381_v35, 0.0  ;;  %v3763_v51 = vld [vmem:[%s5490_s11 + $0x1a8] sm:$0xff]  ;;  %v3762_v52 = vld [vmem:[%s5490_s11 + $0x1a0] sm:$0xff] }
0x1eaf   :  { %v2823_v55 = vadd.f32 %v3717_v53, %v2818_v54  ;;  %v3761_v53 = vld [vmem:[%s5490_s11 + $0x198] sm:$0xff] }
0x1eb1   :  { %4319 = vmatmul.mubr.msk.f32.vlgmr.msra.gmra.mxu0 %vm168_vm2, %v2823_v55 }
0x1eb2   :  { %4348 = vmatprep.mubr.msk.f32.mxu0 %vm4447_vm0, %v4446_v0  ;;  %4341 = vmatpush3.msra.mxu0 %v3743_v14 }
0x1eb3   :  { %4342 = vmatprep.subr.mxu0 %v4446_v0 }
0x1eb4   :  { %4343 = vmatpush3.msra.mxu0 %v3742_v15  ;;  %v3760_v15 = vld [vmem:[%s5490_s11 + $0x190] sm:$0xff] }
0x1eb5   :  { %4344 = vmatprep.subr.mxu0 %v4446_v0 }
0x1eb6   :  { %4345 = vmatpush3.msra.mxu0 %v3741_v16  ;;  %v3759_v16 = vld [vmem:[%s5490_s11 + $0x188] sm:$0xff] }
0x1eb7   :  { %4346 = vmatprep.subr.mxu0 %v4446_v0 }
0x1eb8   :  { %4347 = vmatpush3.msra.mxu0 %v3740_v17  ;;  %v3758_v17 = vld [vmem:[%s5490_s11 + $0x180] sm:$0xff] }
0x1eb9   :  { %4351 = vmatprep.subr.mxu0 %v4446_v0 }
0x1f71   :  { %v2906_v60 = vpop.f32.mrf.mxu0 }
0x1f72   :  { %v2907_v61 = vadd.f32 %v3723_v59, %v2906_v60 }
0x1f73   :  { %v4320_v62 = vpop.f32.mrf.mxu0 }
0x1f74   :  { %v2910_v63 = vmax.f32 %v2907_v61, 0.0  ;;  %v3749_v61 = vld [vmem:[%s5488_s12 + $0x32] ss:$0 sm:$0xff] }
0x1f76   :  { %4338 = vmatmul.mubr.msk.f32.vlgmr.msra.gmra.mxu1 %vm1377_vm6, %v2910_v63  ;;  %v3750_v63 = vld [vmem:[%s5488_s12 + $0x33] ss:$0 sm:$0xff] }
0x1f77   :  { %4378 = vmatprep.mubr.msk.f32.mxu1 %vm4447_vm0, %v4446_v0  ;;  %4363 = vmatpush3.msra.mxu1 %v3765_v49 }
0x1f78   :  { %4364 = vmatprep.subr.mxu1 %v4446_v0 }
0x1f79   :  { %4365 = vmatpush3.msra.mxu1 %v3764_v50 }
0x1f7a   :  { %4366 = vmatprep.subr.mxu1 %v4446_v0 }
0x1f7b   :  { %4367 = vmatpush3.msra.mxu1 %v3763_v51 }
0x1f7c   :  { %4368 = vmatprep.subr.mxu1 %v4446_v0 }
0x1f7d   :  { %4369 = vmatpush3.msra.mxu1 %v3762_v52 }
0x1f7e   :  { %4370 = vmatprep.subr.mxu1 %v4446_v0 }
0x1f7f   :  { %4371 = vmatpush3.msra.mxu1 %v3761_v53 }
0x1f80   :  { %4372 = vmatprep.subr.mxu1 %v4446_v0 }
0x1f81   :  { %4373 = vmatpush3.msra.mxu1 %v3760_v15 }
0x1f82   :  { %4374 = vmatprep.subr.mxu1 %v4446_v0 }
0x1f83   :  { %4375 = vmatpush3.msra.mxu1 %v3759_v16 }
0x1f84   :  { %4376 = vmatprep.subr.mxu1 %v4446_v0 }
0x1f85   :  { %4377 = vmatpush3.msra.mxu1 %v3758_v17 }
0x2036   :  { %v2994_v2 = vpop.f32.mrf.mxu1 }
0x2037   :  { %v2995_v3 = vadd.f32 %v3734_v1, %v2994_v2 }
0x2038   :  { %v4339_v4 = vpop.f32.mrf.mxu1 }
0x2039   :  { %v2998_v5 = vadd.f32 %v2995_v3, %v2823_v55 }
0x203b   :  { %v3001_v6 = vsel %vm1254_vm5, %v2998_v5, 0.0 }
0x203c   :  { %3002 = vadd.xlane.f32.xlu0 %v3001_v6  ;;  %v3672_v6 = vld [vmem:[%s5488_s12 + $0x1c] ss:$0 sm:$0xff] }
0x20c5   :  { %v3003_v7 = vpop.xlane.xlu0 %3002 }
0x20c6   :  { %v3004_v8 = vmul.f32 0.03125, %v3003_v7  ;;  %v3775_v7 = vld [vmem:[%s5492_s13 + $0x30] sm:$0xff] }
0x20c8   :  { %v3005_v9 = vsub.f32 %v2998_v5, %v3004_v8  ;;  %v3776_v5 = vld [vmem:[%s5492_s13 + $0x38] sm:$0xff]  ;;  %v3774_v8 = vld [vmem:[%s5492_s13 + $0x28] sm:$0xff] }
0x20ca   :  { %v3006_v11 = vmul.f32 %v3005_v9, %v3005_v9 }
0x20cc   :  { %v3007_v12 = vsel %vm1254_vm5, %v3006_v11, 0.0  ;;  %v3673_v11 = vld [vmem:[%s5488_s12 + $0x1d] ss:$0 sm:$0xff] }
0x20cd   :  { %3008 = vadd.xlane.f32.xlu1 %v3007_v12  ;;  %v3773_v12 = vld [vmem:[%s5492_s13 + $0x20] sm:$0xff] }
0x2156   :  { %v3009_v19 = vpop.xlane.xlu1 %3008 }
0x2157   :  { %v3010_v20 = vmul.f32 0.03125, %v3009_v19  ;;  %v3756_v19 = vld [vmem:[%s5491_s10 + $0x6] ss:$0 sm:$0xff] }
0x2159   :  { %v3011_v21 = vadd.f32 1e-05, %v3010_v20 }
0x215b   :  { %4434 = vrsqrt.f32 %v3011_v21 }
0x2168   :  { %v4435_v22 = vpop.eup %4434 }
0x2169   :  { %v3013_v24 = vmul.f32 %v4435_v22, %v3005_v9 }
0x216b   :  { %v3018_v10 = vmul.f32 %v3738_v23, %v3013_v24 }
0x216d   :  { %v3023_v26 = vadd.f32 %v3739_v25, %v3018_v10  ;;  %v3767_v10 = vld [vmem:[%s5488_s12 + $0x31] ss:$0 sm:$0xff] }
0x216f   :  { %4349 = vmatmul.mubr.msk.f32.vlgmr.msra.gmra.mxu0 %vm168_vm2, %v3023_v26 }
0x2170   :  { %4359 = vmatprep.mubr.msk.f32.mxu0 %vm4447_vm0, %v4446_v0  ;;  %4352 = vmatpush3.msra.mxu0 %v3754_v13 }
0x2171   :  { %4353 = vmatprep.subr.mxu0 %v4446_v0 }
0x2172   :  { %4354 = vmatpush3.msra.mxu0 %v3753_v46 }
0x2173   :  { %4355 = vmatprep.subr.mxu0 %v4446_v0 }
0x2174   :  { %4356 = vmatpush3.msra.mxu0 %v3752_v47 }
0x2175   :  { %4357 = vmatprep.subr.mxu0 %v4446_v0 }
0x2176   :  { %4358 = vmatpush3.msra.mxu0 %v3751_v48 }
0x2177   :  { %4381 = vmatprep.subr.mxu0 %v4446_v0 }
0x222f   :  { %v3104_v29 = vpop.f32.mrf.mxu0 }
0x2230   :  { %v3105_v31 = vadd.f32 %v3745_v28, %v3104_v29 }
0x2231   :  { %v4350_v32 = vpop.f32.mrf.mxu0 }
0x2232   :  { %v3108_v33 = vadd.f32 %v3105_v31, %v3023_v26 }
0x2234   :  { %v3111_v34 = vsel %vm1254_vm5, %v3108_v33, 0.0 }
0x2235   :  { %3112 = vadd.xlane.f32.xlu0 %v3111_v34 }
0x2239   :  { %2385 = vadd.xlane.f32.xlu0 %v2384_v36  ;;  %v3337_v36 = vld [vmem:[%s5492_s13 + $0x18] sm:$0xff] }
0x22be   :  { %v3113_v37 = vpop.xlane.xlu0 %3112 }
0x22bf   :  { %v3114_v18 = vmul.f32 0.03125, %v3113_v37  ;;  %v3336_v37 = vld [vmem:[%s5492_s13 + $0x10] sm:$0xff] }
0x22c1   :  { %v3115_v38 = vsub.f32 %v3108_v33, %v3114_v18  ;;  %v3335_v18 = vld [vmem:[%s5492_s13 + $0x8] sm:$0xff] }
0x22c2   :  { %v2386_v39 = vpop.xlane.xlu0 %2385 }
0x22c3   :  { %v2387_v40 = vmul.f32 0.03125, %v2386_v39  ;;  %v3116_v41 = vmul.f32 %v3115_v38, %v3115_v38  ;;  %v20_v39 = vstv %s5493_s14 }
0x22c4   :  { %21 = vst [vmem:[#allocation2] sm:$0x1] %v20_v39 }
0x22c5   :  { %v2388_v42 = vsub.f32 %v2381_v35, %v2387_v40  ;;  %v3117_v43 = vsel %vm1254_vm5, %v3116_v41, 0.0 }
0x22c6   :  { %3118 = vadd.xlane.f32.xlu1 %v3117_v43 }
0x22c7   :  { %v2389_v44 = vmul.f32 %v2388_v42, %v2388_v42 }
0x22c9   :  { %v2390_v45 = vsel %vm1254_vm5, %v2389_v44, 0.0  ;;  %v3771_v44 = vld [vmem:[%s5488_s12 + $0x34] ss:$0 sm:$0xff] }
0x22ca   :  { %2391 = vadd.xlane.f32.xlu0 %v2390_v45 }
0x22cb   :  { %v3779_v48 = vld [vmem:[#allocation2] ss:$0 sm:$0xff] }
0x234f   :  { %v3119_v54 = vpop.xlane.xlu1 %3118 }
0x2350   :  { %v3120_v55 = vmul.f32 0.03125, %v3119_v54 }
0x2352   :  { %v3121_v56 = vadd.f32 1e-05, %v3120_v55 }
0x2353   :  { %v2392_v57 = vpop.xlane.xlu0 %2391 }
0x2354   :  { %4436 = vrsqrt.f32 %v3121_v56  ;;  %v2393_v58 = vmul.f32 0.03125, %v2392_v57 }
0x2356   :  { %v2394_v59 = vadd.f32 1e-05, %v2393_v58 }
0x2358   :  { %4438 = vrsqrt.f32 %v2394_v59 }
0x2361   :  { %v4437_v60 = vpop.eup %4436 }
0x2362   :  { %v3123_v62 = vmul.f32 %v4437_v60, %v3115_v38  ;;  %v3334_v38 = vld [vmem:[%s5492_s13] sm:$0xff] }
0x2364   :  { %v3128_v1 = vmul.f32 %v3749_v61, %v3123_v62 }
0x2365   :  { %v4439_v2 = vpop.eup %4438 }
0x2366   :  { %v2396_v3 = vmul.f32 %v4439_v2, %v2388_v42  ;;  %v3133_v4 = vadd.f32 %v3750_v63, %v3128_v1 }
0x2368   :  { %4360 = vmatmul.mubr.msk.f32.vlgmr.msra.gmra.mxu0 %vm168_vm2, %v3133_v4  ;;  %v2401_v9 = vmul.f32 %v3672_v6, %v2396_v3 }
0x2369   :  { %4382 = vmatpush3.msra.mxu0 %v3776_v5  ;;  %4389 = vmatprep.mubr.msk.f32.mxu0 %vm4447_vm0, %v4446_v0 }
0x236a   :  { %4383 = vmatprep.subr.mxu0 %v4446_v0  ;;  %v2406_v14 = vadd.f32 %v3673_v11, %v2401_v9 }
0x236b   :  { %4384 = vmatpush3.msra.mxu0 %v3775_v7 }
0x236c   :  { %4385 = vmatprep.subr.mxu0 %v4446_v0 }
0x236d   :  { %4386 = vmatpush3.msra.mxu0 %v3774_v8 }
0x236e   :  { %4387 = vmatprep.subr.mxu0 %v4446_v0 }
0x236f   :  { %4388 = vmatpush3.msra.mxu0 %v3773_v12 }
0x2370   :  { %4390 = vmatmul.mubr.msk.f32.vlgmr.msra.gmra.mxu0 %vm168_vm2, %v2406_v14  ;;  %4392 = vmatprep.subr.mxu0 %v4446_v0 }
0x2371   :  { %4400 = vmatprep.mubr.msk.f32.mxu0 %vm4447_vm0, %v4446_v0  ;;  %4393 = vmatpush3.msra.mxu0 %v3337_v36 }
0x2372   :  { %4394 = vmatprep.subr.mxu0 %v4446_v0 }
0x2373   :  { %4395 = vmatpush3.msra.mxu0 %v3336_v37 }
0x2374   :  { %4396 = vmatprep.subr.mxu0 %v4446_v0 }
0x2375   :  { %4397 = vmatpush3.msra.mxu0 %v3335_v18 }
0x2376   :  { %4398 = vmatprep.subr.mxu0 %v4446_v0  ;;  %v3772_v0 = vld [vmem:[%s5488_s12 + $0x35] ss:$0 sm:$0xff] }
0x2377   :  { %4399 = vmatpush3.msra.mxu0 %v3334_v38 }
0x2428   :  { %v3216_v20 = vpop.f32.mrf.mxu0 }
0x2429   :  { %v3217_v21 = vadd.f32 %v3756_v19, %v3216_v20 }
0x242a   :  { %v4361_v22 = vpop.f32.mrf.mxu0 }
0x242b   :  { %v3220_v23 = vmax.f32 %v3217_v21, 0.0 }
0x242d   :  { %4379 = vmatmul.mubr.msk.f32.vlgmr.msra.gmra.mxu1 %vm1377_vm6, %v3220_v23 }
0x2430   :  { %v3412_v24 = vpop.f32.mrf.mxu0 }
0x2432   :  { %v4391_v25 = vpop.f32.mrf.mxu0 }
0x24ed   :  { %v3304_v26 = vpop.f32.mrf.mxu1 }
0x24ee   :  { %v3305_v27 = vadd.f32 %v3767_v10, %v3304_v26 }
0x24ef   :  { %v4380_v28 = vpop.f32.mrf.mxu1 }
0x24f0   :  { %v3308_v29 = vadd.f32 %v3305_v27, %v3133_v4 }
0x24f2   :  { %v3311_v30 = vsel %vm1254_vm5, %v3308_v29, 0.0 }
0x24f3   :  { %3312 = vadd.xlane.f32.xlu1 %v3311_v30 }
0x257c   :  { %v3313_v31 = vpop.xlane.xlu1 %3312 }
0x257d   :  { %v3314_v32 = vmul.f32 0.03125, %v3313_v31 }
0x257f   :  { %v3315_v33 = vsub.f32 %v3308_v29, %v3314_v32 }
0x2581   :  { %v3316_v34 = vmul.f32 %v3315_v33, %v3315_v33 }
0x2583   :  { %v3317_v35 = vsel %vm1254_vm5, %v3316_v34, 0.0 }
0x2584   :  { %3318 = vadd.xlane.f32.xlu1 %v3317_v35 }
0x260d   :  { %v3319_v40 = vpop.xlane.xlu1 %3318 }
0x260e   :  { %v3320_v41 = vmul.f32 0.03125, %v3319_v40 }
0x2610   :  { %v3321_v42 = vadd.f32 1e-05, %v3320_v41 }
0x2612   :  { %4440 = vrsqrt.f32 %v3321_v42 }
0x261f   :  { %v4441_v43 = vpop.eup %4440 }
0x2620   :  { %v3323_v45 = vmul.f32 %v4441_v43, %v3315_v33 }
0x2622   :  { %v3328_v13 = vmul.f32 %v3771_v44, %v3323_v45 }
0x2624   :  { %v3333_v46 = vadd.f32 %v3772_v0, %v3328_v13 }
0x2626   :  { %4401 = vmatmul.mubr.msk.f32.vlgmr.msra.gmra.mxu0 %vm168_vm2, %v3333_v46 }
0x26e6   :  { %v3485_v47 = vpop.f32.mrf.mxu0 }
0x26e7   :  { %v3486_v49 = vadd.f32 %v3485_v47, %v3412_v24 }
0x26e8   :  { %v4402_v50 = vpop.f32.mrf.mxu0 }
0x26e9   :  { %v3496_v51 = vadd.f32 %v3779_v48, %v3486_v49 }
0x26eb   :  { %v3780_v52 = vmul.f32 -1.442695, %v3496_v51 }
0x26ed   :  { %4442 = vpow2.f32 %v3780_v52 }
0x26fa   :  { %v4443_v53 = vpop.eup %4442 }
0x26fb   :  { %v3500_v54 = vadd.f32 1.0, %v4443_v53 }
0x26fd   :  { %4444 = vrcp.f32 %v3500_v54 }
0x270a   :  { %v4445_v55 = vpop.eup %4444 }
0x270b   :  { %3504 = vst.msk [vmem:[%s5494_s15] sm:$0x3] %vm3503_vm7, %v4445_v55 }

</bundles_post_ra>
